<compile_context>
chip_gen: v7x
topology: tpu7x:2x2x1
jax: 0.10.0
libtpu: 0.0.40
codegen_flags: <defaults>
</compile_context>

<pallas_src>
import jax
import jax.numpy as jnp
from jax.experimental import pallas as pl
from jax.experimental.pallas import tpu as pltpu

# Plain Python float so it is traced as a literal (a jnp scalar here would be a
# captured constant and pallas_call rejects captured consts).
NEG_INF = float("-inf")


# ----------------------------------------------------------------------------
# Kernel 1: AlignedEmbedding (whole batch, single grid step)
#   x_e = relu(linear(c)); y_e = relu(linear(q))   -- fused into ONE matmul
#   scores = x_e @ y_e^T ; mask question padding -> -inf ; softmax
#   out = alpha @ q
# ----------------------------------------------------------------------------
def _aligned_kernel(c_ref, q_ref, m_ref, w_ref, b_ref, out_ref):
    B, Tc, E = c_ref.shape
    Tq = q_ref.shape[1]
    c = c_ref[...]                                    # (B, Tc, E)
    q = q_ref[...]                                    # (B, Tq, E)

    # Fused shared-linear projection: one (B*Tc + B*Tq, E) x (E, E) matmul.
    rows = jnp.concatenate([c.reshape(B * Tc, E), q.reshape(B * Tq, E)], axis=0)
    proj = jnp.maximum(
        jnp.dot(rows, w_ref[...], preferred_element_type=jnp.float32) + b_ref[...],
        0.0)
    x_e = proj[:B * Tc].reshape(B, Tc, E)
    y_e = proj[B * Tc:].reshape(B, Tq, E)

    # Batched scores on the MXU: (B, Tc, Tq)
    scores = jnp.einsum('bce,bqe->bcq', x_e, y_e,
                        preferred_element_type=jnp.float32)
    mask = m_ref[...]                                 # (B, 1, Tq) int32, 1 = padding
    scores = jnp.where(mask != 0, NEG_INF, scores)
    scores = scores - jnp.max(scores, axis=-1, keepdims=True)
    e = jnp.exp(scores)
    # (pl.reciprocal(approx=True) would move this divide to the EUP on HW; a plain
    #  divide is kept for exact softmax numerics / interpret-mode portability.)
    alpha = e / jnp.sum(e, axis=-1, keepdims=True)
    out_ref[...] = jnp.einsum('bcq,bqe->bce', alpha, q,
                              preferred_element_type=jnp.float32)


def aligned_embedding(c_embed, q_embed, q_mask, w_t, b):
    B, Tc, E = c_embed.shape
    Tq = q_embed.shape[1]
    mask3 = q_mask[:, None, :].astype(jnp.int32)      # (B, 1, Tq)
    return pl.pallas_call(
        _aligned_kernel,
        out_shape=jax.ShapeDtypeStruct((B, Tc, E), jnp.float32),
        grid=(1,),
        in_specs=[
            pl.BlockSpec((B, Tc, E), lambda i: (0, 0, 0)),
            pl.BlockSpec((B, Tq, E), lambda i: (0, 0, 0)),
            pl.BlockSpec((B, 1, Tq), lambda i: (0, 0, 0)),
            pl.BlockSpec((E, E), lambda i: (0, 0)),
            pl.BlockSpec((1, E), lambda i: (0, 0)),
        ],
        out_specs=pl.BlockSpec((B, Tc, E), lambda i: (0, 0, 0)),
    )(c_embed, q_embed, mask3, w_t, b)


# ----------------------------------------------------------------------------
# Kernel 2: one bidirectional LSTM layer.
#   grid=(2,) over directions (parallel -> can split across TensorCores on v7x).
#   PyTorch gate order: i, f, g, o.  b = b_ih + b_hh (combined).
#   Input projection hoisted out of the recurrence; backward direction reads/writes
#   t' = T-1-t in-kernel (no HBM flips, no batch/time transposes).
# ----------------------------------------------------------------------------
def _bilstm_layer_kernel(x_ref, wih_ref, whh_ref, b_ref, out_ref, gates_sc):
    # x_ref: (B,T,F) shared; wih_ref: (F,4H); whh_ref: (H,4H); b_ref: (1,4H)
    # out_ref: (B,T,H) for this direction; gates_sc: VMEM (B,T,4H)
    d = pl.program_id(0)                              # 0 = forward, 1 = backward
    B, T, F = x_ref.shape
    H = whh_ref.shape[0]

    # Hoisted input projection: one (B*T, F) x (F, 4H) matmul (+ bias).
    gx = jnp.dot(x_ref[...].reshape(B * T, F), wih_ref[...],
                 preferred_element_type=jnp.float32)
    gates_sc[...] = gx.reshape(B, T, 4 * H) + b_ref[...]
    whh = whh_ref[...]

    def step(t, carry):
        h, c = carry
        t_eff = jnp.where(d == 0, t, T - 1 - t)
        gx_t = gates_sc[:, pl.ds(t_eff, 1), :].reshape(B, 4 * H)
        gates = gx_t + jnp.dot(h, whh, preferred_element_type=jnp.float32)
        # TODO(synk): gate slices cut the 128-lane vreg at H=32 boundaries; pad H
        # to 128 (or stack gates on a leading axis) when scaling up.
        i_g = jax.nn.sigmoid(gates[:, 0 * H:1 * H])
        f_g = jax.nn.sigmoid(gates[:, 1 * H:2 * H])
        g_g = jnp.tanh(gates[:, 2 * H:3 * H])
        o_g = jax.nn.sigmoid(gates[:, 3 * H:4 * H])
        c_new = f_g * c + i_g * g_g
        h_new = o_g * jnp.tanh(c_new)
        out_ref[:, pl.ds(t_eff, 1), :] = h_new[:, None, :]
        return h_new, c_new

    h0 = jnp.zeros((B, H), jnp.float32)
    c0 = jnp.zeros((B, H), jnp.float32)
    # Short, static trip count -> fully unroll so the LLO scheduler can overlap
    # the EUP (sigmoid/tanh) pushes and the tiny h-matmuls across timesteps.
    jax.lax.fori_loop(0, T, step, (h0, c0), unroll=True)


def bilstm_layer(x, w_ih, w_hh, b):
    # x: (B, T, F); w_ih: (2, F, 4H); w_hh: (2, H, 4H); b: (2, 1, 4H)
    # TODO(synk): for long sequences, stream T-chunks of x / out (emit_pipeline)
    # instead of keeping the full sequence resident (v7x has only 64 MiB VMEM).
    B, T, F = x.shape
    H = w_hh.shape[1]
    out = pl.pallas_call(
        _bilstm_layer_kernel,
        out_shape=jax.ShapeDtypeStruct((2, B, T, H), jnp.float32),
        grid=(2,),
        in_specs=[
            pl.BlockSpec((B, T, F), lambda d: (0, 0, 0)),
            pl.BlockSpec((None, F, 4 * H), lambda d: (d, 0, 0)),
            pl.BlockSpec((None, H, 4 * H), lambda d: (d, 0, 0)),
            pl.BlockSpec((None, 1, 4 * H), lambda d: (d, 0, 0)),
        ],
        out_specs=pl.BlockSpec((None, B, T, H), lambda d: (d, 0, 0, 0)),
        scratch_shapes=[pltpu.VMEM((B, T, 4 * H), jnp.float32)],
        compiler_params=pltpu.CompilerParams(
            dimension_semantics=("parallel",)),
    )(x, w_ih, w_hh, b)
    # (2, B, T, H) -> (B, T, 2H): forward hidden first, backward hidden second.
    return jnp.concatenate([out[0], out[1]], axis=-1)


def bilstm(x, layers):
    for lp in layers:
        x = bilstm_layer(x, lp["w_ih"], lp["w_hh"], lp["b"])
    return x


# ----------------------------------------------------------------------------
# Kernel 3: output heads (whole batch, single grid step)
#   SelfAttentionLayer over q_rep -> alpha -> pooled q_vec
#   fused start/end CrossAttentionLayer scores over c_rep, masked, then exp.
#   Output is a single lane-dense (B, 2, Tc) slab (row 0 = start, row 1 = end).
# ----------------------------------------------------------------------------
def _heads_kernel(q_ref, c_ref, qm_ref, cm_ref,
                  wsa_ref, bsa_ref, wse_ref, bse_ref, out_ref):
    B, Tq, D = q_ref.shape
    q = q_ref[...]                                     # (B, Tq, D)
    c = c_ref[...]                                     # (B, Tc, D)

    # --- question self-attention pooling ---
    sa = jnp.sum(q * wsa_ref[...], axis=-1, keepdims=True) + bsa_ref[...]  # (B,Tq,1)
    sa = jnp.where(qm_ref[...] != 0, NEG_INF, sa)
    sa = sa - jnp.max(sa, axis=1, keepdims=True)
    e = jnp.exp(sa)
    alpha = e / jnp.sum(e, axis=1, keepdims=True)      # (B, Tq, 1)
    # TODO(synk): at larger Tq/D compute qv as an MXU matmul (alpha^T @ q) instead
    # of this VPU/XLU weighted sum.
    qv = jnp.sum(alpha * q, axis=1)                    # (B, D)

    # --- fused start/end projections: one (B,D) x (D,2D) matmul ---
    y = jnp.dot(qv, wse_ref[...], preferred_element_type=jnp.float32) + bse_ref[...]
    ys = y[:, :D][:, None, :]                          # (B, 1, D)
    ye = y[:, D:][:, None, :]                          # (B, 1, D)
    y2 = jnp.concatenate([ys, ye], axis=1)             # (B, 2, D)

    # lane-dense scores: (B, 2, Tc) with Tc on the lane axis
    scores = jnp.einsum('bsd,btd->bst', y2, c,
                        preferred_element_type=jnp.float32)
    scores = jnp.where(cm_ref[...] != 0, NEG_INF, scores)
    # NOTE: plain exp (no max subtraction) to match the reference torch.exp exactly;
    # safe for the small-scale synthetic weights used here.
    out_ref[...] = jnp.exp(scores)


def output_heads(q_rep, c_rep, q_mask, c_mask, p):
    B, Tq, D = q_rep.shape
    Tc = c_rep.shape[1]
    qm = q_mask[..., None].astype(jnp.int32)           # (B, Tq, 1)
    cm = c_mask[:, None, :].astype(jnp.int32)          # (B, 1, Tc)
    out = pl.pallas_call(
        _heads_kernel,
        out_shape=jax.ShapeDtypeStruct((B, 2, Tc), jnp.float32),
        grid=(1,),
        in_specs=[
            pl.BlockSpec((B, Tq, D), lambda i: (0, 0, 0)),
            pl.BlockSpec((B, Tc, D), lambda i: (0, 0, 0)),
            pl.BlockSpec((B, Tq, 1), lambda i: (0, 0, 0)),
            pl.BlockSpec((B, 1, Tc), lambda i: (0, 0, 0)),
            pl.BlockSpec((1, D), lambda i: (0, 0)),
            pl.BlockSpec((1, 1), lambda i: (0, 0)),
            pl.BlockSpec((D, 2 * D), lambda i: (0, 0)),
            pl.BlockSpec((1, 2 * D), lambda i: (0, 0)),
        ],
        out_specs=pl.BlockSpec((B, 2, Tc), lambda i: (0, 0, 0)),
    )(q_rep, c_rep, qm, cm, p["sa_w"], p["sa_b"], p["se_w"], p["se_b"])
    return out[:, 0, :], out[:, 1, :]


# ----------------------------------------------------------------------------
# Full forward (decode=True path)
# ----------------------------------------------------------------------------
def document_reader_forward(params, question, context, ans_ctx_ext_match):
    question_mask = (question == 0)                    # (B, Tq) bool
    context_mask = (context == 0)                      # (B, Tc) bool

    q_embed = params["embedding"][question]            # (B, Tq, E)
    c_embed = params["embedding"][context]             # (B, Tc, E)

    aligned = aligned_embedding(c_embed, q_embed, question_mask,
                                params["align_w"], params["align_b"])

    # in_dropout == identity (rate 0 / eval mode)
    c_in = jnp.concatenate(
        [c_embed, aligned, ans_ctx_ext_match[..., None]], axis=2)   # (B, Tc, 2E+1)

    q_rep = bilstm(q_embed, params["q_lstm"])          # (B, Tq, 2H)
    # TODO(synk): pack_padded_sequence assumed identity (all contexts equal length).
    c_rep = bilstm(c_in, params["c_lstm"])             # (B, Tc, 2H)

    start_p, end_p = output_heads(q_rep, c_rep, question_mask, context_mask, params)
    start_idx = jnp.argmax(start_p, axis=-1)
    end_idx = jnp.argmax(end_p, axis=-1)
    return start_p, end_p, start_idx, end_idx


# ----------------------------------------------------------------------------
# Deterministic synthetic parameters
# ----------------------------------------------------------------------------
def init_params(key, vocab_size, embed_size, hidden_size, ctx_in_size, num_layers=1):
    keys = iter(jax.random.split(key, 64))
    s = 0.1

    def nrm(shape, scale=s):
        return (jax.random.normal(next(keys), shape) * scale).astype(jnp.float32)

    def lstm_p(in_dim, H):
        # direction-stacked: index 0 = forward, 1 = backward; b = b_ih + b_hh combined
        return dict(w_ih=nrm((2, in_dim, 4 * H)),
                    w_hh=nrm((2, H, 4 * H)),
                    b=nrm((2, 1, 4 * H)))

    H, E = hidden_size, embed_size
    D = 2 * H
    p = dict(
        embedding=nrm((vocab_size, E), 0.5),
        align_w=nrm((E, E)), align_b=nrm((1, E)),
        sa_w=nrm((1, D)), sa_b=nrm((1, 1)),
        se_w=nrm((D, 2 * D)), se_b=nrm((1, 2 * D)),    # fused [start_w | end_w]
    )
    q_layers, c_layers = [], []
    q_in, c_in = E, ctx_in_size
    for _ in range(num_layers):
        q_layers.append(lstm_p(q_in, H))
        c_layers.append(lstm_p(c_in, H))
        q_in = c_in = 2 * H
    p["q_lstm"] = q_layers
    p["c_lstm"] = c_layers
    return p


if __name__ == "__main__":
    B, Tq, Tc = 2, 8, 12
    VOCAB, E, H = 50, 32, 32
    CTX_IN = E + E + 1   # context embed + aligned embed + exact-match feature

    key = jax.random.PRNGKey(0)
    kp, kq, kc, km = jax.random.split(key, 4)

    params = init_params(kp, VOCAB, E, H, CTX_IN, num_layers=1)

    # question: batch 1 has 3 padded (token id 0) positions at the end
    question = jax.random.randint(kq, (B, Tq), 1, VOCAB, dtype=jnp.int32)
    question = question.at[1, Tq - 3:].set(0)
    # context: all tokens valid (equal lengths -> packing is identity)
    context = jax.random.randint(kc, (B, Tc), 1, VOCAB, dtype=jnp.int32)
    ans_ctx_ext_match = jax.random.bernoulli(km, 0.3, (B, Tc)).astype(jnp.float32)

    fwd = jax.jit(document_reader_forward)
    start_p, end_p, start_idx, end_idx = fwd(params, question, context, ans_ctx_ext_match)
    jax.block_until_ready((start_p, end_p, start_idx, end_idx))

    assert start_p.shape == (B, Tc) and end_p.shape == (B, Tc)
    assert start_idx.shape == (B,) and end_idx.shape == (B,)
    assert bool(jnp.all(jnp.isfinite(start_p))) and bool(jnp.all(jnp.isfinite(end_p)))
    print("KERNEL_OK")
</pallas_src>

<mosaic_0001>
module attributes {stable_mosaic.version = 11 : i64} {
  func.func @_aligned_kernel(%arg0: i32, %arg1: memref<2x12x32xf32, #tpu.memory_space<vmem>>, %arg2: memref<2x8x32xf32, #tpu.memory_space<vmem>>, %arg3: memref<2x1x8xi32, #tpu.memory_space<vmem>>, %arg4: memref<32x32xf32, #tpu.memory_space<vmem>>, %arg5: memref<1x32xf32, #tpu.memory_space<vmem>>, %arg6: memref<2x12x32xf32, #tpu.memory_space<vmem>>) attributes {dimension_semantics = [#tpu.dimension_semantics<arbitrary>], iteration_bounds = array<i64: 1>, scalar_prefetch = 0 : i64, scratch_operands = 0 : i64, tpu.core_type = #tpu.core_type<tc>, window_params = [{pipeline_mode = #tpu.pipeline_mode<synchronous>, transform_indices = @transform_0, window_bounds = array<i64: 2, 12, 32>}, {pipeline_mode = #tpu.pipeline_mode<synchronous>, transform_indices = @transform_1, window_bounds = array<i64: 2, 8, 32>}, {pipeline_mode = #tpu.pipeline_mode<synchronous>, transform_indices = @transform_2, window_bounds = array<i64: 2, 1, 8>}, {pipeline_mode = #tpu.pipeline_mode<synchronous>, transform_indices = @transform_3, window_bounds = array<i64: 32, 32>}, {pipeline_mode = #tpu.pipeline_mode<synchronous>, transform_indices = @transform_4, window_bounds = array<i64: 1, 32>}, {pipeline_mode = #tpu.pipeline_mode<synchronous>, transform_indices = @transform_5, window_bounds = array<i64: 2, 12, 32>}]} {
    %c0 = arith.constant 0 : index
    %c0_0 = arith.constant 0 : index
    %c0_1 = arith.constant 0 : index
    %0 = vector.load %arg1[%c0, %c0_0, %c0_1] : memref<2x12x32xf32, #tpu.memory_space<vmem>>, vector<2x12x32xf32>
    %c0_2 = arith.constant 0 : index
    %c0_3 = arith.constant 0 : index
    %c0_4 = arith.constant 0 : index
    %1 = vector.load %arg2[%c0_2, %c0_3, %c0_4] : memref<2x8x32xf32, #tpu.memory_space<vmem>>, vector<2x8x32xf32>
    %2 = vector.shape_cast %0 : vector<2x12x32xf32> to vector<24x32xf32>
    %3 = vector.shape_cast %1 : vector<2x8x32xf32> to vector<16x32xf32>
    %4 = tpu.concatenate %2, %3 in 0 : vector<24x32xf32>, vector<16x32xf32> -> vector<40x32xf32>
    %c0_5 = arith.constant 0 : index
    %c0_6 = arith.constant 0 : index
    %5 = vector.load %arg4[%c0_5, %c0_6] : memref<32x32xf32, #tpu.memory_space<vmem>>, vector<32x32xf32>
    %cst = arith.constant dense<0.000000e+00> : vector<40x32xf32>
    %6 = tpu.matmul %4, %5, %cst {dimension_numbers = #tpu.dot_dimension_numbers<[1], [0], [0], [1], [0, 0, 1, 1], [], []>} : vector<40x32xf32>, vector<32x32xf32>, vector<40x32xf32> -> vector<40x32xf32>
    %c0_7 = arith.constant 0 : index
    %c0_8 = arith.constant 0 : index
    %7 = vector.load %arg5[%c0_7, %c0_8] : memref<1x32xf32, #tpu.memory_space<vmem>>, vector<1x32xf32>
    %8 = vector.broadcast %7 : vector<1x32xf32> to vector<40x32xf32>
    %9 = arith.addf %6, %8 : vector<40x32xf32>
    %cst_9 = arith.constant 0.000000e+00 : f32
    %10 = vector.broadcast %cst_9 : f32 to vector<40x32xf32>
    %11 = arith.maximumf %9, %10 : vector<40x32xf32>
    %12 = vector.extract_strided_slice %11 {offsets = [0, 0], sizes = [24, 32], strides = [1, 1]} : vector<40x32xf32> to vector<24x32xf32>
    %13 = vector.shape_cast %12 : vector<24x32xf32> to vector<2x12x32xf32>
    %14 = vector.extract_strided_slice %11 {offsets = [24, 0], sizes = [16, 32], strides = [1, 1]} : vector<40x32xf32> to vector<16x32xf32>
    %15 = vector.shape_cast %14 : vector<16x32xf32> to vector<2x8x32xf32>
    "tpu.trace_start"() <{level = 10 : i32, message = "bce,bqe->bcq"}> : () -> ()
    %cst_10 = arith.constant dense<0.000000e+00> : vector<2x12x8xf32>
    %16 = tpu.matmul %13, %15, %cst_10 {dimension_numbers = #tpu.dot_dimension_numbers<[2], [2], [1], [1], [0, 0, 0, 1, 1, 1], [0], [0]>} : vector<2x12x32xf32>, vector<2x8x32xf32>, vector<2x12x8xf32> -> vector<2x12x8xf32>
    "tpu.trace_stop"() : () -> ()
    %c0_11 = arith.constant 0 : index
    %c0_12 = arith.constant 0 : index
    %c0_13 = arith.constant 0 : index
    %17 = vector.load %arg3[%c0_11, %c0_12, %c0_13] : memref<2x1x8xi32, #tpu.memory_space<vmem>>, vector<2x1x8xi32>
    %c0_i32 = arith.constant 0 : i32
    %18 = vector.broadcast %c0_i32 : i32 to vector<2x1x8xi32>
    %19 = arith.cmpi ne, %17, %18 : vector<2x1x8xi32>
    %cst_14 = arith.constant 0xFF800000 : f32
    %20 = vector.shape_cast %19 : vector<2x1x8xi1> to vector<2x1x8xi1>
    %21 = vector.broadcast %20 : vector<2x1x8xi1> to vector<2x12x8xi1>
    %22 = vector.broadcast %cst_14 : f32 to vector<2x12x8xf32>
    %23 = arith.select %21, %22, %16 : vector<2x12x8xi1>, vector<2x12x8xf32>
    %cst_15 = arith.constant dense<0xFF800000> : vector<2x12xf32>
    %24 = vector.multi_reduction <maximumf>, %23, %cst_15 [2] : vector<2x12x8xf32> to vector<2x12xf32>
    %25 = vector.shape_cast %24 : vector<2x12xf32> to vector<2x12x1xf32>
    %26 = vector.broadcast %25 : vector<2x12x1xf32> to vector<2x12x8xf32>
    %27 = arith.subf %23, %26 : vector<2x12x8xf32>
    %28 = math.exp %27 : vector<2x12x8xf32>
    %cst_16 = arith.constant dense<0.000000e+00> : vector<2x12xf32>
    %29 = vector.multi_reduction <add>, %28, %cst_16 [2] : vector<2x12x8xf32> to vector<2x12xf32>
    %30 = vector.shape_cast %29 : vector<2x12xf32> to vector<2x12x1xf32>
    %31 = vector.broadcast %30 : vector<2x12x1xf32> to vector<2x12x8xf32>
    %32 = arith.divf %28, %31 : vector<2x12x8xf32>
    "tpu.trace_start"() <{level = 10 : i32, message = "bcq,bqe->bce"}> : () -> ()
    %cst_17 = arith.constant dense<0.000000e+00> : vector<2x12x32xf32>
    %33 = tpu.matmul %32, %1, %cst_17 {dimension_numbers = #tpu.dot_dimension_numbers<[2], [1], [1], [2], [0, 0, 0, 1, 1, 2], [0], [0]>} : vector<2x12x8xf32>, vector<2x8x32xf32>, vector<2x12x32xf32> -> vector<2x12x32xf32>
    "tpu.trace_stop"() : () -> ()
    %c0_18 = arith.constant 0 : index
    %c0_19 = arith.constant 0 : index
    %c0_20 = arith.constant 0 : index
    %34 = vector.load %arg6[%c0_18, %c0_19, %c0_20] : memref<2x12x32xf32, #tpu.memory_space<vmem>>, vector<2x12x32xf32>
    tpu.vector_store %arg6[%c0_18, %c0_19, %c0_20], %33 {strides = array<i32>} : memref<2x12x32xf32, #tpu.memory_space<vmem>>, vector<2x12x32xf32>,
    return
  }
  func.func @transform_0(%arg0: i32) -> (i32, i32, i32) {
    %c0_i32 = arith.constant 0 : i32
    %c0_i32_0 = arith.constant 0 : i32
    %c0_i32_1 = arith.constant 0 : i32
    %c0_i32_2 = arith.constant 0 : i32
    return %c0_i32, %c0_i32_0, %c0_i32_1 : i32, i32, i32
  }
  func.func @transform_1(%arg0: i32) -> (i32, i32, i32) {
    %c0_i32 = arith.constant 0 : i32
    %c0_i32_0 = arith.constant 0 : i32
    %c0_i32_1 = arith.constant 0 : i32
    %c0_i32_2 = arith.constant 0 : i32
    return %c0_i32, %c0_i32_0, %c0_i32_1 : i32, i32, i32
  }
  func.func @transform_2(%arg0: i32) -> (i32, i32, i32) {
    %c0_i32 = arith.constant 0 : i32
    %c0_i32_0 = arith.constant 0 : i32
    %c0_i32_1 = arith.constant 0 : i32
    %c0_i32_2 = arith.constant 0 : i32
    return %c0_i32, %c0_i32_0, %c0_i32_1 : i32, i32, i32
  }
  func.func @transform_3(%arg0: i32) -> (i32, i32) {
    %c0_i32 = arith.constant 0 : i32
    %c0_i32_0 = arith.constant 0 : i32
    %c0_i32_1 = arith.constant 0 : i32
    return %c0_i32, %c0_i32_0 : i32, i32
  }
  func.func @transform_4(%arg0: i32) -> (i32, i32) {
    %c0_i32 = arith.constant 0 : i32
    %c0_i32_0 = arith.constant 0 : i32
    %c0_i32_1 = arith.constant 0 : i32
    return %c0_i32, %c0_i32_0 : i32, i32
  }
  func.func @transform_5(%arg0: i32) -> (i32, i32, i32) {
    %c0_i32 = arith.constant 0 : i32
    %c0_i32_0 = arith.constant 0 : i32
    %c0_i32_1 = arith.constant 0 : i32
    %c0_i32_2 = arith.constant 0 : i32
    return %c0_i32, %c0_i32_0, %c0_i32_1 : i32, i32, i32
  }
}

module attributes {stable_mosaic.version = 11 : i64} {
  func.func @_bilstm_layer_kernel(%arg0: i32, %arg1: memref<2x12x65xf32, #tpu.memory_space<vmem>>, %arg2: memref<1x65x128xf32, #tpu.memory_space<vmem>>, %arg3: memref<1x32x128xf32, #tpu.memory_space<vmem>>, %arg4: memref<1x1x128xf32, #tpu.memory_space<vmem>>, %arg5: memref<1x2x12x32xf32, #tpu.memory_space<vmem>>, %arg6: memref<2x12x128xf32, #tpu.memory_space<vmem>>) attributes {dimension_semantics = [#tpu.dimension_semantics<parallel>], iteration_bounds = array<i64: 2>, scalar_prefetch = 0 : i64, scratch_operands = 1 : i64, tpu.core_type = #tpu.core_type<tc>, window_params = [{pipeline_mode = #tpu.pipeline_mode<synchronous>, transform_indices = @transform_0, window_bounds = array<i64: 2, 12, 65>}, {transform_indices = @transform_1, window_bounds = array<i64: 1, 65, 128>}, {transform_indices = @transform_2, window_bounds = array<i64: 1, 32, 128>}, {transform_indices = @transform_3, window_bounds = array<i64: 1, 1, 128>}, {transform_indices = @transform_4, window_bounds = array<i64: 1, 2, 12, 32>}]} {
    %c0 = arith.constant 0 : index
    %c0_0 = arith.constant 0 : index
    %c0_1 = arith.constant 0 : index
    %0 = vector.load %arg1[%c0, %c0_0, %c0_1] : memref<2x12x65xf32, #tpu.memory_space<vmem>>, vector<2x12x65xf32>
    %1 = vector.shape_cast %0 : vector<2x12x65xf32> to vector<24x65xf32>
    %c0_2 = arith.constant 0 : index
    %c0_3 = arith.constant 0 : index
    %c0_4 = arith.constant 0 : index
    %2 = vector.load %arg2[%c0_2, %c0_3, %c0_4] : memref<1x65x128xf32, #tpu.memory_space<vmem>>, vector<1x65x128xf32>
    %3 = vector.shape_cast %2 : vector<1x65x128xf32> to vector<65x128xf32>
    %cst = arith.constant dense<0.000000e+00> : vector<24x128xf32>
    %4 = tpu.matmul %1, %3, %cst {dimension_numbers = #tpu.dot_dimension_numbers<[1], [0], [0], [1], [0, 0, 1, 1], [], []>} : vector<24x65xf32>, vector<65x128xf32>, vector<24x128xf32> -> vector<24x128xf32>
    %5 = vector.shape_cast %4 : vector<24x128xf32> to vector<2x12x128xf32>
    %c0_5 = arith.constant 0 : index
    %c0_6 = arith.constant 0 : index
    %c0_7 = arith.constant 0 : index
    %6 = vector.load %arg4[%c0_5, %c0_6, %c0_7] : memref<1x1x128xf32, #tpu.memory_space<vmem>>, vector<1x1x128xf32>
    %7 = vector.shape_cast %6 : vector<1x1x128xf32> to vector<1x128xf32>
    %8 = vector.shape_cast %7 : vector<1x128xf32> to vector<1x1x128xf32>
    %9 = vector.broadcast %8 : vector<1x1x128xf32> to vector<2x12x128xf32>
    %10 = arith.addf %5, %9 : vector<2x12x128xf32>
    %c0_8 = arith.constant 0 : index
    %c0_9 = arith.constant 0 : index
    %c0_10 = arith.constant 0 : index
    %11 = vector.load %arg6[%c0_8, %c0_9, %c0_10] : memref<2x12x128xf32, #tpu.memory_space<vmem>>, vector<2x12x128xf32>
    tpu.vector_store %arg6[%c0_8, %c0_9, %c0_10], %10 {strides = array<i32>} : memref<2x12x128xf32, #tpu.memory_space<vmem>>, vector<2x12x128xf32>,
    %c0_11 = arith.constant 0 : index
    %c0_12 = arith.constant 0 : index
    %c0_13 = arith.constant 0 : index
    %12 = vector.load %arg3[%c0_11, %c0_12, %c0_13] : memref<1x32x128xf32, #tpu.memory_space<vmem>>, vector<1x32x128xf32>
    %13 = vector.shape_cast %12 : vector<1x32x128xf32> to vector<32x128xf32>
    %cst_14 = arith.constant 0.000000e+00 : f32
    %14 = vector.broadcast %cst_14 : f32 to vector<2x32xf32>
    %cst_15 = arith.constant 0.000000e+00 : f32
    %15 = vector.broadcast %cst_15 : f32 to vector<2x32xf32>
    %c0_i32 = arith.constant 0 : i32
    %c0_i32_16 = arith.constant 0 : i32
    %16 = arith.cmpi eq, %arg0, %c0_i32_16 : i32
    %c11_i32 = arith.constant 11 : i32
    %17 = arith.subi %c11_i32, %c0_i32 : i32
    %18 = arith.select %16, %c0_i32, %17 : i32
    %c0_17 = arith.constant 0 : index
    %19 = arith.index_cast %18 : i32 to index
    %c0_18 = arith.constant 0 : index
    %20 = vector.load %arg6[%c0_17, %19, %c0_18] : memref<2x12x128xf32, #tpu.memory_space<vmem>>, vector<2x1x128xf32>
    %21 = vector.shape_cast %20 : vector<2x1x128xf32> to vector<2x128xf32>
    %cst_19 = arith.constant dense<0.000000e+00> : vector<2x128xf32>
    %22 = tpu.matmul %14, %13, %cst_19 {dimension_numbers = #tpu.dot_dimension_numbers<[1], [0], [0], [1], [0, 0, 1, 1], [], []>} : vector<2x32xf32>, vector<32x128xf32>, vector<2x128xf32> -> vector<2x128xf32>
    %23 = arith.addf %21, %22 : vector<2x128xf32>
    %24 = vector.extract_strided_slice %23 {offsets = [0, 0], sizes = [2, 32], strides = [1, 1]} : vector<2x128xf32> to vector<2x32xf32>
    %25 = arith.negf %24 : vector<2x32xf32>
    %26 = math.exp %25 : vector<2x32xf32>
    %cst_20 = arith.constant 1.000000e+00 : f32
    %27 = vector.broadcast %cst_20 : f32 to vector<2x32xf32>
    %28 = arith.addf %27, %26 : vector<2x32xf32>
    %29 = arith.divf %27, %28 : vector<2x32xf32>
    %30 = vector.extract_strided_slice %23 {offsets = [0, 32], sizes = [2, 32], strides = [1, 1]} : vector<2x128xf32> to vector<2x32xf32>
    %31 = arith.negf %30 : vector<2x32xf32>
    %32 = math.exp %31 : vector<2x32xf32>
    %cst_21 = arith.constant 1.000000e+00 : f32
    %33 = vector.broadcast %cst_21 : f32 to vector<2x32xf32>
    %34 = arith.addf %33, %32 : vector<2x32xf32>
    %35 = arith.divf %33, %34 : vector<2x32xf32>
    %36 = vector.extract_strided_slice %23 {offsets = [0, 64], sizes = [2, 32], strides = [1, 1]} : vector<2x128xf32> to vector<2x32xf32>
    %37 = math.tanh %36 : vector<2x32xf32>
    %38 = vector.extract_strided_slice %23 {offsets = [0, 96], sizes = [2, 32], strides = [1, 1]} : vector<2x128xf32> to vector<2x32xf32>
    %39 = arith.negf %38 : vector<2x32xf32>
    %40 = math.exp %39 : vector<2x32xf32>
    %cst_22 = arith.constant 1.000000e+00 : f32
    %41 = vector.broadcast %cst_22 : f32 to vector<2x32xf32>
    %42 = arith.addf %41, %40 : vector<2x32xf32>
    %43 = arith.divf %41, %42 : vector<2x32xf32>
    %44 = arith.mulf %35, %15 : vector<2x32xf32>
    %45 = arith.mulf %29, %37 : vector<2x32xf32>
    %46 = arith.addf %44, %45 : vector<2x32xf32>
    %47 = math.tanh %46 : vector<2x32xf32>
    %48 = arith.mulf %43, %47 : vector<2x32xf32>
    %49 = vector.shape_cast %48 : vector<2x32xf32> to vector<2x1x32xf32>
    %c0_23 = arith.constant 0 : index
    %c0_24 = arith.constant 0 : index
    %50 = arith.index_cast %18 : i32 to index
    %c0_25 = arith.constant 0 : index
    %51 = vector.load %arg5[%c0_23, %c0_24, %50, %c0_25] : memref<1x2x12x32xf32, #tpu.memory_space<vmem>>, vector<1x2x1x32xf32>
    %52 = vector.shape_cast %51 : vector<1x2x1x32xf32> to vector<2x1x32xf32>
    %53 = vector.shape_cast %49 : vector<2x1x32xf32> to vector<1x2x1x32xf32>
    tpu.vector_store %arg5[%c0_23, %c0_24, %50, %c0_25], %53 {strides = array<i32>} : memref<1x2x12x32xf32, #tpu.memory_space<vmem>>, vector<1x2x1x32xf32>,
    %c1_i32 = arith.constant 1 : i32
    %c0_i32_26 = arith.constant 0 : i32
    %54 = arith.cmpi eq, %arg0, %c0_i32_26 : i32
    %c11_i32_27 = arith.constant 11 : i32
    %55 = arith.subi %c11_i32_27, %c1_i32 : i32
    %56 = arith.select %54, %c1_i32, %55 : i32
    %c0_28 = arith.constant 0 : index
    %57 = arith.index_cast %56 : i32 to index
    %c0_29 = arith.constant 0 : index
    %58 = vector.load %arg6[%c0_28, %57, %c0_29] : memref<2x12x128xf32, #tpu.memory_space<vmem>>, vector<2x1x128xf32>
    %59 = vector.shape_cast %58 : vector<2x1x128xf32> to vector<2x128xf32>
    %cst_30 = arith.constant dense<0.000000e+00> : vector<2x128xf32>
    %60 = tpu.matmul %48, %13, %cst_30 {dimension_numbers = #tpu.dot_dimension_numbers<[1], [0], [0], [1], [0, 0, 1, 1], [], []>} : vector<2x32xf32>, vector<32x128xf32>, vector<2x128xf32> -> vector<2x128xf32>
    %61 = arith.addf %59, %60 : vector<2x128xf32>
    %62 = vector.extract_strided_slice %61 {offsets = [0, 0], sizes = [2, 32], strides = [1, 1]} : vector<2x128xf32> to vector<2x32xf32>
    %63 = arith.negf %62 : vector<2x32xf32>
    %64 = math.exp %63 : vector<2x32xf32>
    %cst_31 = arith.constant 1.000000e+00 : f32
    %65 = vector.broadcast %cst_31 : f32 to vector<2x32xf32>
    %66 = arith.addf %65, %64 : vector<2x32xf32>
    %67 = arith.divf %65, %66 : vector<2x32xf32>
    %68 = vector.extract_strided_slice %61 {offsets = [0, 32], sizes = [2, 32], strides = [1, 1]} : vector<2x128xf32> to vector<2x32xf32>
    %69 = arith.negf %68 : vector<2x32xf32>
    %70 = math.exp %69 : vector<2x32xf32>
    %cst_32 = arith.constant 1.000000e+00 : f32
    %71 = vector.broadcast %cst_32 : f32 to vector<2x32xf32>
    %72 = arith.addf %71, %70 : vector<2x32xf32>
    %73 = arith.divf %71, %72 : vector<2x32xf32>
    %74 = vector.extract_strided_slice %61 {offsets = [0, 64], sizes = [2, 32], strides = [1, 1]} : vector<2x128xf32> to vector<2x32xf32>
    %75 = math.tanh %74 : vector<2x32xf32>
    %76 = vector.extract_strided_slice %61 {offsets = [0, 96], sizes = [2, 32], strides = [1, 1]} : vector<2x128xf32> to vector<2x32xf32>
    %77 = arith.negf %76 : vector<2x32xf32>
    %78 = math.exp %77 : vector<2x32xf32>
    %cst_33 = arith.constant 1.000000e+00 : f32
    %79 = vector.broadcast %cst_33 : f32 to vector<2x32xf32>
    %80 = arith.addf %79, %78 : vector<2x32xf32>
    %81 = arith.divf %79, %80 : vector<2x32xf32>
    %82 = arith.mulf %73, %46 : vector<2x32xf32>
    %83 = arith.mulf %67, %75 : vector<2x32xf32>
    %84 = arith.addf %82, %83 : vector<2x32xf32>
    %85 = math.tanh %84 : vector<2x32xf32>
    %86 = arith.mulf %81, %85 : vector<2x32xf32>
    %87 = vector.shape_cast %86 : vector<2x32xf32> to vector<2x1x32xf32>
    %c0_34 = arith.constant 0 : index
    %c0_35 = arith.constant 0 : index
    %88 = arith.index_cast %56 : i32 to index
    %c0_36 = arith.constant 0 : index
    %89 = vector.load %arg5[%c0_34, %c0_35, %88, %c0_36] : memref<1x2x12x32xf32, #tpu.memory_space<vmem>>, vector<1x2x1x32xf32>
    %90 = vector.shape_cast %89 : vector<1x2x1x32xf32> to vector<2x1x32xf32>
    %91 = vector.shape_cast %87 : vector<2x1x32xf32> to vector<1x2x1x32xf32>
    tpu.vector_store %arg5[%c0_34, %c0_35, %88, %c0_36], %91 {strides = array<i32>} : memref<1x2x12x32xf32, #tpu.memory_space<vmem>>, vector<1x2x1x32xf32>,
    %c2_i32 = arith.constant 2 : i32
    %c0_i32_37 = arith.constant 0 : i32
    %92 = arith.cmpi eq, %arg0, %c0_i32_37 : i32
    %c11_i32_38 = arith.constant 11 : i32
    %93 = arith.subi %c11_i32_38, %c2_i32 : i32
    %94 = arith.select %92, %c2_i32, %93 : i32
    %c0_39 = arith.constant 0 : index
    %95 = arith.index_cast %94 : i32 to index
    %c0_40 = arith.constant 0 : index
    %96 = vector.load %arg6[%c0_39, %95, %c0_40] : memref<2x12x128xf32, #tpu.memory_space<vmem>>, vector<2x1x128xf32>
    %97 = vector.shape_cast %96 : vector<2x1x128xf32> to vector<2x128xf32>
    %cst_41 = arith.constant dense<0.000000e+00> : vector<2x128xf32>
    %98 = tpu.matmul %86, %13, %cst_41 {dimension_numbers = #tpu.dot_dimension_numbers<[1], [0], [0], [1], [0, 0, 1, 1], [], []>} : vector<2x32xf32>, vector<32x128xf32>, vector<2x128xf32> -> vector<2x128xf32>
    %99 = arith.addf %97, %98 : vector<2x128xf32>
    %100 = vector.extract_strided_slice %99 {offsets = [0, 0], sizes = [2, 32], strides = [1, 1]} : vector<2x128xf32> to vector<2x32xf32>
    %101 = arith.negf %100 : vector<2x32xf32>
    %102 = math.exp %101 : vector<2x32xf32>
    %cst_42 = arith.constant 1.000000e+00 : f32
    %103 = vector.broadcast %cst_42 : f32 to vector<2x32xf32>
    %104 = arith.addf %103, %102 : vector<2x32xf32>
    %105 = arith.divf %103, %104 : vector<2x32xf32>
    %106 = vector.extract_strided_slice %99 {offsets = [0, 32], sizes = [2, 32], strides = [1, 1]} : vector<2x128xf32> to vector<2x32xf32>
    %107 = arith.negf %106 : vector<2x32xf32>
    %108 = math.exp %107 : vector<2x32xf32>
    %cst_43 = arith.constant 1.000000e+00 : f32
    %109 = vector.broadcast %cst_43 : f32 to vector<2x32xf32>
    %110 = arith.addf %109, %108 : vector<2x32xf32>
    %111 = arith.divf %109, %110 : vector<2x32xf32>
    %112 = vector.extract_strided_slice %99 {offsets = [0, 64], sizes = [2, 32], strides = [1, 1]} : vector<2x128xf32> to vector<2x32xf32>
    %113 = math.tanh %112 : vector<2x32xf32>
    %114 = vector.extract_strided_slice %99 {offsets = [0, 96], sizes = [2, 32], strides = [1, 1]} : vector<2x128xf32> to vector<2x32xf32>
    %115 = arith.negf %114 : vector<2x32xf32>
    %116 = math.exp %115 : vector<2x32xf32>
    %cst_44 = arith.constant 1.000000e+00 : f32
    %117 = vector.broadcast %cst_44 : f32 to vector<2x32xf32>
    %118 = arith.addf %117, %116 : vector<2x32xf32>
    %119 = arith.divf %117, %118 : vector<2x32xf32>
    %120 = arith.mulf %111, %84 : vector<2x32xf32>
    %121 = arith.mulf %105, %113 : vector<2x32xf32>
    %122 = arith.addf %120, %121 : vector<2x32xf32>
    %123 = math.tanh %122 : vector<2x32xf32>
    %124 = arith.mulf %119, %123 : vector<2x32xf32>
    %125 = vector.shape_cast %124 : vector<2x32xf32> to vector<2x1x32xf32>
    %c0_45 = arith.constant 0 : index
    %c0_46 = arith.constant 0 : index
    %126 = arith.index_cast %94 : i32 to index
    %c0_47 = arith.constant 0 : index
    %127 = vector.load %arg5[%c0_45, %c0_46, %126, %c0_47] : memref<1x2x12x32xf32, #tpu.memory_space<vmem>>, vector<1x2x1x32xf32>
    %128 = vector.shape_cast %127 : vector<1x2x1x32xf32> to vector<2x1x32xf32>
    %129 = vector.shape_cast %125 : vector<2x1x32xf32> to vector<1x2x1x32xf32>
    tpu.vector_store %arg5[%c0_45, %c0_46, %126, %c0_47], %129 {strides = array<i32>} : memref<1x2x12x32xf32, #tpu.memory_space<vmem>>, vector<1x2x1x32xf32>,
    %c3_i32 = arith.constant 3 : i32
    %c0_i32_48 = arith.constant 0 : i32
    %130 = arith.cmpi eq, %arg0, %c0_i32_48 : i32
    %c11_i32_49 = arith.constant 11 : i32
    %131 = arith.subi %c11_i32_49, %c3_i32 : i32
    %132 = arith.select %130, %c3_i32, %131 : i32
    %c0_50 = arith.constant 0 : index
    %133 = arith.index_cast %132 : i32 to index
    %c0_51 = arith.constant 0 : index
    %134 = vector.load %arg6[%c0_50, %133, %c0_51] : memref<2x12x128xf32, #tpu.memory_space<vmem>>, vector<2x1x128xf32>
    %135 = vector.shape_cast %134 : vector<2x1x128xf32> to vector<2x128xf32>
    %cst_52 = arith.constant dense<0.000000e+00> : vector<2x128xf32>
    %136 = tpu.matmul %124, %13, %cst_52 {dimension_numbers = #tpu.dot_dimension_numbers<[1], [0], [0], [1], [0, 0, 1, 1], [], []>} : vector<2x32xf32>, vector<32x128xf32>, vector<2x128xf32> -> vector<2x128xf32>
    %137 = arith.addf %135, %136 : vector<2x128xf32>
    %138 = vector.extract_strided_slice %137 {offsets = [0, 0], sizes = [2, 32], strides = [1, 1]} : vector<2x128xf32> to vector<2x32xf32>
    %139 = arith.negf %138 : vector<2x32xf32>
    %140 = math.exp %139 : vector<2x32xf32>
    %cst_53 = arith.constant 1.000000e+00 : f32
    %141 = vector.broadcast %cst_53 : f32 to vector<2x32xf32>
    %142 = arith.addf %141, %140 : vector<2x32xf32>
    %143 = arith.divf %141, %142 : vector<2x32xf32>
    %144 = vector.extract_strided_slice %137 {offsets = [0, 32], sizes = [2, 32], strides = [1, 1]} : vector<2x128xf32> to vector<2x32xf32>
    %145 = arith.negf %144 : vector<2x32xf32>
    %146 = math.exp %145 : vector<2x32xf32>
    %cst_54 = arith.constant 1.000000e+00 : f32
    %147 = vector.broadcast %cst_54 : f32 to vector<2x32xf32>
    %148 = arith.addf %147, %146 : vector<2x32xf32>
    %149 = arith.divf %147, %148 : vector<2x32xf32>
    %150 = vector.extract_strided_slice %137 {offsets = [0, 64], sizes = [2, 32], strides = [1, 1]} : vector<2x128xf32> to vector<2x32xf32>
    %151 = math.tanh %150 : vector<2x32xf32>
    %152 = vector.extract_strided_slice %137 {offsets = [0, 96], sizes = [2, 32], strides = [1, 1]} : vector<2x128xf32> to vector<2x32xf32>
    %153 = arith.negf %152 : vector<2x32xf32>
    %154 = math.exp %153 : vector<2x32xf32>
    %cst_55 = arith.constant 1.000000e+00 : f32
    %155 = vector.broadcast %cst_55 : f32 to vector<2x32xf32>
    %156 = arith.addf %155, %154 : vector<2x32xf32>
    %157 = arith.divf %155, %156 : vector<2x32xf32>
    %158 = arith.mulf %149, %122 : vector<2x32xf32>
    %159 = arith.mulf %143, %151 : vector<2x32xf32>
    %160 = arith.addf %158, %159 : vector<2x32xf32>
    %161 = math.tanh %160 : vector<2x32xf32>
    %162 = arith.mulf %157, %161 : vector<2x32xf32>
    %163 = vector.shape_cast %162 : vector<2x32xf32> to vector<2x1x32xf32>
    %c0_56 = arith.constant 0 : index
    %c0_57 = arith.constant 0 : index
    %164 = arith.index_cast %132 : i32 to index
    %c0_58 = arith.constant 0 : index
    %165 = vector.load %arg5[%c0_56, %c0_57, %164, %c0_58] : memref<1x2x12x32xf32, #tpu.memory_space<vmem>>, vector<1x2x1x32xf32>
    %166 = vector.shape_cast %165 : vector<1x2x1x32xf32> to vector<2x1x32xf32>
    %167 = vector.shape_cast %163 : vector<2x1x32xf32> to vector<1x2x1x32xf32>
    tpu.vector_store %arg5[%c0_56, %c0_57, %164, %c0_58], %167 {strides = array<i32>} : memref<1x2x12x32xf32, #tpu.memory_space<vmem>>, vector<1x2x1x32xf32>,
    %c4_i32 = arith.constant 4 : i32
    %c0_i32_59 = arith.constant 0 : i32
    %168 = arith.cmpi eq, %arg0, %c0_i32_59 : i32
    %c11_i32_60 = arith.constant 11 : i32
    %169 = arith.subi %c11_i32_60, %c4_i32 : i32
    %170 = arith.select %168, %c4_i32, %169 : i32
    %c0_61 = arith.constant 0 : index
    %171 = arith.index_cast %170 : i32 to index
    %c0_62 = arith.constant 0 : index
    %172 = vector.load %arg6[%c0_61, %171, %c0_62] : memref<2x12x128xf32, #tpu.memory_space<vmem>>, vector<2x1x128xf32>
    %173 = vector.shape_cast %172 : vector<2x1x128xf32> to vector<2x128xf32>
    %cst_63 = arith.constant dense<0.000000e+00> : vector<2x128xf32>
    %174 = tpu.matmul %162, %13, %cst_63 {dimension_numbers = #tpu.dot_dimension_numbers<[1], [0], [0], [1], [0, 0, 1, 1], [], []>} : vector<2x32xf32>, vector<32x128xf32>, vector<2x128xf32> -> vector<2x128xf32>
    %175 = arith.addf %173, %174 : vector<2x128xf32>
    %176 = vector.extract_strided_slice %175 {offsets = [0, 0], sizes = [2, 32], strides = [1, 1]} : vector<2x128xf32> to vector<2x32xf32>
    %177 = arith.negf %176 : vector<2x32xf32>
    %178 = math.exp %177 : vector<2x32xf32>
    %cst_64 = arith.constant 1.000000e+00 : f32
    %179 = vector.broadcast %cst_64 : f32 to vector<2x32xf32>
    %180 = arith.addf %179, %178 : vector<2x32xf32>
    %181 = arith.divf %179, %180 : vector<2x32xf32>
    %182 = vector.extract_strided_slice %175 {offsets = [0, 32], sizes = [2, 32], strides = [1, 1]} : vector<2x128xf32> to vector<2x32xf32>
    %183 = arith.negf %182 : vector<2x32xf32>
    %184 = math.exp %183 : vector<2x32xf32>
    %cst_65 = arith.constant 1.000000e+00 : f32
    %185 = vector.broadcast %cst_65 : f32 to vector<2x32xf32>
    %186 = arith.addf %185, %184 : vector<2x32xf32>
    %187 = arith.divf %185, %186 : vector<2x32xf32>
    %188 = vector.extract_strided_slice %175 {offsets = [0, 64], sizes = [2, 32], strides = [1, 1]} : vector<2x128xf32> to vector<2x32xf32>
    %189 = math.tanh %188 : vector<2x32xf32>
    %190 = vector.extract_strided_slice %175 {offsets = [0, 96], sizes = [2, 32], strides = [1, 1]} : vector<2x128xf32> to vector<2x32xf32>
    %191 = arith.negf %190 : vector<2x32xf32>
    %192 = math.exp %191 : vector<2x32xf32>
    %cst_66 = arith.constant 1.000000e+00 : f32
    %193 = vector.broadcast %cst_66 : f32 to vector<2x32xf32>
    %194 = arith.addf %193, %192 : vector<2x32xf32>
    %195 = arith.divf %193, %194 : vector<2x32xf32>
    %196 = arith.mulf %187, %160 : vector<2x32xf32>
    %197 = arith.mulf %181, %189 : vector<2x32xf32>
    %198 = arith.addf %196, %197 : vector<2x32xf32>
    %199 = math.tanh %198 : vector<2x32xf32>
    %200 = arith.mulf %195, %199 : vector<2x32xf32>
    %201 = vector.shape_cast %200 : vector<2x32xf32> to vector<2x1x32xf32>
    %c0_67 = arith.constant 0 : index
    %c0_68 = arith.constant 0 : index
    %202 = arith.index_cast %170 : i32 to index
    %c0_69 = arith.constant 0 : index
    %203 = vector.load %arg5[%c0_67, %c0_68, %202, %c0_69] : memref<1x2x12x32xf32, #tpu.memory_space<vmem>>, vector<1x2x1x32xf32>
    %204 = vector.shape_cast %203 : vector<1x2x1x32xf32> to vector<2x1x32xf32>
    %205 = vector.shape_cast %201 : vector<2x1x32xf32> to vector<1x2x1x32xf32>
    tpu.vector_store %arg5[%c0_67, %c0_68, %202, %c0_69], %205 {strides = array<i32>} : memref<1x2x12x32xf32, #tpu.memory_space<vmem>>, vector<1x2x1x32xf32>,
    %c5_i32 = arith.constant 5 : i32
    %c0_i32_70 = arith.constant 0 : i32
    %206 = arith.cmpi eq, %arg0, %c0_i32_70 : i32
    %c11_i32_71 = arith.constant 11 : i32
    %207 = arith.subi %c11_i32_71, %c5_i32 : i32
    %208 = arith.select %206, %c5_i32, %207 : i32
    %c0_72 = arith.constant 0 : index
    %209 = arith.index_cast %208 : i32 to index
    %c0_73 = arith.constant 0 : index
    %210 = vector.load %arg6[%c0_72, %209, %c0_73] : memref<2x12x128xf32, #tpu.memory_space<vmem>>, vector<2x1x128xf32>
    %211 = vector.shape_cast %210 : vector<2x1x128xf32> to vector<2x128xf32>
    %cst_74 = arith.constant dense<0.000000e+00> : vector<2x128xf32>
    %212 = tpu.matmul %200, %13, %cst_74 {dimension_numbers = #tpu.dot_dimension_numbers<[1], [0], [0], [1], [0, 0, 1, 1], [], []>} : vector<2x32xf32>, vector<32x128xf32>, vector<2x128xf32> -> vector<2x128xf32>
    %213 = arith.addf %211, %212 : vector<2x128xf32>
    %214 = vector.extract_strided_slice %213 {offsets = [0, 0], sizes = [2, 32], strides = [1, 1]} : vector<2x128xf32> to vector<2x32xf32>
    %215 = arith.negf %214 : vector<2x32xf32>
    %216 = math.exp %215 : vector<2x32xf32>
    %cst_75 = arith.constant 1.000000e+00 : f32
    %217 = vector.broadcast %cst_75 : f32 to vector<2x32xf32>
    %218 = arith.addf %217, %216 : vector<2x32xf32>
    %219 = arith.divf %217, %218 : vector<2x32xf32>
    %220 = vector.extract_strided_slice %213 {offsets = [0, 32], sizes = [2, 32], strides = [1, 1]} : vector<2x128xf32> to vector<2x32xf32>
    %221 = arith.negf %220 : vector<2x32xf32>
    %222 = math.exp %221 : vector<2x32xf32>
    %cst_76 = arith.constant 1.000000e+00 : f32
    %223 = vector.broadcast %cst_76 : f32 to vector<2x32xf32>
    %224 = arith.addf %223, %222 : vector<2x32xf32>
    %225 = arith.divf %223, %224 : vector<2x32xf32>
    %226 = vector.extract_strided_slice %213 {offsets = [0, 64], sizes = [2, 32], strides = [1, 1]} : vector<2x128xf32> to vector<2x32xf32>
    %227 = math.tanh %226 : vector<2x32xf32>
    %228 = vector.extract_strided_slice %213 {offsets = [0, 96], sizes = [2, 32], strides = [1, 1]} : vector<2x128xf32> to vector<2x32xf32>
    %229 = arith.negf %228 : vector<2x32xf32>
    %230 = math.exp %229 : vector<2x32xf32>
    %cst_77 = arith.constant 1.000000e+00 : f32
    %231 = vector.broadcast %cst_77 : f32 to vector<2x32xf32>
    %232 = arith.addf %231, %230 : vector<2x32xf32>
    %233 = arith.divf %231, %232 : vector<2x32xf32>
    %234 = arith.mulf %225, %198 : vector<2x32xf32>
    %235 = arith.mulf %219, %227 : vector<2x32xf32>
    %236 = arith.addf %234, %235 : vector<2x32xf32>
    %237 = math.tanh %236 : vector<2x32xf32>
    %238 = arith.mulf %233, %237 : vector<2x32xf32>
    %239 = vector.shape_cast %238 : vector<2x32xf32> to vector<2x1x32xf32>
    %c0_78 = arith.constant 0 : index
    %c0_79 = arith.constant 0 : index
    %240 = arith.index_cast %208 : i32 to index
    %c0_80 = arith.constant 0 : index
    %241 = vector.load %arg5[%c0_78, %c0_79, %240, %c0_80] : memref<1x2x12x32xf32, #tpu.memory_space<vmem>>, vector<1x2x1x32xf32>
    %242 = vector.shape_cast %241 : vector<1x2x1x32xf32> to vector<2x1x32xf32>
    %243 = vector.shape_cast %239 : vector<2x1x32xf32> to vector<1x2x1x32xf32>
    tpu.vector_store %arg5[%c0_78, %c0_79, %240, %c0_80], %243 {strides = array<i32>} : memref<1x2x12x32xf32, #tpu.memory_space<vmem>>, vector<1x2x1x32xf32>,
    %c6_i32 = arith.constant 6 : i32
    %c0_i32_81 = arith.constant 0 : i32
    %244 = arith.cmpi eq, %arg0, %c0_i32_81 : i32
    %c11_i32_82 = arith.constant 11 : i32
    %245 = arith.subi %c11_i32_82, %c6_i32 : i32
    %246 = arith.select %244, %c6_i32, %245 : i32
    %c0_83 = arith.constant 0 : index
    %247 = arith.index_cast %246 : i32 to index
    %c0_84 = arith.constant 0 : index
    %248 = vector.load %arg6[%c0_83, %247, %c0_84] : memref<2x12x128xf32, #tpu.memory_space<vmem>>, vector<2x1x128xf32>
    %249 = vector.shape_cast %248 : vector<2x1x128xf32> to vector<2x128xf32>
    %cst_85 = arith.constant dense<0.000000e+00> : vector<2x128xf32>
    %250 = tpu.matmul %238, %13, %cst_85 {dimension_numbers = #tpu.dot_dimension_numbers<[1], [0], [0], [1], [0, 0, 1, 1], [], []>} : vector<2x32xf32>, vector<32x128xf32>, vector<2x128xf32> -> vector<2x128xf32>
    %251 = arith.addf %249, %250 : vector<2x128xf32>
    %252 = vector.extract_strided_slice %251 {offsets = [0, 0], sizes = [2, 32], strides = [1, 1]} : vector<2x128xf32> to vector<2x32xf32>
    %253 = arith.negf %252 : vector<2x32xf32>
    %254 = math.exp %253 : vector<2x32xf32>
    %cst_86 = arith.constant 1.000000e+00 : f32
    %255 = vector.broadcast %cst_86 : f32 to vector<2x32xf32>
    %256 = arith.addf %255, %254 : vector<2x32xf32>
    %257 = arith.divf %255, %256 : vector<2x32xf32>
    %258 = vector.extract_strided_slice %251 {offsets = [0, 32], sizes = [2, 32], strides = [1, 1]} : vector<2x128xf32> to vector<2x32xf32>
    %259 = arith.negf %258 : vector<2x32xf32>
    %260 = math.exp %259 : vector<2x32xf32>
    %cst_87 = arith.constant 1.000000e+00 : f32
    %261 = vector.broadcast %cst_87 : f32 to vector<2x32xf32>
    %262 = arith.addf %261, %260 : vector<2x32xf32>
    %263 = arith.divf %261, %262 : vector<2x32xf32>
    %264 = vector.extract_strided_slice %251 {offsets = [0, 64], sizes = [2, 32], strides = [1, 1]} : vector<2x128xf32> to vector<2x32xf32>
    %265 = math.tanh %264 : vector<2x32xf32>
    %266 = vector.extract_strided_slice %251 {offsets = [0, 96], sizes = [2, 32], strides = [1, 1]} : vector<2x128xf32> to vector<2x32xf32>
    %267 = arith.negf %266 : vector<2x32xf32>
    %268 = math.exp %267 : vector<2x32xf32>
    %cst_88 = arith.constant 1.000000e+00 : f32
    %269 = vector.broadcast %cst_88 : f32 to vector<2x32xf32>
    %270 = arith.addf %269, %268 : vector<2x32xf32>
    %271 = arith.divf %269, %270 : vector<2x32xf32>
    %272 = arith.mulf %263, %236 : vector<2x32xf32>
    %273 = arith.mulf %257, %265 : vector<2x32xf32>
    %274 = arith.addf %272, %273 : vector<2x32xf32>
    %275 = math.tanh %274 : vector<2x32xf32>
    %276 = arith.mulf %271, %275 : vector<2x32xf32>
    %277 = vector.shape_cast %276 : vector<2x32xf32> to vector<2x1x32xf32>
    %c0_89 = arith.constant 0 : index
    %c0_90 = arith.constant 0 : index
    %278 = arith.index_cast %246 : i32 to index
    %c0_91 = arith.constant 0 : index
    %279 = vector.load %arg5[%c0_89, %c0_90, %278, %c0_91] : memref<1x2x12x32xf32, #tpu.memory_space<vmem>>, vector<1x2x1x32xf32>
    %280 = vector.shape_cast %279 : vector<1x2x1x32xf32> to vector<2x1x32xf32>
    %281 = vector.shape_cast %277 : vector<2x1x32xf32> to vector<1x2x1x32xf32>
    tpu.vector_store %arg5[%c0_89, %c0_90, %278, %c0_91], %281 {strides = array<i32>} : memref<1x2x12x32xf32, #tpu.memory_space<vmem>>, vector<1x2x1x32xf32>,
    %c7_i32 = arith.constant 7 : i32
    %c0_i32_92 = arith.constant 0 : i32
    %282 = arith.cmpi eq, %arg0, %c0_i32_92 : i32
    %c11_i32_93 = arith.constant 11 : i32
    %283 = arith.subi %c11_i32_93, %c7_i32 : i32
    %284 = arith.select %282, %c7_i32, %283 : i32
    %c0_94 = arith.constant 0 : index
    %285 = arith.index_cast %284 : i32 to index
    %c0_95 = arith.constant 0 : index
    %286 = vector.load %arg6[%c0_94, %285, %c0_95] : memref<2x12x128xf32, #tpu.memory_space<vmem>>, vector<2x1x128xf32>
    %287 = vector.shape_cast %286 : vector<2x1x128xf32> to vector<2x128xf32>
    %cst_96 = arith.constant dense<0.000000e+00> : vector<2x128xf32>
    %288 = tpu.matmul %276, %13, %cst_96 {dimension_numbers = #tpu.dot_dimension_numbers<[1], [0], [0], [1], [0, 0, 1, 1], [], []>} : vector<2x32xf32>, vector<32x128xf32>, vector<2x128xf32> -> vector<2x128xf32>
    %289 = arith.addf %287, %288 : vector<2x128xf32>
    %290 = vector.extract_strided_slice %289 {offsets = [0, 0], sizes = [2, 32], strides = [1, 1]} : vector<2x128xf32> to vector<2x32xf32>
    %291 = arith.negf %290 : vector<2x32xf32>
    %292 = math.exp %291 : vector<2x32xf32>
    %cst_97 = arith.constant 1.000000e+00 : f32
    %293 = vector.broadcast %cst_97 : f32 to vector<2x32xf32>
    %294 = arith.addf %293, %292 : vector<2x32xf32>
    %295 = arith.divf %293, %294 : vector<2x32xf32>
    %296 = vector.extract_strided_slice %289 {offsets = [0, 32], sizes = [2, 32], strides = [1, 1]} : vector<2x128xf32> to vector<2x32xf32>
    %297 = arith.negf %296 : vector<2x32xf32>
    %298 = math.exp %297 : vector<2x32xf32>
    %cst_98 = arith.constant 1.000000e+00 : f32
    %299 = vector.broadcast %cst_98 : f32 to vector<2x32xf32>
    %300 = arith.addf %299, %298 : vector<2x32xf32>
    %301 = arith.divf %299, %300 : vector<2x32xf32>
    %302 = vector.extract_strided_slice %289 {offsets = [0, 64], sizes = [2, 32], strides = [1, 1]} : vector<2x128xf32> to vector<2x32xf32>
    %303 = math.tanh %302 : vector<2x32xf32>
    %304 = vector.extract_strided_slice %289 {offsets = [0, 96], sizes = [2, 32], strides = [1, 1]} : vector<2x128xf32> to vector<2x32xf32>
    %305 = arith.negf %304 : vector<2x32xf32>
    %306 = math.exp %305 : vector<2x32xf32>
    %cst_99 = arith.constant 1.000000e+00 : f32
    %307 = vector.broadcast %cst_99 : f32 to vector<2x32xf32>
    %308 = arith.addf %307, %306 : vector<2x32xf32>
    %309 = arith.divf %307, %308 : vector<2x32xf32>
    %310 = arith.mulf %301, %274 : vector<2x32xf32>
    %311 = arith.mulf %295, %303 : vector<2x32xf32>
    %312 = arith.addf %310, %311 : vector<2x32xf32>
    %313 = math.tanh %312 : vector<2x32xf32>
    %314 = arith.mulf %309, %313 : vector<2x32xf32>
    %315 = vector.shape_cast %314 : vector<2x32xf32> to vector<2x1x32xf32>
    %c0_100 = arith.constant 0 : index
    %c0_101 = arith.constant 0 : index
    %316 = arith.index_cast %284 : i32 to index
    %c0_102 = arith.constant 0 : index
    %317 = vector.load %arg5[%c0_100, %c0_101, %316, %c0_102] : memref<1x2x12x32xf32, #tpu.memory_space<vmem>>, vector<1x2x1x32xf32>
    %318 = vector.shape_cast %317 : vector<1x2x1x32xf32> to vector<2x1x32xf32>
    %319 = vector.shape_cast %315 : vector<2x1x32xf32> to vector<1x2x1x32xf32>
    tpu.vector_store %arg5[%c0_100, %c0_101, %316, %c0_102], %319 {strides = array<i32>} : memref<1x2x12x32xf32, #tpu.memory_space<vmem>>, vector<1x2x1x32xf32>,
    %c8_i32 = arith.constant 8 : i32
    %c0_i32_103 = arith.constant 0 : i32
    %320 = arith.cmpi eq, %arg0, %c0_i32_103 : i32
    %c11_i32_104 = arith.constant 11 : i32
    %321 = arith.subi %c11_i32_104, %c8_i32 : i32
    %322 = arith.select %320, %c8_i32, %321 : i32
    %c0_105 = arith.constant 0 : index
    %323 = arith.index_cast %322 : i32 to index
    %c0_106 = arith.constant 0 : index
    %324 = vector.load %arg6[%c0_105, %323, %c0_106] : memref<2x12x128xf32, #tpu.memory_space<vmem>>, vector<2x1x128xf32>
    %325 = vector.shape_cast %324 : vector<2x1x128xf32> to vector<2x128xf32>
    %cst_107 = arith.constant dense<0.000000e+00> : vector<2x128xf32>
    %326 = tpu.matmul %314, %13, %cst_107 {dimension_numbers = #tpu.dot_dimension_numbers<[1], [0], [0], [1], [0, 0, 1, 1], [], []>} : vector<2x32xf32>, vector<32x128xf32>, vector<2x128xf32> -> vector<2x128xf32>
    %327 = arith.addf %325, %326 : vector<2x128xf32>
    %328 = vector.extract_strided_slice %327 {offsets = [0, 0], sizes = [2, 32], strides = [1, 1]} : vector<2x128xf32> to vector<2x32xf32>
    %329 = arith.negf %328 : vector<2x32xf32>
    %330 = math.exp %329 : vector<2x32xf32>
    %cst_108 = arith.constant 1.000000e+00 : f32
    %331 = vector.broadcast %cst_108 : f32 to vector<2x32xf32>
    %332 = arith.addf %331, %330 : vector<2x32xf32>
    %333 = arith.divf %331, %332 : vector<2x32xf32>
    %334 = vector.extract_strided_slice %327 {offsets = [0, 32], sizes = [2, 32], strides = [1, 1]} : vector<2x128xf32> to vector<2x32xf32>
    %335 = arith.negf %334 : vector<2x32xf32>
    %336 = math.exp %335 : vector<2x32xf32>
    %cst_109 = arith.constant 1.000000e+00 : f32
    %337 = vector.broadcast %cst_109 : f32 to vector<2x32xf32>
    %338 = arith.addf %337, %336 : vector<2x32xf32>
    %339 = arith.divf %337, %338 : vector<2x32xf32>
    %340 = vector.extract_strided_slice %327 {offsets = [0, 64], sizes = [2, 32], strides = [1, 1]} : vector<2x128xf32> to vector<2x32xf32>
    %341 = math.tanh %340 : vector<2x32xf32>
    %342 = vector.extract_strided_slice %327 {offsets = [0, 96], sizes = [2, 32], strides = [1, 1]} : vector<2x128xf32> to vector<2x32xf32>
    %343 = arith.negf %342 : vector<2x32xf32>
    %344 = math.exp %343 : vector<2x32xf32>
    %cst_110 = arith.constant 1.000000e+00 : f32
    %345 = vector.broadcast %cst_110 : f32 to vector<2x32xf32>
    %346 = arith.addf %345, %344 : vector<2x32xf32>
    %347 = arith.divf %345, %346 : vector<2x32xf32>
    %348 = arith.mulf %339, %312 : vector<2x32xf32>
    %349 = arith.mulf %333, %341 : vector<2x32xf32>
    %350 = arith.addf %348, %349 : vector<2x32xf32>
    %351 = math.tanh %350 : vector<2x32xf32>
    %352 = arith.mulf %347, %351 : vector<2x32xf32>
    %353 = vector.shape_cast %352 : vector<2x32xf32> to vector<2x1x32xf32>
    %c0_111 = arith.constant 0 : index
    %c0_112 = arith.constant 0 : index
    %354 = arith.index_cast %322 : i32 to index
    %c0_113 = arith.constant 0 : index
    %355 = vector.load %arg5[%c0_111, %c0_112, %354, %c0_113] : memref<1x2x12x32xf32, #tpu.memory_space<vmem>>, vector<1x2x1x32xf32>
    %356 = vector.shape_cast %355 : vector<1x2x1x32xf32> to vector<2x1x32xf32>
    %357 = vector.shape_cast %353 : vector<2x1x32xf32> to vector<1x2x1x32xf32>
    tpu.vector_store %arg5[%c0_111, %c0_112, %354, %c0_113], %357 {strides = array<i32>} : memref<1x2x12x32xf32, #tpu.memory_space<vmem>>, vector<1x2x1x32xf32>,
    %c9_i32 = arith.constant 9 : i32
    %c0_i32_114 = arith.constant 0 : i32
    %358 = arith.cmpi eq, %arg0, %c0_i32_114 : i32
    %c11_i32_115 = arith.constant 11 : i32
    %359 = arith.subi %c11_i32_115, %c9_i32 : i32
    %360 = arith.select %358, %c9_i32, %359 : i32
    %c0_116 = arith.constant 0 : index
    %361 = arith.index_cast %360 : i32 to index
    %c0_117 = arith.constant 0 : index
    %362 = vector.load %arg6[%c0_116, %361, %c0_117] : memref<2x12x128xf32, #tpu.memory_space<vmem>>, vector<2x1x128xf32>
    %363 = vector.shape_cast %362 : vector<2x1x128xf32> to vector<2x128xf32>
    %cst_118 = arith.constant dense<0.000000e+00> : vector<2x128xf32>
    %364 = tpu.matmul %352, %13, %cst_118 {dimension_numbers = #tpu.dot_dimension_numbers<[1], [0], [0], [1], [0, 0, 1, 1], [], []>} : vector<2x32xf32>, vector<32x128xf32>, vector<2x128xf32> -> vector<2x128xf32>
    %365 = arith.addf %363, %364 : vector<2x128xf32>
    %366 = vector.extract_strided_slice %365 {offsets = [0, 0], sizes = [2, 32], strides = [1, 1]} : vector<2x128xf32> to vector<2x32xf32>
    %367 = arith.negf %366 : vector<2x32xf32>
    %368 = math.exp %367 : vector<2x32xf32>
    %cst_119 = arith.constant 1.000000e+00 : f32
    %369 = vector.broadcast %cst_119 : f32 to vector<2x32xf32>
    %370 = arith.addf %369, %368 : vector<2x32xf32>
    %371 = arith.divf %369, %370 : vector<2x32xf32>
    %372 = vector.extract_strided_slice %365 {offsets = [0, 32], sizes = [2, 32], strides = [1, 1]} : vector<2x128xf32> to vector<2x32xf32>
    %373 = arith.negf %372 : vector<2x32xf32>
    %374 = math.exp %373 : vector<2x32xf32>
    %cst_120 = arith.constant 1.000000e+00 : f32
    %375 = vector.broadcast %cst_120 : f32 to vector<2x32xf32>
    %376 = arith.addf %375, %374 : vector<2x32xf32>
    %377 = arith.divf %375, %376 : vector<2x32xf32>
    %378 = vector.extract_strided_slice %365 {offsets = [0, 64], sizes = [2, 32], strides = [1, 1]} : vector<2x128xf32> to vector<2x32xf32>
    %379 = math.tanh %378 : vector<2x32xf32>
    %380 = vector.extract_strided_slice %365 {offsets = [0, 96], sizes = [2, 32], strides = [1, 1]} : vector<2x128xf32> to vector<2x32xf32>
    %381 = arith.negf %380 : vector<2x32xf32>
    %382 = math.exp %381 : vector<2x32xf32>
    %cst_121 = arith.constant 1.000000e+00 : f32
    %383 = vector.broadcast %cst_121 : f32 to vector<2x32xf32>
    %384 = arith.addf %383, %382 : vector<2x32xf32>
    %385 = arith.divf %383, %384 : vector<2x32xf32>
    %386 = arith.mulf %377, %350 : vector<2x32xf32>
    %387 = arith.mulf %371, %379 : vector<2x32xf32>
    %388 = arith.addf %386, %387 : vector<2x32xf32>
    %389 = math.tanh %388 : vector<2x32xf32>
    %390 = arith.mulf %385, %389 : vector<2x32xf32>
    %391 = vector.shape_cast %390 : vector<2x32xf32> to vector<2x1x32xf32>
    %c0_122 = arith.constant 0 : index
    %c0_123 = arith.constant 0 : index
    %392 = arith.index_cast %360 : i32 to index
    %c0_124 = arith.constant 0 : index
    %393 = vector.load %arg5[%c0_122, %c0_123, %392, %c0_124] : memref<1x2x12x32xf32, #tpu.memory_space<vmem>>, vector<1x2x1x32xf32>
    %394 = vector.shape_cast %393 : vector<1x2x1x32xf32> to vector<2x1x32xf32>
    %395 = vector.shape_cast %391 : vector<2x1x32xf32> to vector<1x2x1x32xf32>
    tpu.vector_store %arg5[%c0_122, %c0_123, %392, %c0_124], %395 {strides = array<i32>} : memref<1x2x12x32xf32, #tpu.memory_space<vmem>>, vector<1x2x1x32xf32>,
    %c10_i32 = arith.constant 10 : i32
    %c0_i32_125 = arith.constant 0 : i32
    %396 = arith.cmpi eq, %arg0, %c0_i32_125 : i32
    %c11_i32_126 = arith.constant 11 : i32
    %397 = arith.subi %c11_i32_126, %c10_i32 : i32
    %398 = arith.select %396, %c10_i32, %397 : i32
    %c0_127 = arith.constant 0 : index
    %399 = arith.index_cast %398 : i32 to index
    %c0_128 = arith.constant 0 : index
    %400 = vector.load %arg6[%c0_127, %399, %c0_128] : memref<2x12x128xf32, #tpu.memory_space<vmem>>, vector<2x1x128xf32>
    %401 = vector.shape_cast %400 : vector<2x1x128xf32> to vector<2x128xf32>
    %cst_129 = arith.constant dense<0.000000e+00> : vector<2x128xf32>
    %402 = tpu.matmul %390, %13, %cst_129 {dimension_numbers = #tpu.dot_dimension_numbers<[1], [0], [0], [1], [0, 0, 1, 1], [], []>} : vector<2x32xf32>, vector<32x128xf32>, vector<2x128xf32> -> vector<2x128xf32>
    %403 = arith.addf %401, %402 : vector<2x128xf32>
    %404 = vector.extract_strided_slice %403 {offsets = [0, 0], sizes = [2, 32], strides = [1, 1]} : vector<2x128xf32> to vector<2x32xf32>
    %405 = arith.negf %404 : vector<2x32xf32>
    %406 = math.exp %405 : vector<2x32xf32>
    %cst_130 = arith.constant 1.000000e+00 : f32
    %407 = vector.broadcast %cst_130 : f32 to vector<2x32xf32>
    %408 = arith.addf %407, %406 : vector<2x32xf32>
    %409 = arith.divf %407, %408 : vector<2x32xf32>
    %410 = vector.extract_strided_slice %403 {offsets = [0, 32], sizes = [2, 32], strides = [1, 1]} : vector<2x128xf32> to vector<2x32xf32>
    %411 = arith.negf %410 : vector<2x32xf32>
    %412 = math.exp %411 : vector<2x32xf32>
    %cst_131 = arith.constant 1.000000e+00 : f32
    %413 = vector.broadcast %cst_131 : f32 to vector<2x32xf32>
    %414 = arith.addf %413, %412 : vector<2x32xf32>
    %415 = arith.divf %413, %414 : vector<2x32xf32>
    %416 = vector.extract_strided_slice %403 {offsets = [0, 64], sizes = [2, 32], strides = [1, 1]} : vector<2x128xf32> to vector<2x32xf32>
    %417 = math.tanh %416 : vector<2x32xf32>
    %418 = vector.extract_strided_slice %403 {offsets = [0, 96], sizes = [2, 32], strides = [1, 1]} : vector<2x128xf32> to vector<2x32xf32>
    %419 = arith.negf %418 : vector<2x32xf32>
    %420 = math.exp %419 : vector<2x32xf32>
    %cst_132 = arith.constant 1.000000e+00 : f32
    %421 = vector.broadcast %cst_132 : f32 to vector<2x32xf32>
    %422 = arith.addf %421, %420 : vector<2x32xf32>
    %423 = arith.divf %421, %422 : vector<2x32xf32>
    %424 = arith.mulf %415, %388 : vector<2x32xf32>
    %425 = arith.mulf %409, %417 : vector<2x32xf32>
    %426 = arith.addf %424, %425 : vector<2x32xf32>
    %427 = math.tanh %426 : vector<2x32xf32>
    %428 = arith.mulf %423, %427 : vector<2x32xf32>
    %429 = vector.shape_cast %428 : vector<2x32xf32> to vector<2x1x32xf32>
    %c0_133 = arith.constant 0 : index
    %c0_134 = arith.constant 0 : index
    %430 = arith.index_cast %398 : i32 to index
    %c0_135 = arith.constant 0 : index
    %431 = vector.load %arg5[%c0_133, %c0_134, %430, %c0_135] : memref<1x2x12x32xf32, #tpu.memory_space<vmem>>, vector<1x2x1x32xf32>
    %432 = vector.shape_cast %431 : vector<1x2x1x32xf32> to vector<2x1x32xf32>
    %433 = vector.shape_cast %429 : vector<2x1x32xf32> to vector<1x2x1x32xf32>
    tpu.vector_store %arg5[%c0_133, %c0_134, %430, %c0_135], %433 {strides = array<i32>} : memref<1x2x12x32xf32, #tpu.memory_space<vmem>>, vector<1x2x1x32xf32>,
    %c11_i32_136 = arith.constant 11 : i32
    %c0_i32_137 = arith.constant 0 : i32
    %434 = arith.cmpi eq, %arg0, %c0_i32_137 : i32
    %c11_i32_138 = arith.constant 11 : i32
    %435 = arith.subi %c11_i32_138, %c11_i32_136 : i32
    %436 = arith.select %434, %c11_i32_136, %435 : i32
    %c0_139 = arith.constant 0 : index
    %437 = arith.index_cast %436 : i32 to index
    %c0_140 = arith.constant 0 : index
    %438 = vector.load %arg6[%c0_139, %437, %c0_140] : memref<2x12x128xf32, #tpu.memory_space<vmem>>, vector<2x1x128xf32>
    %439 = vector.shape_cast %438 : vector<2x1x128xf32> to vector<2x128xf32>
    %cst_141 = arith.constant dense<0.000000e+00> : vector<2x128xf32>
    %440 = tpu.matmul %428, %13, %cst_141 {dimension_numbers = #tpu.dot_dimension_numbers<[1], [0], [0], [1], [0, 0, 1, 1], [], []>} : vector<2x32xf32>, vector<32x128xf32>, vector<2x128xf32> -> vector<2x128xf32>
    %441 = arith.addf %439, %440 : vector<2x128xf32>
    %442 = vector.extract_strided_slice %441 {offsets = [0, 0], sizes = [2, 32], strides = [1, 1]} : vector<2x128xf32> to vector<2x32xf32>
    %443 = arith.negf %442 : vector<2x32xf32>
    %444 = math.exp %443 : vector<2x32xf32>
    %cst_142 = arith.constant 1.000000e+00 : f32
    %445 = vector.broadcast %cst_142 : f32 to vector<2x32xf32>
    %446 = arith.addf %445, %444 : vector<2x32xf32>
    %447 = arith.divf %445, %446 : vector<2x32xf32>
    %448 = vector.extract_strided_slice %441 {offsets = [0, 32], sizes = [2, 32], strides = [1, 1]} : vector<2x128xf32> to vector<2x32xf32>
    %449 = arith.negf %448 : vector<2x32xf32>
    %450 = math.exp %449 : vector<2x32xf32>
    %cst_143 = arith.constant 1.000000e+00 : f32
    %451 = vector.broadcast %cst_143 : f32 to vector<2x32xf32>
    %452 = arith.addf %451, %450 : vector<2x32xf32>
    %453 = arith.divf %451, %452 : vector<2x32xf32>
    %454 = vector.extract_strided_slice %441 {offsets = [0, 64], sizes = [2, 32], strides = [1, 1]} : vector<2x128xf32> to vector<2x32xf32>
    %455 = math.tanh %454 : vector<2x32xf32>
    %456 = vector.extract_strided_slice %441 {offsets = [0, 96], sizes = [2, 32], strides = [1, 1]} : vector<2x128xf32> to vector<2x32xf32>
    %457 = arith.negf %456 : vector<2x32xf32>
    %458 = math.exp %457 : vector<2x32xf32>
    %cst_144 = arith.constant 1.000000e+00 : f32
    %459 = vector.broadcast %cst_144 : f32 to vector<2x32xf32>
    %460 = arith.addf %459, %458 : vector<2x32xf32>
    %461 = arith.divf %459, %460 : vector<2x32xf32>
    %462 = arith.mulf %453, %426 : vector<2x32xf32>
    %463 = arith.mulf %447, %455 : vector<2x32xf32>
    %464 = arith.addf %462, %463 : vector<2x32xf32>
    %465 = math.tanh %464 : vector<2x32xf32>
    %466 = arith.mulf %461, %465 : vector<2x32xf32>
    %467 = vector.shape_cast %466 : vector<2x32xf32> to vector<2x1x32xf32>
    %c0_145 = arith.constant 0 : index
    %c0_146 = arith.constant 0 : index
    %468 = arith.index_cast %436 : i32 to index
    %c0_147 = arith.constant 0 : index
    %469 = vector.load %arg5[%c0_145, %c0_146, %468, %c0_147] : memref<1x2x12x32xf32, #tpu.memory_space<vmem>>, vector<1x2x1x32xf32>
    %470 = vector.shape_cast %469 : vector<1x2x1x32xf32> to vector<2x1x32xf32>
    %471 = vector.shape_cast %467 : vector<2x1x32xf32> to vector<1x2x1x32xf32>
    tpu.vector_store %arg5[%c0_145, %c0_146, %468, %c0_147], %471 {strides = array<i32>} : memref<1x2x12x32xf32, #tpu.memory_space<vmem>>, vector<1x2x1x32xf32>,
    %c12_i32 = arith.constant 12 : i32
    return
  }
  func.func @transform_0(%arg0: i32) -> (i32, i32, i32) {
    %c0_i32 = arith.constant 0 : i32
    %c0_i32_0 = arith.constant 0 : i32
    %c0_i32_1 = arith.constant 0 : i32
    %c0_i32_2 = arith.constant 0 : i32
    return %c0_i32, %c0_i32_0, %c0_i32_1 : i32, i32, i32
  }
  func.func @transform_1(%arg0: i32) -> (i32, i32, i32) {
    %c0_i32 = arith.constant 0 : i32
    %c0_i32_0 = arith.constant 0 : i32
    %c0_i32_1 = arith.constant 0 : i32
    return %arg0, %c0_i32, %c0_i32_0 : i32, i32, i32
  }
  func.func @transform_2(%arg0: i32) -> (i32, i32, i32) {
    %c0_i32 = arith.constant 0 : i32
    %c0_i32_0 = arith.constant 0 : i32
    %c0_i32_1 = arith.constant 0 : i32
    return %arg0, %c0_i32, %c0_i32_0 : i32, i32, i32
  }
  func.func @transform_3(%arg0: i32) -> (i32, i32, i32) {
    %c0_i32 = arith.constant 0 : i32
    %c0_i32_0 = arith.constant 0 : i32
    %c0_i32_1 = arith.constant 0 : i32
    return %arg0, %c0_i32, %c0_i32_0 : i32, i32, i32
  }
  func.func @transform_4(%arg0: i32) -> (i32, i32, i32, i32) {
    %c0_i32 = arith.constant 0 : i32
    %c0_i32_0 = arith.constant 0 : i32
    %c0_i32_1 = arith.constant 0 : i32
    %c0_i32_2 = arith.constant 0 : i32
    return %arg0, %c0_i32, %c0_i32_0, %c0_i32_1 : i32, i32, i32, i32
  }
}

module attributes {stable_mosaic.version = 11 : i64} {
  func.func @_bilstm_layer_kernel(%arg0: i32, %arg1: memref<2x8x32xf32, #tpu.memory_space<vmem>>, %arg2: memref<1x32x128xf32, #tpu.memory_space<vmem>>, %arg3: memref<1x32x128xf32, #tpu.memory_space<vmem>>, %arg4: memref<1x1x128xf32, #tpu.memory_space<vmem>>, %arg5: memref<1x2x8x32xf32, #tpu.memory_space<vmem>>, %arg6: memref<2x8x128xf32, #tpu.memory_space<vmem>>) attributes {dimension_semantics = [#tpu.dimension_semantics<parallel>], iteration_bounds = array<i64: 2>, scalar_prefetch = 0 : i64, scratch_operands = 1 : i64, tpu.core_type = #tpu.core_type<tc>, window_params = [{pipeline_mode = #tpu.pipeline_mode<synchronous>, transform_indices = @transform_0, window_bounds = array<i64: 2, 8, 32>}, {transform_indices = @transform_1, window_bounds = array<i64: 1, 32, 128>}, {transform_indices = @transform_2, window_bounds = array<i64: 1, 32, 128>}, {transform_indices = @transform_3, window_bounds = array<i64: 1, 1, 128>}, {transform_indices = @transform_4, window_bounds = array<i64: 1, 2, 8, 32>}]} {
    %c0 = arith.constant 0 : index
    %c0_0 = arith.constant 0 : index
    %c0_1 = arith.constant 0 : index
    %0 = vector.load %arg1[%c0, %c0_0, %c0_1] : memref<2x8x32xf32, #tpu.memory_space<vmem>>, vector<2x8x32xf32>
    %1 = vector.shape_cast %0 : vector<2x8x32xf32> to vector<16x32xf32>
    %c0_2 = arith.constant 0 : index
    %c0_3 = arith.constant 0 : index
    %c0_4 = arith.constant 0 : index
    %2 = vector.load %arg2[%c0_2, %c0_3, %c0_4] : memref<1x32x128xf32, #tpu.memory_space<vmem>>, vector<1x32x128xf32>
    %3 = vector.shape_cast %2 : vector<1x32x128xf32> to vector<32x128xf32>
    %cst = arith.constant dense<0.000000e+00> : vector<16x128xf32>
    %4 = tpu.matmul %1, %3, %cst {dimension_numbers = #tpu.dot_dimension_numbers<[1], [0], [0], [1], [0, 0, 1, 1], [], []>} : vector<16x32xf32>, vector<32x128xf32>, vector<16x128xf32> -> vector<16x128xf32>
    %5 = vector.shape_cast %4 : vector<16x128xf32> to vector<2x8x128xf32>
    %c0_5 = arith.constant 0 : index
    %c0_6 = arith.constant 0 : index
    %c0_7 = arith.constant 0 : index
    %6 = vector.load %arg4[%c0_5, %c0_6, %c0_7] : memref<1x1x128xf32, #tpu.memory_space<vmem>>, vector<1x1x128xf32>
    %7 = vector.shape_cast %6 : vector<1x1x128xf32> to vector<1x128xf32>
    %8 = vector.shape_cast %7 : vector<1x128xf32> to vector<1x1x128xf32>
    %9 = vector.broadcast %8 : vector<1x1x128xf32> to vector<2x8x128xf32>
    %10 = arith.addf %5, %9 : vector<2x8x128xf32>
    %c0_8 = arith.constant 0 : index
    %c0_9 = arith.constant 0 : index
    %c0_10 = arith.constant 0 : index
    %11 = vector.load %arg6[%c0_8, %c0_9, %c0_10] : memref<2x8x128xf32, #tpu.memory_space<vmem>>, vector<2x8x128xf32>
    tpu.vector_store %arg6[%c0_8, %c0_9, %c0_10], %10 {strides = array<i32>} : memref<2x8x128xf32, #tpu.memory_space<vmem>>, vector<2x8x128xf32>,
    %c0_11 = arith.constant 0 : index
    %c0_12 = arith.constant 0 : index
    %c0_13 = arith.constant 0 : index
    %12 = vector.load %arg3[%c0_11, %c0_12, %c0_13] : memref<1x32x128xf32, #tpu.memory_space<vmem>>, vector<1x32x128xf32>
    %13 = vector.shape_cast %12 : vector<1x32x128xf32> to vector<32x128xf32>
    %cst_14 = arith.constant 0.000000e+00 : f32
    %14 = vector.broadcast %cst_14 : f32 to vector<2x32xf32>
    %cst_15 = arith.constant 0.000000e+00 : f32
    %15 = vector.broadcast %cst_15 : f32 to vector<2x32xf32>
    %c0_i32 = arith.constant 0 : i32
    %c0_i32_16 = arith.constant 0 : i32
    %16 = arith.cmpi eq, %arg0, %c0_i32_16 : i32
    %c7_i32 = arith.constant 7 : i32
    %17 = arith.subi %c7_i32, %c0_i32 : i32
    %18 = arith.select %16, %c0_i32, %17 : i32
    %c0_17 = arith.constant 0 : index
    %19 = arith.index_cast %18 : i32 to index
    %c0_18 = arith.constant 0 : index
    %20 = vector.load %arg6[%c0_17, %19, %c0_18] : memref<2x8x128xf32, #tpu.memory_space<vmem>>, vector<2x1x128xf32>
    %21 = vector.shape_cast %20 : vector<2x1x128xf32> to vector<2x128xf32>
    %cst_19 = arith.constant dense<0.000000e+00> : vector<2x128xf32>
    %22 = tpu.matmul %14, %13, %cst_19 {dimension_numbers = #tpu.dot_dimension_numbers<[1], [0], [0], [1], [0, 0, 1, 1], [], []>} : vector<2x32xf32>, vector<32x128xf32>, vector<2x128xf32> -> vector<2x128xf32>
    %23 = arith.addf %21, %22 : vector<2x128xf32>
    %24 = vector.extract_strided_slice %23 {offsets = [0, 0], sizes = [2, 32], strides = [1, 1]} : vector<2x128xf32> to vector<2x32xf32>
    %25 = arith.negf %24 : vector<2x32xf32>
    %26 = math.exp %25 : vector<2x32xf32>
    %cst_20 = arith.constant 1.000000e+00 : f32
    %27 = vector.broadcast %cst_20 : f32 to vector<2x32xf32>
    %28 = arith.addf %27, %26 : vector<2x32xf32>
    %29 = arith.divf %27, %28 : vector<2x32xf32>
    %30 = vector.extract_strided_slice %23 {offsets = [0, 32], sizes = [2, 32], strides = [1, 1]} : vector<2x128xf32> to vector<2x32xf32>
    %31 = arith.negf %30 : vector<2x32xf32>
    %32 = math.exp %31 : vector<2x32xf32>
    %cst_21 = arith.constant 1.000000e+00 : f32
    %33 = vector.broadcast %cst_21 : f32 to vector<2x32xf32>
    %34 = arith.addf %33, %32 : vector<2x32xf32>
    %35 = arith.divf %33, %34 : vector<2x32xf32>
    %36 = vector.extract_strided_slice %23 {offsets = [0, 64], sizes = [2, 32], strides = [1, 1]} : vector<2x128xf32> to vector<2x32xf32>
    %37 = math.tanh %36 : vector<2x32xf32>
    %38 = vector.extract_strided_slice %23 {offsets = [0, 96], sizes = [2, 32], strides = [1, 1]} : vector<2x128xf32> to vector<2x32xf32>
    %39 = arith.negf %38 : vector<2x32xf32>
    %40 = math.exp %39 : vector<2x32xf32>
    %cst_22 = arith.constant 1.000000e+00 : f32
    %41 = vector.broadcast %cst_22 : f32 to vector<2x32xf32>
    %42 = arith.addf %41, %40 : vector<2x32xf32>
    %43 = arith.divf %41, %42 : vector<2x32xf32>
    %44 = arith.mulf %35, %15 : vector<2x32xf32>
    %45 = arith.mulf %29, %37 : vector<2x32xf32>
    %46 = arith.addf %44, %45 : vector<2x32xf32>
    %47 = math.tanh %46 : vector<2x32xf32>
    %48 = arith.mulf %43, %47 : vector<2x32xf32>
    %49 = vector.shape_cast %48 : vector<2x32xf32> to vector<2x1x32xf32>
    %c0_23 = arith.constant 0 : index
    %c0_24 = arith.constant 0 : index
    %50 = arith.index_cast %18 : i32 to index
    %c0_25 = arith.constant 0 : index
    %51 = vector.load %arg5[%c0_23, %c0_24, %50, %c0_25] : memref<1x2x8x32xf32, #tpu.memory_space<vmem>>, vector<1x2x1x32xf32>
    %52 = vector.shape_cast %51 : vector<1x2x1x32xf32> to vector<2x1x32xf32>
    %53 = vector.shape_cast %49 : vector<2x1x32xf32> to vector<1x2x1x32xf32>
    tpu.vector_store %arg5[%c0_23, %c0_24, %50, %c0_25], %53 {strides = array<i32>} : memref<1x2x8x32xf32, #tpu.memory_space<vmem>>, vector<1x2x1x32xf32>,
    %c1_i32 = arith.constant 1 : i32
    %c0_i32_26 = arith.constant 0 : i32
    %54 = arith.cmpi eq, %arg0, %c0_i32_26 : i32
    %c7_i32_27 = arith.constant 7 : i32
    %55 = arith.subi %c7_i32_27, %c1_i32 : i32
    %56 = arith.select %54, %c1_i32, %55 : i32
    %c0_28 = arith.constant 0 : index
    %57 = arith.index_cast %56 : i32 to index
    %c0_29 = arith.constant 0 : index
    %58 = vector.load %arg6[%c0_28, %57, %c0_29] : memref<2x8x128xf32, #tpu.memory_space<vmem>>, vector<2x1x128xf32>
    %59 = vector.shape_cast %58 : vector<2x1x128xf32> to vector<2x128xf32>
    %cst_30 = arith.constant dense<0.000000e+00> : vector<2x128xf32>
    %60 = tpu.matmul %48, %13, %cst_30 {dimension_numbers = #tpu.dot_dimension_numbers<[1], [0], [0], [1], [0, 0, 1, 1], [], []>} : vector<2x32xf32>, vector<32x128xf32>, vector<2x128xf32> -> vector<2x128xf32>
    %61 = arith.addf %59, %60 : vector<2x128xf32>
    %62 = vector.extract_strided_slice %61 {offsets = [0, 0], sizes = [2, 32], strides = [1, 1]} : vector<2x128xf32> to vector<2x32xf32>
    %63 = arith.negf %62 : vector<2x32xf32>
    %64 = math.exp %63 : vector<2x32xf32>
    %cst_31 = arith.constant 1.000000e+00 : f32
    %65 = vector.broadcast %cst_31 : f32 to vector<2x32xf32>
    %66 = arith.addf %65, %64 : vector<2x32xf32>
    %67 = arith.divf %65, %66 : vector<2x32xf32>
    %68 = vector.extract_strided_slice %61 {offsets = [0, 32], sizes = [2, 32], strides = [1, 1]} : vector<2x128xf32> to vector<2x32xf32>
    %69 = arith.negf %68 : vector<2x32xf32>
    %70 = math.exp %69 : vector<2x32xf32>
    %cst_32 = arith.constant 1.000000e+00 : f32
    %71 = vector.broadcast %cst_32 : f32 to vector<2x32xf32>
    %72 = arith.addf %71, %70 : vector<2x32xf32>
    %73 = arith.divf %71, %72 : vector<2x32xf32>
    %74 = vector.extract_strided_slice %61 {offsets = [0, 64], sizes = [2, 32], strides = [1, 1]} : vector<2x128xf32> to vector<2x32xf32>
    %75 = math.tanh %74 : vector<2x32xf32>
    %76 = vector.extract_strided_slice %61 {offsets = [0, 96], sizes = [2, 32], strides = [1, 1]} : vector<2x128xf32> to vector<2x32xf32>
    %77 = arith.negf %76 : vector<2x32xf32>
    %78 = math.exp %77 : vector<2x32xf32>
    %cst_33 = arith.constant 1.000000e+00 : f32
    %79 = vector.broadcast %cst_33 : f32 to vector<2x32xf32>
    %80 = arith.addf %79, %78 : vector<2x32xf32>
    %81 = arith.divf %79, %80 : vector<2x32xf32>
    %82 = arith.mulf %73, %46 : vector<2x32xf32>
    %83 = arith.mulf %67, %75 : vector<2x32xf32>
    %84 = arith.addf %82, %83 : vector<2x32xf32>
    %85 = math.tanh %84 : vector<2x32xf32>
    %86 = arith.mulf %81, %85 : vector<2x32xf32>
    %87 = vector.shape_cast %86 : vector<2x32xf32> to vector<2x1x32xf32>
    %c0_34 = arith.constant 0 : index
    %c0_35 = arith.constant 0 : index
    %88 = arith.index_cast %56 : i32 to index
    %c0_36 = arith.constant 0 : index
    %89 = vector.load %arg5[%c0_34, %c0_35, %88, %c0_36] : memref<1x2x8x32xf32, #tpu.memory_space<vmem>>, vector<1x2x1x32xf32>
    %90 = vector.shape_cast %89 : vector<1x2x1x32xf32> to vector<2x1x32xf32>
    %91 = vector.shape_cast %87 : vector<2x1x32xf32> to vector<1x2x1x32xf32>
    tpu.vector_store %arg5[%c0_34, %c0_35, %88, %c0_36], %91 {strides = array<i32>} : memref<1x2x8x32xf32, #tpu.memory_space<vmem>>, vector<1x2x1x32xf32>,
    %c2_i32 = arith.constant 2 : i32
    %c0_i32_37 = arith.constant 0 : i32
    %92 = arith.cmpi eq, %arg0, %c0_i32_37 : i32
    %c7_i32_38 = arith.constant 7 : i32
    %93 = arith.subi %c7_i32_38, %c2_i32 : i32
    %94 = arith.select %92, %c2_i32, %93 : i32
    %c0_39 = arith.constant 0 : index
    %95 = arith.index_cast %94 : i32 to index
    %c0_40 = arith.constant 0 : index
    %96 = vector.load %arg6[%c0_39, %95, %c0_40] : memref<2x8x128xf32, #tpu.memory_space<vmem>>, vector<2x1x128xf32>
    %97 = vector.shape_cast %96 : vector<2x1x128xf32> to vector<2x128xf32>
    %cst_41 = arith.constant dense<0.000000e+00> : vector<2x128xf32>
    %98 = tpu.matmul %86, %13, %cst_41 {dimension_numbers = #tpu.dot_dimension_numbers<[1], [0], [0], [1], [0, 0, 1, 1], [], []>} : vector<2x32xf32>, vector<32x128xf32>, vector<2x128xf32> -> vector<2x128xf32>
    %99 = arith.addf %97, %98 : vector<2x128xf32>
    %100 = vector.extract_strided_slice %99 {offsets = [0, 0], sizes = [2, 32], strides = [1, 1]} : vector<2x128xf32> to vector<2x32xf32>
    %101 = arith.negf %100 : vector<2x32xf32>
    %102 = math.exp %101 : vector<2x32xf32>
    %cst_42 = arith.constant 1.000000e+00 : f32
    %103 = vector.broadcast %cst_42 : f32 to vector<2x32xf32>
    %104 = arith.addf %103, %102 : vector<2x32xf32>
    %105 = arith.divf %103, %104 : vector<2x32xf32>
    %106 = vector.extract_strided_slice %99 {offsets = [0, 32], sizes = [2, 32], strides = [1, 1]} : vector<2x128xf32> to vector<2x32xf32>
    %107 = arith.negf %106 : vector<2x32xf32>
    %108 = math.exp %107 : vector<2x32xf32>
    %cst_43 = arith.constant 1.000000e+00 : f32
    %109 = vector.broadcast %cst_43 : f32 to vector<2x32xf32>
    %110 = arith.addf %109, %108 : vector<2x32xf32>
    %111 = arith.divf %109, %110 : vector<2x32xf32>
    %112 = vector.extract_strided_slice %99 {offsets = [0, 64], sizes = [2, 32], strides = [1, 1]} : vector<2x128xf32> to vector<2x32xf32>
    %113 = math.tanh %112 : vector<2x32xf32>
    %114 = vector.extract_strided_slice %99 {offsets = [0, 96], sizes = [2, 32], strides = [1, 1]} : vector<2x128xf32> to vector<2x32xf32>
    %115 = arith.negf %114 : vector<2x32xf32>
    %116 = math.exp %115 : vector<2x32xf32>
    %cst_44 = arith.constant 1.000000e+00 : f32
    %117 = vector.broadcast %cst_44 : f32 to vector<2x32xf32>
    %118 = arith.addf %117, %116 : vector<2x32xf32>
    %119 = arith.divf %117, %118 : vector<2x32xf32>
    %120 = arith.mulf %111, %84 : vector<2x32xf32>
    %121 = arith.mulf %105, %113 : vector<2x32xf32>
    %122 = arith.addf %120, %121 : vector<2x32xf32>
    %123 = math.tanh %122 : vector<2x32xf32>
    %124 = arith.mulf %119, %123 : vector<2x32xf32>
    %125 = vector.shape_cast %124 : vector<2x32xf32> to vector<2x1x32xf32>
    %c0_45 = arith.constant 0 : index
    %c0_46 = arith.constant 0 : index
    %126 = arith.index_cast %94 : i32 to index
    %c0_47 = arith.constant 0 : index
    %127 = vector.load %arg5[%c0_45, %c0_46, %126, %c0_47] : memref<1x2x8x32xf32, #tpu.memory_space<vmem>>, vector<1x2x1x32xf32>
    %128 = vector.shape_cast %127 : vector<1x2x1x32xf32> to vector<2x1x32xf32>
    %129 = vector.shape_cast %125 : vector<2x1x32xf32> to vector<1x2x1x32xf32>
    tpu.vector_store %arg5[%c0_45, %c0_46, %126, %c0_47], %129 {strides = array<i32>} : memref<1x2x8x32xf32, #tpu.memory_space<vmem>>, vector<1x2x1x32xf32>,
    %c3_i32 = arith.constant 3 : i32
    %c0_i32_48 = arith.constant 0 : i32
    %130 = arith.cmpi eq, %arg0, %c0_i32_48 : i32
    %c7_i32_49 = arith.constant 7 : i32
    %131 = arith.subi %c7_i32_49, %c3_i32 : i32
    %132 = arith.select %130, %c3_i32, %131 : i32
    %c0_50 = arith.constant 0 : index
    %133 = arith.index_cast %132 : i32 to index
    %c0_51 = arith.constant 0 : index
    %134 = vector.load %arg6[%c0_50, %133, %c0_51] : memref<2x8x128xf32, #tpu.memory_space<vmem>>, vector<2x1x128xf32>
    %135 = vector.shape_cast %134 : vector<2x1x128xf32> to vector<2x128xf32>
    %cst_52 = arith.constant dense<0.000000e+00> : vector<2x128xf32>
    %136 = tpu.matmul %124, %13, %cst_52 {dimension_numbers = #tpu.dot_dimension_numbers<[1], [0], [0], [1], [0, 0, 1, 1], [], []>} : vector<2x32xf32>, vector<32x128xf32>, vector<2x128xf32> -> vector<2x128xf32>
    %137 = arith.addf %135, %136 : vector<2x128xf32>
    %138 = vector.extract_strided_slice %137 {offsets = [0, 0], sizes = [2, 32], strides = [1, 1]} : vector<2x128xf32> to vector<2x32xf32>
    %139 = arith.negf %138 : vector<2x32xf32>
    %140 = math.exp %139 : vector<2x32xf32>
    %cst_53 = arith.constant 1.000000e+00 : f32
    %141 = vector.broadcast %cst_53 : f32 to vector<2x32xf32>
    %142 = arith.addf %141, %140 : vector<2x32xf32>
    %143 = arith.divf %141, %142 : vector<2x32xf32>
    %144 = vector.extract_strided_slice %137 {offsets = [0, 32], sizes = [2, 32], strides = [1, 1]} : vector<2x128xf32> to vector<2x32xf32>
    %145 = arith.negf %144 : vector<2x32xf32>
    %146 = math.exp %145 : vector<2x32xf32>
    %cst_54 = arith.constant 1.000000e+00 : f32
    %147 = vector.broadcast %cst_54 : f32 to vector<2x32xf32>
    %148 = arith.addf %147, %146 : vector<2x32xf32>
    %149 = arith.divf %147, %148 : vector<2x32xf32>
    %150 = vector.extract_strided_slice %137 {offsets = [0, 64], sizes = [2, 32], strides = [1, 1]} : vector<2x128xf32> to vector<2x32xf32>
    %151 = math.tanh %150 : vector<2x32xf32>
    %152 = vector.extract_strided_slice %137 {offsets = [0, 96], sizes = [2, 32], strides = [1, 1]} : vector<2x128xf32> to vector<2x32xf32>
    %153 = arith.negf %152 : vector<2x32xf32>
    %154 = math.exp %153 : vector<2x32xf32>
    %cst_55 = arith.constant 1.000000e+00 : f32
    %155 = vector.broadcast %cst_55 : f32 to vector<2x32xf32>
    %156 = arith.addf %155, %154 : vector<2x32xf32>
    %157 = arith.divf %155, %156 : vector<2x32xf32>
    %158 = arith.mulf %149, %122 : vector<2x32xf32>
    %159 = arith.mulf %143, %151 : vector<2x32xf32>
    %160 = arith.addf %158, %159 : vector<2x32xf32>
    %161 = math.tanh %160 : vector<2x32xf32>
    %162 = arith.mulf %157, %161 : vector<2x32xf32>
    %163 = vector.shape_cast %162 : vector<2x32xf32> to vector<2x1x32xf32>
    %c0_56 = arith.constant 0 : index
    %c0_57 = arith.constant 0 : index
    %164 = arith.index_cast %132 : i32 to index
    %c0_58 = arith.constant 0 : index
    %165 = vector.load %arg5[%c0_56, %c0_57, %164, %c0_58] : memref<1x2x8x32xf32, #tpu.memory_space<vmem>>, vector<1x2x1x32xf32>
    %166 = vector.shape_cast %165 : vector<1x2x1x32xf32> to vector<2x1x32xf32>
    %167 = vector.shape_cast %163 : vector<2x1x32xf32> to vector<1x2x1x32xf32>
    tpu.vector_store %arg5[%c0_56, %c0_57, %164, %c0_58], %167 {strides = array<i32>} : memref<1x2x8x32xf32, #tpu.memory_space<vmem>>, vector<1x2x1x32xf32>,
    %c4_i32 = arith.constant 4 : i32
    %c0_i32_59 = arith.constant 0 : i32
    %168 = arith.cmpi eq, %arg0, %c0_i32_59 : i32
    %c7_i32_60 = arith.constant 7 : i32
    %169 = arith.subi %c7_i32_60, %c4_i32 : i32
    %170 = arith.select %168, %c4_i32, %169 : i32
    %c0_61 = arith.constant 0 : index
    %171 = arith.index_cast %170 : i32 to index
    %c0_62 = arith.constant 0 : index
    %172 = vector.load %arg6[%c0_61, %171, %c0_62] : memref<2x8x128xf32, #tpu.memory_space<vmem>>, vector<2x1x128xf32>
    %173 = vector.shape_cast %172 : vector<2x1x128xf32> to vector<2x128xf32>
    %cst_63 = arith.constant dense<0.000000e+00> : vector<2x128xf32>
    %174 = tpu.matmul %162, %13, %cst_63 {dimension_numbers = #tpu.dot_dimension_numbers<[1], [0], [0], [1], [0, 0, 1, 1], [], []>} : vector<2x32xf32>, vector<32x128xf32>, vector<2x128xf32> -> vector<2x128xf32>
    %175 = arith.addf %173, %174 : vector<2x128xf32>
    %176 = vector.extract_strided_slice %175 {offsets = [0, 0], sizes = [2, 32], strides = [1, 1]} : vector<2x128xf32> to vector<2x32xf32>
    %177 = arith.negf %176 : vector<2x32xf32>
    %178 = math.exp %177 : vector<2x32xf32>
    %cst_64 = arith.constant 1.000000e+00 : f32
    %179 = vector.broadcast %cst_64 : f32 to vector<2x32xf32>
    %180 = arith.addf %179, %178 : vector<2x32xf32>
    %181 = arith.divf %179, %180 : vector<2x32xf32>
    %182 = vector.extract_strided_slice %175 {offsets = [0, 32], sizes = [2, 32], strides = [1, 1]} : vector<2x128xf32> to vector<2x32xf32>
    %183 = arith.negf %182 : vector<2x32xf32>
    %184 = math.exp %183 : vector<2x32xf32>
    %cst_65 = arith.constant 1.000000e+00 : f32
    %185 = vector.broadcast %cst_65 : f32 to vector<2x32xf32>
    %186 = arith.addf %185, %184 : vector<2x32xf32>
    %187 = arith.divf %185, %186 : vector<2x32xf32>
    %188 = vector.extract_strided_slice %175 {offsets = [0, 64], sizes = [2, 32], strides = [1, 1]} : vector<2x128xf32> to vector<2x32xf32>
    %189 = math.tanh %188 : vector<2x32xf32>
    %190 = vector.extract_strided_slice %175 {offsets = [0, 96], sizes = [2, 32], strides = [1, 1]} : vector<2x128xf32> to vector<2x32xf32>
    %191 = arith.negf %190 : vector<2x32xf32>
    %192 = math.exp %191 : vector<2x32xf32>
    %cst_66 = arith.constant 1.000000e+00 : f32
    %193 = vector.broadcast %cst_66 : f32 to vector<2x32xf32>
    %194 = arith.addf %193, %192 : vector<2x32xf32>
    %195 = arith.divf %193, %194 : vector<2x32xf32>
    %196 = arith.mulf %187, %160 : vector<2x32xf32>
    %197 = arith.mulf %181, %189 : vector<2x32xf32>
    %198 = arith.addf %196, %197 : vector<2x32xf32>
    %199 = math.tanh %198 : vector<2x32xf32>
    %200 = arith.mulf %195, %199 : vector<2x32xf32>
    %201 = vector.shape_cast %200 : vector<2x32xf32> to vector<2x1x32xf32>
    %c0_67 = arith.constant 0 : index
    %c0_68 = arith.constant 0 : index
    %202 = arith.index_cast %170 : i32 to index
    %c0_69 = arith.constant 0 : index
    %203 = vector.load %arg5[%c0_67, %c0_68, %202, %c0_69] : memref<1x2x8x32xf32, #tpu.memory_space<vmem>>, vector<1x2x1x32xf32>
    %204 = vector.shape_cast %203 : vector<1x2x1x32xf32> to vector<2x1x32xf32>
    %205 = vector.shape_cast %201 : vector<2x1x32xf32> to vector<1x2x1x32xf32>
    tpu.vector_store %arg5[%c0_67, %c0_68, %202, %c0_69], %205 {strides = array<i32>} : memref<1x2x8x32xf32, #tpu.memory_space<vmem>>, vector<1x2x1x32xf32>,
    %c5_i32 = arith.constant 5 : i32
    %c0_i32_70 = arith.constant 0 : i32
    %206 = arith.cmpi eq, %arg0, %c0_i32_70 : i32
    %c7_i32_71 = arith.constant 7 : i32
    %207 = arith.subi %c7_i32_71, %c5_i32 : i32
    %208 = arith.select %206, %c5_i32, %207 : i32
    %c0_72 = arith.constant 0 : index
    %209 = arith.index_cast %208 : i32 to index
    %c0_73 = arith.constant 0 : index
    %210 = vector.load %arg6[%c0_72, %209, %c0_73] : memref<2x8x128xf32, #tpu.memory_space<vmem>>, vector<2x1x128xf32>
    %211 = vector.shape_cast %210 : vector<2x1x128xf32> to vector<2x128xf32>
    %cst_74 = arith.constant dense<0.000000e+00> : vector<2x128xf32>
    %212 = tpu.matmul %200, %13, %cst_74 {dimension_numbers = #tpu.dot_dimension_numbers<[1], [0], [0], [1], [0, 0, 1, 1], [], []>} : vector<2x32xf32>, vector<32x128xf32>, vector<2x128xf32> -> vector<2x128xf32>
    %213 = arith.addf %211, %212 : vector<2x128xf32>
    %214 = vector.extract_strided_slice %213 {offsets = [0, 0], sizes = [2, 32], strides = [1, 1]} : vector<2x128xf32> to vector<2x32xf32>
    %215 = arith.negf %214 : vector<2x32xf32>
    %216 = math.exp %215 : vector<2x32xf32>
    %cst_75 = arith.constant 1.000000e+00 : f32
    %217 = vector.broadcast %cst_75 : f32 to vector<2x32xf32>
    %218 = arith.addf %217, %216 : vector<2x32xf32>
    %219 = arith.divf %217, %218 : vector<2x32xf32>
    %220 = vector.extract_strided_slice %213 {offsets = [0, 32], sizes = [2, 32], strides = [1, 1]} : vector<2x128xf32> to vector<2x32xf32>
    %221 = arith.negf %220 : vector<2x32xf32>
    %222 = math.exp %221 : vector<2x32xf32>
    %cst_76 = arith.constant 1.000000e+00 : f32
    %223 = vector.broadcast %cst_76 : f32 to vector<2x32xf32>
    %224 = arith.addf %223, %222 : vector<2x32xf32>
    %225 = arith.divf %223, %224 : vector<2x32xf32>
    %226 = vector.extract_strided_slice %213 {offsets = [0, 64], sizes = [2, 32], strides = [1, 1]} : vector<2x128xf32> to vector<2x32xf32>
    %227 = math.tanh %226 : vector<2x32xf32>
    %228 = vector.extract_strided_slice %213 {offsets = [0, 96], sizes = [2, 32], strides = [1, 1]} : vector<2x128xf32> to vector<2x32xf32>
    %229 = arith.negf %228 : vector<2x32xf32>
    %230 = math.exp %229 : vector<2x32xf32>
    %cst_77 = arith.constant 1.000000e+00 : f32
    %231 = vector.broadcast %cst_77 : f32 to vector<2x32xf32>
    %232 = arith.addf %231, %230 : vector<2x32xf32>
    %233 = arith.divf %231, %232 : vector<2x32xf32>
    %234 = arith.mulf %225, %198 : vector<2x32xf32>
    %235 = arith.mulf %219, %227 : vector<2x32xf32>
    %236 = arith.addf %234, %235 : vector<2x32xf32>
    %237 = math.tanh %236 : vector<2x32xf32>
    %238 = arith.mulf %233, %237 : vector<2x32xf32>
    %239 = vector.shape_cast %238 : vector<2x32xf32> to vector<2x1x32xf32>
    %c0_78 = arith.constant 0 : index
    %c0_79 = arith.constant 0 : index
    %240 = arith.index_cast %208 : i32 to index
    %c0_80 = arith.constant 0 : index
    %241 = vector.load %arg5[%c0_78, %c0_79, %240, %c0_80] : memref<1x2x8x32xf32, #tpu.memory_space<vmem>>, vector<1x2x1x32xf32>
    %242 = vector.shape_cast %241 : vector<1x2x1x32xf32> to vector<2x1x32xf32>
    %243 = vector.shape_cast %239 : vector<2x1x32xf32> to vector<1x2x1x32xf32>
    tpu.vector_store %arg5[%c0_78, %c0_79, %240, %c0_80], %243 {strides = array<i32>} : memref<1x2x8x32xf32, #tpu.memory_space<vmem>>, vector<1x2x1x32xf32>,
    %c6_i32 = arith.constant 6 : i32
    %c0_i32_81 = arith.constant 0 : i32
    %244 = arith.cmpi eq, %arg0, %c0_i32_81 : i32
    %c7_i32_82 = arith.constant 7 : i32
    %245 = arith.subi %c7_i32_82, %c6_i32 : i32
    %246 = arith.select %244, %c6_i32, %245 : i32
    %c0_83 = arith.constant 0 : index
    %247 = arith.index_cast %246 : i32 to index
    %c0_84 = arith.constant 0 : index
    %248 = vector.load %arg6[%c0_83, %247, %c0_84] : memref<2x8x128xf32, #tpu.memory_space<vmem>>, vector<2x1x128xf32>
    %249 = vector.shape_cast %248 : vector<2x1x128xf32> to vector<2x128xf32>
    %cst_85 = arith.constant dense<0.000000e+00> : vector<2x128xf32>
    %250 = tpu.matmul %238, %13, %cst_85 {dimension_numbers = #tpu.dot_dimension_numbers<[1], [0], [0], [1], [0, 0, 1, 1], [], []>} : vector<2x32xf32>, vector<32x128xf32>, vector<2x128xf32> -> vector<2x128xf32>
    %251 = arith.addf %249, %250 : vector<2x128xf32>
    %252 = vector.extract_strided_slice %251 {offsets = [0, 0], sizes = [2, 32], strides = [1, 1]} : vector<2x128xf32> to vector<2x32xf32>
    %253 = arith.negf %252 : vector<2x32xf32>
    %254 = math.exp %253 : vector<2x32xf32>
    %cst_86 = arith.constant 1.000000e+00 : f32
    %255 = vector.broadcast %cst_86 : f32 to vector<2x32xf32>
    %256 = arith.addf %255, %254 : vector<2x32xf32>
    %257 = arith.divf %255, %256 : vector<2x32xf32>
    %258 = vector.extract_strided_slice %251 {offsets = [0, 32], sizes = [2, 32], strides = [1, 1]} : vector<2x128xf32> to vector<2x32xf32>
    %259 = arith.negf %258 : vector<2x32xf32>
    %260 = math.exp %259 : vector<2x32xf32>
    %cst_87 = arith.constant 1.000000e+00 : f32
    %261 = vector.broadcast %cst_87 : f32 to vector<2x32xf32>
    %262 = arith.addf %261, %260 : vector<2x32xf32>
    %263 = arith.divf %261, %262 : vector<2x32xf32>
    %264 = vector.extract_strided_slice %251 {offsets = [0, 64], sizes = [2, 32], strides = [1, 1]} : vector<2x128xf32> to vector<2x32xf32>
    %265 = math.tanh %264 : vector<2x32xf32>
    %266 = vector.extract_strided_slice %251 {offsets = [0, 96], sizes = [2, 32], strides = [1, 1]} : vector<2x128xf32> to vector<2x32xf32>
    %267 = arith.negf %266 : vector<2x32xf32>
    %268 = math.exp %267 : vector<2x32xf32>
    %cst_88 = arith.constant 1.000000e+00 : f32
    %269 = vector.broadcast %cst_88 : f32 to vector<2x32xf32>
    %270 = arith.addf %269, %268 : vector<2x32xf32>
    %271 = arith.divf %269, %270 : vector<2x32xf32>
    %272 = arith.mulf %263, %236 : vector<2x32xf32>
    %273 = arith.mulf %257, %265 : vector<2x32xf32>
    %274 = arith.addf %272, %273 : vector<2x32xf32>
    %275 = math.tanh %274 : vector<2x32xf32>
    %276 = arith.mulf %271, %275 : vector<2x32xf32>
    %277 = vector.shape_cast %276 : vector<2x32xf32> to vector<2x1x32xf32>
    %c0_89 = arith.constant 0 : index
    %c0_90 = arith.constant 0 : index
    %278 = arith.index_cast %246 : i32 to index
    %c0_91 = arith.constant 0 : index
    %279 = vector.load %arg5[%c0_89, %c0_90, %278, %c0_91] : memref<1x2x8x32xf32, #tpu.memory_space<vmem>>, vector<1x2x1x32xf32>
    %280 = vector.shape_cast %279 : vector<1x2x1x32xf32> to vector<2x1x32xf32>
    %281 = vector.shape_cast %277 : vector<2x1x32xf32> to vector<1x2x1x32xf32>
    tpu.vector_store %arg5[%c0_89, %c0_90, %278, %c0_91], %281 {strides = array<i32>} : memref<1x2x8x32xf32, #tpu.memory_space<vmem>>, vector<1x2x1x32xf32>,
    %c7_i32_92 = arith.constant 7 : i32
    %c0_i32_93 = arith.constant 0 : i32
    %282 = arith.cmpi eq, %arg0, %c0_i32_93 : i32
    %c7_i32_94 = arith.constant 7 : i32
    %283 = arith.subi %c7_i32_94, %c7_i32_92 : i32
    %284 = arith.select %282, %c7_i32_92, %283 : i32
    %c0_95 = arith.constant 0 : index
    %285 = arith.index_cast %284 : i32 to index
    %c0_96 = arith.constant 0 : index
    %286 = vector.load %arg6[%c0_95, %285, %c0_96] : memref<2x8x128xf32, #tpu.memory_space<vmem>>, vector<2x1x128xf32>
    %287 = vector.shape_cast %286 : vector<2x1x128xf32> to vector<2x128xf32>
    %cst_97 = arith.constant dense<0.000000e+00> : vector<2x128xf32>
    %288 = tpu.matmul %276, %13, %cst_97 {dimension_numbers = #tpu.dot_dimension_numbers<[1], [0], [0], [1], [0, 0, 1, 1], [], []>} : vector<2x32xf32>, vector<32x128xf32>, vector<2x128xf32> -> vector<2x128xf32>
    %289 = arith.addf %287, %288 : vector<2x128xf32>
    %290 = vector.extract_strided_slice %289 {offsets = [0, 0], sizes = [2, 32], strides = [1, 1]} : vector<2x128xf32> to vector<2x32xf32>
    %291 = arith.negf %290 : vector<2x32xf32>
    %292 = math.exp %291 : vector<2x32xf32>
    %cst_98 = arith.constant 1.000000e+00 : f32
    %293 = vector.broadcast %cst_98 : f32 to vector<2x32xf32>
    %294 = arith.addf %293, %292 : vector<2x32xf32>
    %295 = arith.divf %293, %294 : vector<2x32xf32>
    %296 = vector.extract_strided_slice %289 {offsets = [0, 32], sizes = [2, 32], strides = [1, 1]} : vector<2x128xf32> to vector<2x32xf32>
    %297 = arith.negf %296 : vector<2x32xf32>
    %298 = math.exp %297 : vector<2x32xf32>
    %cst_99 = arith.constant 1.000000e+00 : f32
    %299 = vector.broadcast %cst_99 : f32 to vector<2x32xf32>
    %300 = arith.addf %299, %298 : vector<2x32xf32>
    %301 = arith.divf %299, %300 : vector<2x32xf32>
    %302 = vector.extract_strided_slice %289 {offsets = [0, 64], sizes = [2, 32], strides = [1, 1]} : vector<2x128xf32> to vector<2x32xf32>
    %303 = math.tanh %302 : vector<2x32xf32>
    %304 = vector.extract_strided_slice %289 {offsets = [0, 96], sizes = [2, 32], strides = [1, 1]} : vector<2x128xf32> to vector<2x32xf32>
    %305 = arith.negf %304 : vector<2x32xf32>
    %306 = math.exp %305 : vector<2x32xf32>
    %cst_100 = arith.constant 1.000000e+00 : f32
    %307 = vector.broadcast %cst_100 : f32 to vector<2x32xf32>
    %308 = arith.addf %307, %306 : vector<2x32xf32>
    %309 = arith.divf %307, %308 : vector<2x32xf32>
    %310 = arith.mulf %301, %274 : vector<2x32xf32>
    %311 = arith.mulf %295, %303 : vector<2x32xf32>
    %312 = arith.addf %310, %311 : vector<2x32xf32>
    %313 = math.tanh %312 : vector<2x32xf32>
    %314 = arith.mulf %309, %313 : vector<2x32xf32>
    %315 = vector.shape_cast %314 : vector<2x32xf32> to vector<2x1x32xf32>
    %c0_101 = arith.constant 0 : index
    %c0_102 = arith.constant 0 : index
    %316 = arith.index_cast %284 : i32 to index
    %c0_103 = arith.constant 0 : index
    %317 = vector.load %arg5[%c0_101, %c0_102, %316, %c0_103] : memref<1x2x8x32xf32, #tpu.memory_space<vmem>>, vector<1x2x1x32xf32>
    %318 = vector.shape_cast %317 : vector<1x2x1x32xf32> to vector<2x1x32xf32>
    %319 = vector.shape_cast %315 : vector<2x1x32xf32> to vector<1x2x1x32xf32>
    tpu.vector_store %arg5[%c0_101, %c0_102, %316, %c0_103], %319 {strides = array<i32>} : memref<1x2x8x32xf32, #tpu.memory_space<vmem>>, vector<1x2x1x32xf32>,
    %c8_i32 = arith.constant 8 : i32
    return
  }
  func.func @transform_0(%arg0: i32) -> (i32, i32, i32) {
    %c0_i32 = arith.constant 0 : i32
    %c0_i32_0 = arith.constant 0 : i32
    %c0_i32_1 = arith.constant 0 : i32
    %c0_i32_2 = arith.constant 0 : i32
    return %c0_i32, %c0_i32_0, %c0_i32_1 : i32, i32, i32
  }
  func.func @transform_1(%arg0: i32) -> (i32, i32, i32) {
    %c0_i32 = arith.constant 0 : i32
    %c0_i32_0 = arith.constant 0 : i32
    %c0_i32_1 = arith.constant 0 : i32
    return %arg0, %c0_i32, %c0_i32_0 : i32, i32, i32
  }
  func.func @transform_2(%arg0: i32) -> (i32, i32, i32) {
    %c0_i32 = arith.constant 0 : i32
    %c0_i32_0 = arith.constant 0 : i32
    %c0_i32_1 = arith.constant 0 : i32
    return %arg0, %c0_i32, %c0_i32_0 : i32, i32, i32
  }
  func.func @transform_3(%arg0: i32) -> (i32, i32, i32) {
    %c0_i32 = arith.constant 0 : i32
    %c0_i32_0 = arith.constant 0 : i32
    %c0_i32_1 = arith.constant 0 : i32
    return %arg0, %c0_i32, %c0_i32_0 : i32, i32, i32
  }
  func.func @transform_4(%arg0: i32) -> (i32, i32, i32, i32) {
    %c0_i32 = arith.constant 0 : i32
    %c0_i32_0 = arith.constant 0 : i32
    %c0_i32_1 = arith.constant 0 : i32
    %c0_i32_2 = arith.constant 0 : i32
    return %arg0, %c0_i32, %c0_i32_0, %c0_i32_1 : i32, i32, i32, i32
  }
}

module attributes {stable_mosaic.version = 11 : i64} {
  func.func @_heads_kernel(%arg0: i32, %arg1: memref<2x8x64xf32, #tpu.memory_space<vmem>>, %arg2: memref<2x12x64xf32, #tpu.memory_space<vmem>>, %arg3: memref<2x8x1xi32, #tpu.memory_space<vmem>>, %arg4: memref<2x1x12xi32, #tpu.memory_space<vmem>>, %arg5: memref<1x64xf32, #tpu.memory_space<vmem>>, %arg6: memref<1x1xf32, #tpu.memory_space<vmem>>, %arg7: memref<64x128xf32, #tpu.memory_space<vmem>>, %arg8: memref<1x128xf32, #tpu.memory_space<vmem>>, %arg9: memref<2x2x12xf32, #tpu.memory_space<vmem>>) attributes {dimension_semantics = [#tpu.dimension_semantics<arbitrary>], iteration_bounds = array<i64: 1>, scalar_prefetch = 0 : i64, scratch_operands = 0 : i64, tpu.core_type = #tpu.core_type<tc>, window_params = [{pipeline_mode = #tpu.pipeline_mode<synchronous>, transform_indices = @transform_0, window_bounds = array<i64: 2, 8, 64>}, {pipeline_mode = #tpu.pipeline_mode<synchronous>, transform_indices = @transform_1, window_bounds = array<i64: 2, 12, 64>}, {pipeline_mode = #tpu.pipeline_mode<synchronous>, transform_indices = @transform_2, window_bounds = array<i64: 2, 8, 1>}, {pipeline_mode = #tpu.pipeline_mode<synchronous>, transform_indices = @transform_3, window_bounds = array<i64: 2, 1, 12>}, {pipeline_mode = #tpu.pipeline_mode<synchronous>, transform_indices = @transform_4, window_bounds = array<i64: 1, 64>}, {pipeline_mode = #tpu.pipeline_mode<synchronous>, transform_indices = @transform_5, window_bounds = array<i64: 1, 1>}, {pipeline_mode = #tpu.pipeline_mode<synchronous>, transform_indices = @transform_6, window_bounds = array<i64: 64, 128>}, {pipeline_mode = #tpu.pipeline_mode<synchronous>, transform_indices = @transform_7, window_bounds = array<i64: 1, 128>}, {pipeline_mode = #tpu.pipeline_mode<synchronous>, transform_indices = @transform_8, window_bounds = array<i64: 2, 2, 12>}]} {
    %c0 = arith.constant 0 : index
    %c0_0 = arith.constant 0 : index
    %c0_1 = arith.constant 0 : index
    %0 = vector.load %arg1[%c0, %c0_0, %c0_1] : memref<2x8x64xf32, #tpu.memory_space<vmem>>, vector<2x8x64xf32>
    %c0_2 = arith.constant 0 : index
    %c0_3 = arith.constant 0 : index
    %c0_4 = arith.constant 0 : index
    %1 = vector.load %arg2[%c0_2, %c0_3, %c0_4] : memref<2x12x64xf32, #tpu.memory_space<vmem>>, vector<2x12x64xf32>
    %c0_5 = arith.constant 0 : index
    %c0_6 = arith.constant 0 : index
    %2 = vector.load %arg5[%c0_5, %c0_6] : memref<1x64xf32, #tpu.memory_space<vmem>>, vector<1x64xf32>
    %3 = vector.shape_cast %2 : vector<1x64xf32> to vector<1x1x64xf32>
    %4 = vector.broadcast %3 : vector<1x1x64xf32> to vector<2x8x64xf32>
    %5 = arith.mulf %0, %4 : vector<2x8x64xf32>
    %cst = arith.constant dense<0.000000e+00> : vector<2x8xf32>
    %6 = vector.multi_reduction <add>, %5, %cst [2] : vector<2x8x64xf32> to vector<2x8xf32>
    %7 = vector.shape_cast %6 : vector<2x8xf32> to vector<2x8x1xf32>
    %c0_7 = arith.constant 0 : index
    %c0_8 = arith.constant 0 : index
    %8 = vector.load %arg6[%c0_7, %c0_8] : memref<1x1xf32, #tpu.memory_space<vmem>>, vector<1x1xf32>
    %9 = vector.shape_cast %8 : vector<1x1xf32> to vector<1x1x1xf32>
    %10 = vector.broadcast %9 : vector<1x1x1xf32> to vector<2x8x1xf32>
    %11 = arith.addf %7, %10 : vector<2x8x1xf32>
    %c0_9 = arith.constant 0 : index
    %c0_10 = arith.constant 0 : index
    %c0_11 = arith.constant 0 : index
    %12 = vector.load %arg3[%c0_9, %c0_10, %c0_11] : memref<2x8x1xi32, #tpu.memory_space<vmem>>, vector<2x8x1xi32>
    %c0_i32 = arith.constant 0 : i32
    %13 = vector.broadcast %c0_i32 : i32 to vector<2x8x1xi32>
    %14 = arith.cmpi ne, %12, %13 : vector<2x8x1xi32>
    %cst_12 = arith.constant 0xFF800000 : f32
    %15 = vector.broadcast %cst_12 : f32 to vector<2x8x1xf32>
    %16 = arith.select %14, %15, %11 : vector<2x8x1xi1>, vector<2x8x1xf32>
    %cst_13 = arith.constant dense<0xFF800000> : vector<2x1xf32>
    %17 = vector.multi_reduction <maximumf>, %16, %cst_13 [1] : vector<2x8x1xf32> to vector<2x1xf32>
    %18 = vector.shape_cast %17 : vector<2x1xf32> to vector<2x1x1xf32>
    %19 = vector.broadcast %18 : vector<2x1x1xf32> to vector<2x8x1xf32>
    %20 = arith.subf %16, %19 : vector<2x8x1xf32>
    %21 = math.exp %20 : vector<2x8x1xf32>
    %cst_14 = arith.constant dense<0.000000e+00> : vector<2x1xf32>
    %22 = vector.multi_reduction <add>, %21, %cst_14 [1] : vector<2x8x1xf32> to vector<2x1xf32>
    %23 = vector.shape_cast %22 : vector<2x1xf32> to vector<2x1x1xf32>
    %24 = vector.broadcast %23 : vector<2x1x1xf32> to vector<2x8x1xf32>
    %25 = arith.divf %21, %24 : vector<2x8x1xf32>
    %26 = vector.broadcast %25 : vector<2x8x1xf32> to vector<2x8x64xf32>
    %27 = arith.mulf %26, %0 : vector<2x8x64xf32>
    %cst_15 = arith.constant dense<0.000000e+00> : vector<2x64xf32>
    %28 = vector.multi_reduction <add>, %27, %cst_15 [1] : vector<2x8x64xf32> to vector<2x64xf32>
    %c0_16 = arith.constant 0 : index
    %c0_17 = arith.constant 0 : index
    %29 = vector.load %arg7[%c0_16, %c0_17] : memref<64x128xf32, #tpu.memory_space<vmem>>, vector<64x128xf32>
    %cst_18 = arith.constant dense<0.000000e+00> : vector<2x128xf32>
    %30 = tpu.matmul %28, %29, %cst_18 {dimension_numbers = #tpu.dot_dimension_numbers<[1], [0], [0], [1], [0, 0, 1, 1], [], []>} : vector<2x64xf32>, vector<64x128xf32>, vector<2x128xf32> -> vector<2x128xf32>
    %c0_19 = arith.constant 0 : index
    %c0_20 = arith.constant 0 : index
    %31 = vector.load %arg8[%c0_19, %c0_20] : memref<1x128xf32, #tpu.memory_space<vmem>>, vector<1x128xf32>
    %32 = vector.broadcast %31 : vector<1x128xf32> to vector<2x128xf32>
    %33 = arith.addf %30, %32 : vector<2x128xf32>
    %34 = vector.extract_strided_slice %33 {offsets = [0, 0], sizes = [2, 64], strides = [1, 1]} : vector<2x128xf32> to vector<2x64xf32>
    %35 = vector.shape_cast %34 : vector<2x64xf32> to vector<2x1x64xf32>
    %36 = vector.extract_strided_slice %33 {offsets = [0, 64], sizes = [2, 64], strides = [1, 1]} : vector<2x128xf32> to vector<2x64xf32>
    %37 = vector.shape_cast %36 : vector<2x64xf32> to vector<2x1x64xf32>
    %38 = tpu.concatenate %35, %37 in 1 : vector<2x1x64xf32>, vector<2x1x64xf32> -> vector<2x2x64xf32>
    "tpu.trace_start"() <{level = 10 : i32, message = "bsd,btd->bst"}> : () -> ()
    %cst_21 = arith.constant dense<0.000000e+00> : vector<2x2x12xf32>
    %39 = tpu.matmul %38, %1, %cst_21 {dimension_numbers = #tpu.dot_dimension_numbers<[2], [2], [1], [1], [0, 0, 0, 1, 1, 1], [0], [0]>} : vector<2x2x64xf32>, vector<2x12x64xf32>, vector<2x2x12xf32> -> vector<2x2x12xf32>
    "tpu.trace_stop"() : () -> ()
    %c0_22 = arith.constant 0 : index
    %c0_23 = arith.constant 0 : index
    %c0_24 = arith.constant 0 : index
    %40 = vector.load %arg4[%c0_22, %c0_23, %c0_24] : memref<2x1x12xi32, #tpu.memory_space<vmem>>, vector<2x1x12xi32>
    %c0_i32_25 = arith.constant 0 : i32
    %41 = vector.broadcast %c0_i32_25 : i32 to vector<2x1x12xi32>
    %42 = arith.cmpi ne, %40, %41 : vector<2x1x12xi32>
    %cst_26 = arith.constant 0xFF800000 : f32
    %43 = vector.shape_cast %42 : vector<2x1x12xi1> to vector<2x1x12xi1>
    %44 = vector.broadcast %43 : vector<2x1x12xi1> to vector<2x2x12xi1>
    %45 = vector.broadcast %cst_26 : f32 to vector<2x2x12xf32>
    %46 = arith.select %44, %45, %39 : vector<2x2x12xi1>, vector<2x2x12xf32>
    %47 = math.exp %46 : vector<2x2x12xf32>
    %c0_27 = arith.constant 0 : index
    %c0_28 = arith.constant 0 : index
    %c0_29 = arith.constant 0 : index
    %48 = vector.load %arg9[%c0_27, %c0_28, %c0_29] : memref<2x2x12xf32, #tpu.memory_space<vmem>>, vector<2x2x12xf32>
    tpu.vector_store %arg9[%c0_27, %c0_28, %c0_29], %47 {strides = array<i32>} : memref<2x2x12xf32, #tpu.memory_space<vmem>>, vector<2x2x12xf32>,
    return
  }
  func.func @transform_0(%arg0: i32) -> (i32, i32, i32) {
    %c0_i32 = arith.constant 0 : i32
    %c0_i32_0 = arith.constant 0 : i32
    %c0_i32_1 = arith.constant 0 : i32
    %c0_i32_2 = arith.constant 0 : i32
    return %c0_i32, %c0_i32_0, %c0_i32_1 : i32, i32, i32
  }
  func.func @transform_1(%arg0: i32) -> (i32, i32, i32) {
    %c0_i32 = arith.constant 0 : i32
    %c0_i32_0 = arith.constant 0 : i32
    %c0_i32_1 = arith.constant 0 : i32
    %c0_i32_2 = arith.constant 0 : i32
    return %c0_i32, %c0_i32_0, %c0_i32_1 : i32, i32, i32
  }
  func.func @transform_2(%arg0: i32) -> (i32, i32, i32) {
    %c0_i32 = arith.constant 0 : i32
    %c0_i32_0 = arith.constant 0 : i32
    %c0_i32_1 = arith.constant 0 : i32
    %c0_i32_2 = arith.constant 0 : i32
    return %c0_i32, %c0_i32_0, %c0_i32_1 : i32, i32, i32
  }
  func.func @transform_3(%arg0: i32) -> (i32, i32, i32) {
    %c0_i32 = arith.constant 0 : i32
    %c0_i32_0 = arith.constant 0 : i32
    %c0_i32_1 = arith.constant 0 : i32
    %c0_i32_2 = arith.constant 0 : i32
    return %c0_i32, %c0_i32_0, %c0_i32_1 : i32, i32, i32
  }
  func.func @transform_4(%arg0: i32) -> (i32, i32) {
    %c0_i32 = arith.constant 0 : i32
    %c0_i32_0 = arith.constant 0 : i32
    %c0_i32_1 = arith.constant 0 : i32
    return %c0_i32, %c0_i32_0 : i32, i32
  }
  func.func @transform_5(%arg0: i32) -> (i32, i32) {
    %c0_i32 = arith.constant 0 : i32
    %c0_i32_0 = arith.constant 0 : i32
    %c0_i32_1 = arith.constant 0 : i32
    return %c0_i32, %c0_i32_0 : i32, i32
  }
  func.func @transform_6(%arg0: i32) -> (i32, i32) {
    %c0_i32 = arith.constant 0 : i32
    %c0_i32_0 = arith.constant 0 : i32
    %c0_i32_1 = arith.constant 0 : i32
    return %c0_i32, %c0_i32_0 : i32, i32
  }
  func.func @transform_7(%arg0: i32) -> (i32, i32) {
    %c0_i32 = arith.constant 0 : i32
    %c0_i32_0 = arith.constant 0 : i32
    %c0_i32_1 = arith.constant 0 : i32
    return %c0_i32, %c0_i32_0 : i32, i32
  }
  func.func @transform_8(%arg0: i32) -> (i32, i32, i32) {
    %c0_i32 = arith.constant 0 : i32
    %c0_i32_0 = arith.constant 0 : i32
    %c0_i32_1 = arith.constant 0 : i32
    %c0_i32_2 = arith.constant 0 : i32
    return %c0_i32, %c0_i32_0, %c0_i32_1 : i32, i32, i32
  }
}

</mosaic_0001>

<bundles_post_ra>
// kernel: document_reader_forward.4
= control target key start
LH: loop header
LB: loop body
LE: loop exit
PB: predicated region body
PF: predicated region fallthrough
CT: control target
= control target key end

     0   :  { %v672_v0 = vmov 0.0|0.0   ;;  %vm673_vm0 = vmmov 0   ;;  %v674_v4 = vmov 0.0   ;;  %vm46_vm1 = vcmask 261120   ;;  %s794_s3 = inlined_call_operand.vmem [shape: f32[32,32], index: 3, kind: input, shape index: {}]   ;;  %s795_s0 = inlined_call_operand.vmem [shape: f32[2,12,32], index: 0, kind: input, shape index: {}]   ;;  %s796_s1 = inlined_call_operand.vmem [shape: f32[2,8,32], index: 1, kind: input, shape index: {}]   ;;  %s797_s4 = inlined_call_operand.vmem [shape: f32[1,32], index: 4, kind: input, shape index: {}]   ;;  %s798_s2 = inlined_call_operand.vmem [shape: s32[2,1,8], index: 2, kind: input, shape index: {}]   ;;  %s799_s5 = inlined_call_operand.vmem [shape: f32[2,12,32], index: 5, kind: output, shape index: {}]  }
   0x1   :  { %643 = vmatprep.subr.bf16.mxu0 %v672_v0  ;;  %v35_v1 = vld [vmem:[%s794_s3] sm:$0xff]  ;;  %v36_v2 = vld [vmem:[%s794_s3 + $0x8] sm:$0xff]  ;;  %v37_v3 = vld [vmem:[%s794_s3 + $0x10] sm:$0xff]  ;;  %608 = vmatprep.mubr.msk.f32.mxu0 %vm673_vm0, %v674_v4  ;;  %v332_v45 = vlaneseq  ;;  %v675_v50 = vmov 0   ;;  %vm346_vm5 = vcmask 64512   ;;  %vm350_vm7 = vcmask 60416  }
   0x2   :  { %v644_v5 = vpack.c.bf16 %v36_v2, %v35_v1  ;;  %v38_v6 = vld [vmem:[%s794_s3 + $0x18] sm:$0xff]  ;;  %v20_v7 = vld [vmem:[%s795_s0] sm:$0xff]  ;;  %v21_v11 = vld [vmem:[%s795_s0 + $0x8] sm:$0xf]  ;;  %vm555_vm8 = vcmask 257024  }
   0x3   :  { %v30_v8 = vcombine.high %v20_v7, %v20_v7  ;;  %v647_v9 = vpack.c.bf16 %v38_v6, %v37_v3  ;;  %v22_v12 = vld [vmem:[%s795_s0 + $0x10] sm:$0xff]  ;;  %v23_v15 = vld [vmem:[%s795_s0 + $0x18] sm:$0xf]  ;;  %v24_v17 = vld [vmem:[%s796_s1] sm:$0xff]  ;;  %v333_v47 = vshrl.u32 %v332_v45, 7 }
   0x4   :  { %645 = vmatpush3.bf16.msra.mxu0 %v644_v5  ;;  %v33_v13 = vcombine.low %v21_v11, %v22_v12  ;;  %v31_v14 = vcombine.high %v22_v12, %v22_v12  ;;  %v745_v18 = vld [vmem:[%s796_s1 + $0x8] sm:$0xff]  ;;  %v563_v19 = vld [vmem:[%s797_s4] ss:$0 sm:$0xff]  ;;  %v327_v48 = vld [vmem:[%s798_s2 + $0x1] sm:$0x1] }
   0x5   :  { %646 = vmatprep.subr.bf16.mxu0 %v672_v0  ;;  %v32_v10 = vcombine.low %v20_v7, %v30_v8  ;;  %v326_v46 = vld [vmem:[%s798_s2] sm:$0x1]  ;;  %v334_v49 = vsub.s32 0, %v333_v47  ;;  %vm329_vm3 = vcmp.ne.s32.totalorder %v327_v48, 0 }
   0x6   :  { %v34_v16 = vcombine.low %v31_v14, %v23_v15  ;;  %vm328_vm2 = vcmp.ne.s32.totalorder %v326_v46, 0  ;;  %v331_v53 = vsel %vm329_vm3, 1, %v675_v50 }
   0x7   :  { %v330_v51 = vsel %vm328_vm2, 1, %v675_v50  ;;  %v339_v54 = vrot.slane %v331_v53, %v334_v49 }
   0x8   :  { %648 = vmatpush3.bf16.msra.mxu0 %v647_v9  ;;  %v335_v52 = vrot.slane %v330_v51, %v334_v49 }
   0x9   :  { %vm341_vm6 = vcmp.eq.s32.totalorder %v339_v54, 1 }
   0xa   :  { %vm340_vm4 = vcmp.eq.s32.totalorder %v335_v52, 1 }
   0xb   :  { %609 = vmatmul.mubr.msk.f32.vlgmr.msra.gmra.mrb[0].mxu0 %vm46_vm1, %v32_v10 }
   0xc   :  { %611 = vmatprep.mubr.msk.f32.mxu0 %vm673_vm0, %v674_v4 }
   0xf   :  { %612 = vmatmul.mubr.msk.f32.gmra.mrb[2].mxu0 %vm46_vm1, %v33_v13 }
  0x10   :  { %614 = vmatprep.mubr.msk.f32.mxu0 %vm673_vm0, %v674_v4 }
  0x13   :  { %615 = vmatmul.mubr.msk.f32.gmra.mrb[4].mxu0 %vm46_vm1, %v34_v16 }
  0x14   :  { %617 = vmatprep.mubr.msk.f32.mxu0 %vm673_vm0, %v674_v4 }
  0x17   :  { %618 = vmatmul.mubr.msk.f32.gmra.mrb[6].mxu0 %vm46_vm1, %v24_v17 }
  0x18   :  { %620 = vmatprep.mubr.msk.f32.mxu0 %vm673_vm0, %v674_v4 }
  0x1b   :  { %621 = vmatmul.mubr.msk.f32.gmra.mrb[8].mxu0 %vm46_vm1, %v745_v18 }
  0xde   :  { %v125_v20 = vpop.f32.mrb[0].mxu0 }
  0xdf   :  { %v126_v21 = vadd.f32 %v563_v19, %v125_v20  ;;  %v610_v22 = vpop.f32.mrb[1].mxu0 }
  0xe1   :  { %v149_v23 = vmax.f32 %v126_v21, 0.0 }
  0xe2   :  { %v130_v24 = vpop.f32.mrb[2].mxu0 }
  0xe3   :  { %v157_v25 = vcombine.high %v149_v23, %v149_v23  ;;  %v131_v26 = vadd.f32 %v563_v19, %v130_v24  ;;  %v613_v27 = vpop.f32.mrb[3].mxu0 }
  0xe5   :  { %v150_v28 = vmax.f32 %v131_v26, 0.0  ;;  %v160_v29 = vcombine.low %v149_v23, %v157_v25 }
  0xe6   :  { %v135_v30 = vpop.f32.mrb[4].mxu0 }
  0xe7   :  { %v136_v31 = vadd.f32 %v563_v19, %v135_v30  ;;  %v616_v32 = vpop.f32.mrb[5].mxu0  ;;  %625 = vmatprep.mubr.msk.f32.mxu1 %vm46_vm1, %v160_v29  ;;  %v158_v33 = vcombine.high %v150_v28, %v150_v28 }
  0xe9   :  { %v151_v34 = vmax.f32 %v136_v31, 0.0 }
  0xea   :  { %v140_v35 = vpop.f32.mrb[6].mxu0 }
  0xeb   :  { %v243_v36 = vcombine.low %v158_v33, %v151_v34  ;;  %v141_v37 = vadd.f32 %v563_v19, %v140_v35  ;;  %v619_v38 = vpop.f32.mrb[7].mxu0  ;;  %v159_v44 = vcombine.high %v151_v34, %v151_v34 }
  0xed   :  { %v152_v39 = vmax.f32 %v141_v37, 0.0 }
  0xee   :  { %v145_v40 = vpop.f32.mrb[8].mxu0 }
  0xef   :  { %v146_v41 = vadd.f32 %v563_v19, %v145_v40  ;;  %v622_v42 = vpop.f32.mrb[9].mxu0  ;;  %623 = vmatprep.subr.msk.mxu1 %vm46_vm1, %v152_v39 }
  0xf0   :  { %624 = vmatpush3.xpose.msk.msra.mxu1 %vm46_vm1, %v152_v39 }
  0xf1   :  { %v153_v43 = vmax.f32 %v146_v41, 0.0 }
  0xf3   :  { %626 = vmatmul.mubr.msk.f32.vlgmr.msra.gmra.mrb[0].mxu1 %vm46_vm1, %v150_v28  ;;  %628 = vmatprep.subr.msk.mxu1 %vm46_vm1, %v153_v43 }
  0xf4   :  { %629 = vmatpush3.xpose.msk.msra.mxu1 %vm46_vm1, %v153_v43  ;;  %630 = vmatprep.mubr.msk.f32.mxu1 %vm46_vm1, %v243_v36 }
  0xf5   :  { %633 = vmatprep.subr.mxu1 %v24_v17 }
  0xf7   :  { %631 = vmatmul.mubr.msk.f32.vlgmr.msra.gmra.mrb[2].mxu1 %vm46_vm1, %v159_v44 }
  0xf8   :  { %634 = vmatpush3.msra.mxu1 %v24_v17 }
  0xf9   :  { %638 = vmatprep.subr.mxu1 %v745_v18 }
 0x1c6   :  { %v627_v55 = vpop.f32.mrb[0].mxu1 }
 0x1c7   :  { %v234_v56 = vpop.f32.mrb[1].mxu1  ;;  %v343_v59 = vsel %vm340_vm4, -inf, %v627_v55 }
 0x1c8   :  { %v342_v57 = vsel %vm340_vm4, -inf, %v234_v56  ;;  %v351_v63 = vsel %vm350_vm7, %v343_v59, -inf }
 0x1c9   :  { %v347_v58 = vsel %vm346_vm5, %v342_v57, -inf }
 0x1ca   :  { %348 = vmax.xlane.f32.xlu0 %v347_v58  ;;  %v632_v60 = vpop.f32.mrb[2].mxu1 }
 0x1cb   :  { %v317_v61 = vpop.f32.mrb[3].mxu1  ;;  %v345_v1 = vsel %vm341_vm6, -inf, %v632_v60 }
 0x1cc   :  { %v344_v62 = vsel %vm341_vm6, -inf, %v317_v61  ;;  %v357_v2 = vsel %vm350_vm7, %v345_v1, -inf }
 0x1cd   :  { %v354_v0 = vsel %vm346_vm5, %v344_v62, -inf }
 0x1ce   :  { %352 = vmax.xlane.f32.xlu0 %v351_v63  ;;  %355 = vmax.xlane.f32.xlu1 %v354_v0 }
 0x1d2   :  { %358 = vmax.xlane.f32.xlu1 %v357_v2 }
 0x257   :  { %v349_v3 = vpop.xlane.xlu0 %348 }
 0x258   :  { %v360_v4 = vsub.f32 %v342_v57, %v349_v3 }
 0x25a   :  { %v364_v5 = vmul.f32 1.442695, %v360_v4 }
 0x25b   :  { %v353_v6 = vpop.xlane.xlu0 %352  ;;  %v356_v7 = vpop.xlane.xlu1 %355 }
 0x25c   :  { %656 = vpow2.f32 %v364_v5  ;;  %v361_v8 = vsub.f32 %v343_v59, %v353_v6  ;;  %v362_v9 = vsub.f32 %v344_v62, %v356_v7 }
 0x25e   :  { %v366_v10 = vmul.f32 1.442695, %v361_v8  ;;  %v368_v11 = vmul.f32 1.442695, %v362_v9 }
 0x25f   :  { %v359_v12 = vpop.xlane.xlu1 %358 }
 0x260   :  { %658 = vpow2.f32 %v366_v10  ;;  %v363_v13 = vsub.f32 %v345_v1, %v359_v12 }
 0x261   :  { %660 = vpow2.f32 %v368_v11 }
 0x262   :  { %v370_v14 = vmul.f32 1.442695, %v363_v13 }
 0x264   :  { %662 = vpow2.f32 %v370_v14 }
 0x266   :  { %v657_v15 = vpop.eup %656 }
 0x267   :  { %v372_v16 = vsel %vm346_vm5, %v657_v15, 0.0 }
 0x268   :  { %373 = vadd.xlane.f32.xlu0 %v372_v16 }
 0x26a   :  { %v659_v17 = vpop.eup %658 }
 0x26b   :  { %v661_v19 = vpop.eup %660  ;;  %v375_v20 = vsel %vm350_vm7, %v659_v17, 0.0 }
 0x26c   :  { %376 = vadd.xlane.f32.xlu1 %v375_v20  ;;  %v378_v21 = vsel %vm346_vm5, %v661_v19, 0.0 }
 0x26d   :  { %379 = vadd.xlane.f32.xlu0 %v378_v21 }
 0x26e   :  { %v663_v22 = vpop.eup %662 }
 0x26f   :  { %v381_v23 = vsel %vm350_vm7, %v663_v22, 0.0 }
 0x270   :  { %382 = vadd.xlane.f32.xlu1 %v381_v23 }
 0x2f5   :  { %v374_v24 = vpop.xlane.xlu0 %373 }
 0x2f6   :  { %664 = vrcp.f32 %v374_v24 }
 0x2f9   :  { %v377_v25 = vpop.xlane.xlu1 %376 }
 0x2fa   :  { %v380_v26 = vpop.xlane.xlu0 %379  ;;  %666 = vrcp.f32 %v377_v25 }
 0x2fb   :  { %668 = vrcp.f32 %v380_v26 }
 0x2fd   :  { %v383_v27 = vpop.xlane.xlu1 %382 }
 0x2fe   :  { %670 = vrcp.f32 %v383_v27 }
 0x300   :  { %v665_v28 = vpop.eup %664 }
 0x301   :  { %v385_v29 = vmul.f32 %v665_v28, %v657_v15 }
 0x303   :  { %635 = vmatprep.mubr.msk.f32.mxu1 %vm346_vm5, %v385_v29 }
 0x304   :  { %v667_v30 = vpop.eup %666 }
 0x305   :  { %v669_v31 = vpop.eup %668  ;;  %v387_v32 = vmul.f32 %v667_v30, %v659_v17 }
 0x306   :  { %v389_v33 = vmul.f32 %v669_v31, %v661_v19 }
 0x307   :  { %636 = vmatmul.mubr.msk.f32.vlgmr.msra.gmra.mrb[4].mxu1 %vm346_vm5, %v387_v32 }
 0x308   :  { %v671_v34 = vpop.eup %670  ;;  %639 = vmatpush3.msra.mxu1 %v745_v18  ;;  %640 = vmatprep.mubr.msk.f32.mxu1 %vm346_vm5, %v389_v33 }
 0x309   :  { %v391_v35 = vmul.f32 %v671_v34, %v663_v22 }
 0x30b   :  { %641 = vmatmul.mubr.msk.f32.vlgmr.msra.gmra.mrb[6].mxu1 %vm346_vm5, %v391_v35 }
 0x3da   :  { %v637_v36 = vpop.f32.mrb[4].mxu1 }
 0x3db   :  { %556 = vst.msk [vmem:[%s799_s5 + $0x8] sm:$0xf] %vm555_vm8, %v637_v36  ;;  %v464_v37 = vpop.f32.mrb[5].mxu1 }
 0x3dc   :  { %554 = vst.msk [vmem:[%s799_s5] sm:$0xff] %vm46_vm1, %v464_v37 }
 0x3de   :  { %v642_v38 = vpop.f32.mrb[6].mxu1 }
 0x3df   :  { %558 = vst.msk [vmem:[%s799_s5 + $0x18] sm:$0xf] %vm555_vm8, %v642_v38  ;;  %v545_v18 = vpop.f32.mrb[7].mxu1 }
 0x3e0   :  { %557 = vst.msk [vmem:[%s799_s5 + $0x10] sm:$0xff] %vm46_vm1, %v545_v18 }

// kernel: document_reader_forward.5
= control target key start
LH: loop header
LB: loop body
LE: loop exit
PB: predicated region body
PF: predicated region fallthrough
CT: control target
= control target key end

     0   :  { %s2009_s15 = smov 0   ;;  %s2314_s0 = inlined_call_operand.vmem [shape: f32[2,8,32], index: 0, kind: input, shape index: {}]   ;;  %s2315_s1 = inlined_call_operand.vmem [shape: f32[2,32,128], index: 1, kind: input, shape index: {}]   ;;  %s2316_s2 = inlined_call_operand.vmem [shape: f32[2,32,128], index: 2, kind: input, shape index: {}]   ;;  %s2317_s3 = inlined_call_operand.vmem [shape: f32[2,1,128], index: 3, kind: input, shape index: {}]   ;;  %s2318_s4 = inlined_call_operand.vmem [shape: f32[2,2,8,32], index: 4, kind: output, shape index: {}]  }
   0x1 LB: > { %s2015_s16 = sadd.s32 4294967295, %s1977_s15   ;;  %p1591_p0 = scmp.ge.s32.totalorder %s1977_s15, 1  ;;  %s1977_s15 = sphi %s2009_s15, %s14_s15  }
   0x2   : > { %p180_p1 = scmp.lt.s32.totalorder %s1977_s15, 3 }
   0x4   : > { %p181_p2 = pnand %p1591_p0, %p180_p1 }
   0x5   : > { %p214_p3 = scmp.lt.s32.totalorder (!%p181_p2), %s2015_s16, 1  ;;  %v232_v0 = vld [vmem:[%s2314_s0] sm:$0xff] (!%p181_p2)  ;;  %vm238_vm0 = vcmask (!%p181_p2), 261120   ;;  %v1979_v1 = vmov (!%p181_p2), 0.0|0.0   ;;  %vm1980_vm1 = vmmov (!%p181_p2), 0   ;;  %v1981_v2 = vmov (!%p181_p2), 0.0  }
   0x6   : > { %184 = sbr.rel (%p181_p2) target bundleno = 5693 (0x163d), region = 36  ;;  %1683 = vmatprep.mubr.msk.f32.mxu0 (!%p181_p2), %vm238_vm0, %v232_v0  ;;  %1782 = vmatprep.subr.bf16.mxu1 (!%p181_p2), %v1979_v1  ;;  %v233_v15 = vld [vmem:[%s2314_s0 + $0x8] sm:$0xff] (!%p181_p2)  ;;  %p335_p4 = scmp.eq.s32.totalorder (!%p181_p2), %s2015_s16, 0  ;;  %vm484_vm2 = vcmask (!%p181_p2), 1041409   ;;  %vm476_vm3 = vcmask (!%p181_p2), 253952  }
   0x7   : > { %1694 = vmatprep.mubr.msk.f32.mxu1 (!%p181_p2), %vm1980_vm1, %v1981_v2  ;;  %s1982_s8 = smov (!%p181_p2), 64   ;;  %s1983_s9 = smov (!%p181_p2), 32  }
   0xd   : > { %s2026_s19 = scalar_select %p214_p3, %s2015_s16, 1 }
   0xe   : > { %s2070_s6 = scalar_select %p335_p4, 0, 7 }
   0xf   : > { %s1626_s20 = sshll.u32 %s2026_s19, 5  ;;  %s226_s5 = scalar_lea.vmem %s2317_s3, %s2026_s19 }
  0x10   : > { %s218_s23 = scalar_lea.vmem %s2315_s1, %s1626_s20  ;;  %s223_s26 = scalar_lea.vmem %s2316_s2, %s1626_s20  ;;  %v1600_v16 = vld [vmem:[%s226_s5] ss:$0 sm:$0xff] }
  0x11   : > { %v234_v3 = vld [vmem:[%s218_s23] sm:$0xff]  ;;  %v235_v4 = vld [vmem:[%s218_s23 + $0x8] sm:$0xff]  ;;  %v333_v8 = vld [vmem:[%s223_s26 + $0x10] sm:$0xff]  ;;  %s337_s7 = scalar_lea.vmem [#allocation2], %s2070_s6  ;;  %s1628_s16 = sshll.u32 %s2026_s19, 4 }
  0x12   : > { %v331_v5 = vld [vmem:[%s223_s26] sm:$0xff]  ;;  %v1774_v6 = vpack.c.bf16 %v235_v4, %v234_v3  ;;  %v332_v7 = vld [vmem:[%s223_s26 + $0x8] sm:$0xff]  ;;  %v334_v9 = vld [vmem:[%s223_s26 + $0x18] sm:$0xff]  ;;  %s2096_s10 = scalar_select %p335_p4, 1, 6 }
  0x13   : > { %v2037_v10 = vpack.c.bf16 %v332_v7, %v331_v5  ;;  %v236_v11 = vld [vmem:[%s218_s23 + $0x10] sm:$0xff]  ;;  %v237_v12 = vld [vmem:[%s218_s23 + $0x18] sm:$0xff]  ;;  %v2039_v14 = vpack.c.bf16 %v334_v9, %v333_v8  ;;  %s2122_s12 = scalar_select %p335_p4, 2, 5 }
  0x14   : > { %1775 = vmatprep.subr.bf16.mxu0 %v1774_v6  ;;  %v1778_v13 = vpack.c.bf16 %v237_v12, %v236_v11  ;;  %s480_s11 = scalar_lea.vmem [#allocation2], %s2096_s10  ;;  %s2275_s29 = scalar_lea.vmem %s2318_s4, %s1628_s16 }
  0x15   : > { %1777 = vmatpush3.bf16.msra.mxu0 %v1774_v6  ;;  %1784 = vmatpush3.bf16.msra.mxu1 %v2037_v10  ;;  %s626_s13 = scalar_lea.vmem [#allocation2], %s2122_s12  ;;  %s475_s30 = scalar_lea.vmem %s2275_s29, %s2070_s6 }
  0x16   : > { %1779 = vmatprep.subr.bf16.mxu0 %v1778_v13  ;;  %1785 = vmatprep.subr.bf16.mxu1 %v1979_v1  ;;  %s2148_s14 = scalar_select %p335_p4, 3, 4 }
  0x17   : > { %s2173_s18 = scalar_select %p335_p4, 4, 3 }
  0x18   : > { %s771_s17 = scalar_lea.vmem [#allocation2], %s2148_s14  ;;  %s622_s19 = scalar_lea.vmem %s2275_s29, %s2096_s10 }
  0x19   : > { %1781 = vmatpush3.bf16.msra.mxu0 %v1778_v13  ;;  %1787 = vmatpush3.bf16.msra.mxu1 %v2039_v14  ;;  %s916_s20 = scalar_lea.vmem [#allocation2], %s2173_s18  ;;  %s767_s5 = scalar_lea.vmem %s2275_s29, %s2122_s12 }
  0x1a   : > { %1788 = vmatprep.subr.bf16.mxu0 %v1979_v1  ;;  %1794 = vmatprep.subr.bf16.mxu1 %v1979_v1  ;;  %s2198_s21 = scalar_select %p335_p4, 5, 2 }
  0x1b   : > { %s2218_s23 = scalar_select %p335_p4, 6, 1 }
  0x1c   : > { %1684 = vmatmul.mubr.msk.f32.vlgmr.msra.gmra.mrb[0].mxu0 %vm238_vm0, %v233_v15  ;;  %1695 = vmatmul.mubr.f32.vlgmr.msra.gmra.mrb[0].mxu1 %v1981_v2  ;;  %s1061_s22 = scalar_lea.vmem [#allocation2], %s2198_s21  ;;  %s912_s6 = scalar_lea.vmem %s2275_s29, %s2148_s14 }
  0x1d   : > { %1790 = vmatpush3.bf16.msra.mxu0 %v2037_v10  ;;  %1705 = vmatprep.mubr.msk.f32.mxu0 %vm1980_vm1, %v1981_v2  ;;  %s1206_s24 = scalar_lea.vmem [#allocation2], %s2218_s23 }
  0x1e   : > { %1791 = vmatprep.subr.bf16.mxu0 %v1979_v1  ;;  %1796 = vmatpush3.bf16.msra.mxu1 %v2037_v10  ;;  %s2235_s25 = scalar_select %p335_p4, 7, 0 }
  0x1f   : > { %1797 = vmatprep.subr.bf16.mxu1 %v1979_v1  ;;  %1716 = vmatprep.mubr.msk.f32.mxu1 %vm1980_vm1, %v1981_v2 }
  0x20   : > { %s1351_s26 = scalar_lea.vmem [#allocation2], %s2235_s25  ;;  %s1492_s10 = scalar_lea.vmem %s2275_s29, %s2235_s25 }
  0x21   : > { %1793 = vmatpush3.bf16.msra.mxu0 %v2039_v14 }
  0x22   : > { %1799 = vmatpush3.bf16.msra.mxu1 %v2039_v14  ;;  %1800 = vmatprep.subr.bf16.mxu0 %v1979_v1 }
  0x23   : > { %1806 = vmatprep.subr.bf16.mxu1 %v1979_v1 }
  0xef   : > { %v1685_v17 = vpop.f32.mrb[0].mxu0  ;;  %v409_v18 = vpop.f32.mrb[0].mxu1 }
  0xf0   : > { %v328_v19 = vadd.f32 %v1685_v17, %v1600_v16  ;;  %v311_v20 = vpop.f32.mrb[1].mxu0  ;;  %v1696_v21 = vpop.f32.mrb[1].mxu1  ;;  %v414_v23 = vrot.slane %v409_v18, 1 }
  0xf1   : > { %v327_v22 = vadd.f32 %v1600_v16, %v311_v20 }
  0xf2   : > { %330 = vst [vmem:[#allocation2 + $0x8] sm:$0xff] %v328_v19 }
  0xf3   : > { %329 = vst [vmem:[#allocation2] sm:$0xff] %v327_v22 }
  0xfa   : > { %v339_v24 = vld [vmem:[%s337_s7 + $0x8] sm:$0x1]  ;;  %v338_v25 = vld [vmem:[%s337_s7] sm:$0x1]  ;;  %s1057_s7 = scalar_lea.vmem %s2275_s29, %s2173_s18 }
  0xfb   : > { %v418_v26 = vadd.f32 %v414_v23, %v339_v24  ;;  %v417_v27 = vadd.f32 %v409_v18, %v338_v25  ;;  %v481_v57 = vld [vmem:[%s480_s11] sm:$0x1]  ;;  %v482_v62 = vld [vmem:[%s480_s11 + $0x8] sm:$0x1] }
  0xfd   : > { %1843 = vtanh.f32 %v418_v26  ;;  %v1602_v30 = vmul.f32 -1.442695, %v418_v26  ;;  %v1601_v31 = vmul.f32 -1.442695, %v417_v27 }
  0xfe   : > { %1845 = vtanh.f32 %v417_v27 }
  0xff   : > { %1847 = vpow2.f32 %v1602_v30 }
 0x100   : > { %1849 = vpow2.f32 %v1601_v31 }
 0x107   : > { %v1844_v28 = vpop.eup %1843 }
 0x108   : > { %439 = vrot.lane.b32.xlu0 %v1844_v28, %s1982_s8  ;;  %v1846_v29 = vpop.eup %1845 }
 0x109   : > { %v1848_v32 = vpop.eup %1847 }
 0x10a   : > { %v426_v33 = vadd.f32 1.0, %v1848_v32  ;;  %v1850_v34 = vpop.eup %1849 }
 0x10b   : > { %v425_v35 = vadd.f32 1.0, %v1850_v34 }
 0x10c   : > { %437 = vrot.lane.b32.xlu0 %v1846_v29, %s1982_s8  ;;  %1851 = vrcp.f32 %v426_v33  ;;  %v627_v33 = vld [vmem:[%s626_s13] sm:$0x1] }
 0x10d   : > { %1853 = vrcp.f32 %v425_v35 }
 0x116   : > { %v1852_v36 = vpop.eup %1851 }
 0x117   : > { %v1854_v39 = vpop.eup %1853  ;;  %v434_v42 = vmul.f32 0.0, %v1852_v36 }
 0x118   : > { %v433_v45 = vmul.f32 0.0, %v1854_v39 }
 0x17a   : > { %v440_v37 = vpop.permute.xlu0 %439 }
 0x17b   : > { %v444_v38 = vmul.f32 %v1852_v36, %v440_v37 }
 0x17d   : > { %449 = vrot.lane.b32.xlu1 %v444_v38, %s1983_s9  ;;  %v628_v38 = vld [vmem:[%s626_s13 + $0x8] sm:$0x1] }
 0x17e   : > { %v438_v40 = vpop.permute.xlu0 %437 }
 0x17f   : > { %v443_v41 = vmul.f32 %v1854_v39, %v438_v40 }
 0x181   : > { %447 = vrot.lane.b32.xlu1 %v443_v41, %s1983_s9 }
 0x1ef   : > { %v450_v43 = vpop.permute.xlu1 %449 }
 0x1f0   : > { %v454_v44 = vadd.f32 %v450_v43, %v434_v42 }
 0x1f2   : > { %1855 = vtanh.f32 %v454_v44 }
 0x1f3   : > { %v448_v46 = vpop.permute.xlu1 %447 }
 0x1f4   : > { %v453_v47 = vadd.f32 %v448_v46, %v433_v45 }
 0x1f6   : > { %1857 = vtanh.f32 %v453_v47 }
 0x1fc   : > { %v1856_v48 = vpop.eup %1855 }
 0x1fd   : > { %461 = vrot.lane.b32.xlu0 %v1856_v48, %s1982_s8 }
 0x200   : > { %v1858_v49 = vpop.eup %1857 }
 0x201   : > { %459 = vrot.lane.b32.xlu1 %v1858_v49, %s1982_s8 }
 0x26f   : > { %v462_v50 = vpop.permute.xlu0 %461 }
 0x270   : > { %v2079_v51 = vmul.f32 %v1852_v36, %v462_v50 }
 0x272   : > { %v483_v53 = vrot.slane %v2079_v51, 7 }
 0x273   : > { %v460_v52 = vpop.permute.xlu1 %459 }
 0x274   : > { %v2082_v54 = vmul.f32 %v1854_v39, %v460_v52 }
 0x276   : > { %v485_v55 = vsel %vm484_vm2, %v483_v53, %v2082_v54 }
 0x277   : > { %486 = vrot.lane.b32.xlu0 %v485_v55, %s1983_s9 }
 0x2e9   : > { %v487_v56 = vpop.permute.xlu0 %486 }
 0x2ea   : > { %1706 = vmatmul.mubr.msk.f32.vlgmr.msra.gmra.mrb[2].mxu0 %vm238_vm0, %v487_v56 }
 0x2eb   : > { %1802 = vmatpush3.bf16.msra.mxu0 %v2037_v10  ;;  %1727 = vmatprep.mubr.msk.f32.mxu0 %vm1980_vm1, %v1981_v2 }
 0x2ec   : > { %1803 = vmatprep.subr.bf16.mxu0 %v1979_v1 }
 0x2ef   : > { %1805 = vmatpush3.bf16.msra.mxu0 %v2039_v14 }
 0x2f0   : > { %1812 = vmatprep.subr.bf16.mxu0 %v1979_v1 }
 0x3bd   : > { %v556_v58 = vpop.f32.mrb[2].mxu0 }
 0x3be   : > { %v561_v59 = vrot.slane %v556_v58, 1  ;;  %v564_v60 = vadd.f32 %v556_v58, %v481_v57  ;;  %v1707_v61 = vpop.f32.mrb[3].mxu0 }
 0x3c0   : > { %v565_v63 = vadd.f32 %v561_v59, %v482_v62  ;;  %1859 = vtanh.f32 %v564_v60  ;;  %v1604_v4 = vmul.f32 -1.442695, %v564_v60 }
 0x3c2   : > { %1861 = vtanh.f32 %v565_v63  ;;  %v1605_v5 = vmul.f32 -1.442695, %v565_v63 }
 0x3c3   : > { %1863 = vpow2.f32 %v1604_v4 }
 0x3c4   : > { %1865 = vpow2.f32 %v1605_v5 }
 0x3ca   : > { %v1860_v0 = vpop.eup %1859 }
 0x3cb   : > { %584 = vrot.lane.b32.xlu0 %v1860_v0, %s1982_s8 }
 0x3cc   : > { %v1862_v3 = vpop.eup %1861 }
 0x3cd   : > { %586 = vrot.lane.b32.xlu1 %v1862_v3, %s1982_s8  ;;  %v1864_v6 = vpop.eup %1863 }
 0x3ce   : > { %v1866_v7 = vpop.eup %1865  ;;  %v572_v8 = vadd.f32 1.0, %v1864_v6 }
 0x3cf   : > { %v573_v9 = vadd.f32 1.0, %v1866_v7 }
 0x3d0   : > { %1867 = vrcp.f32 %v572_v8 }
 0x3d1   : > { %1869 = vrcp.f32 %v573_v9  ;;  %v772_v9 = vld [vmem:[%s771_s17] sm:$0x1] }
 0x3da   : > { %v1868_v11 = vpop.eup %1867 }
 0x3db   : > { %v1870_v15 = vpop.eup %1869  ;;  %v580_v18 = vmul.f32 %v1868_v11, %v453_v47 }
 0x3dc   : > { %v581_v21 = vmul.f32 %v1870_v15, %v454_v44 }
 0x43d   : > { %v585_v12 = vpop.permute.xlu0 %584 }
 0x43e   : > { %v590_v13 = vmul.f32 %v1868_v11, %v585_v12 }
 0x43f   : > { %v587_v16 = vpop.permute.xlu1 %586 }
 0x440   : > { %594 = vrot.lane.b32.xlu0 %v590_v13, %s1983_s9  ;;  %v591_v17 = vmul.f32 %v1870_v15, %v587_v16  ;;  %v773_v16 = vld [vmem:[%s771_s17 + $0x8] sm:$0x1] }
 0x442   : > { %596 = vrot.lane.b32.xlu1 %v591_v17, %s1983_s9 }
 0x4b2   : > { %v595_v19 = vpop.permute.xlu0 %594 }
 0x4b3   : > { %v600_v20 = vadd.f32 %v595_v19, %v580_v18 }
 0x4b4   : > { %v597_v22 = vpop.permute.xlu1 %596 }
 0x4b5   : > { %1871 = vtanh.f32 %v600_v20  ;;  %v601_v23 = vadd.f32 %v597_v22, %v581_v21 }
 0x4b7   : > { %1873 = vtanh.f32 %v601_v23 }
 0x4bf   : > { %v1872_v24 = vpop.eup %1871 }
 0x4c0   : > { %606 = vrot.lane.b32.xlu0 %v1872_v24, %s1982_s8 }
 0x4c1   : > { %v1874_v25 = vpop.eup %1873 }
 0x4c2   : > { %608 = vrot.lane.b32.xlu1 %v1874_v25, %s1982_s8 }
 0x532   : > { %v607_v26 = vpop.permute.xlu0 %606 }
 0x533   : > { %v2107_v29 = vmul.f32 %v1868_v11, %v607_v26 }
 0x534   : > { %v609_v27 = vpop.permute.xlu1 %608 }
 0x535   : > { %v2105_v28 = vmul.f32 %v1870_v15, %v609_v27 }
 0x537   : > { %v629_v30 = vrot.slane %v2105_v28, 7 }
 0x539   : > { %v630_v31 = vsel %vm484_vm2, %v629_v30, %v2107_v29 }
 0x53a   : > { %631 = vrot.lane.b32.xlu1 %v630_v31, %s1983_s9 }
 0x5ac   : > { %v632_v32 = vpop.permute.xlu1 %631 }
 0x5ad   : > { %1717 = vmatmul.mubr.msk.f32.vlgmr.msra.gmra.mrb[2].mxu1 %vm238_vm0, %v632_v32 }
 0x5ae   : > { %1808 = vmatpush3.bf16.msra.mxu1 %v2037_v10  ;;  %1738 = vmatprep.mubr.msk.f32.mxu1 %vm1980_vm1, %v1981_v2 }
 0x5af   : > { %1809 = vmatprep.subr.bf16.mxu1 %v1979_v1 }
 0x5b2   : > { %1811 = vmatpush3.bf16.msra.mxu1 %v2039_v14 }
 0x5b3   : > { %1818 = vmatprep.subr.bf16.mxu1 %v1979_v1 }
 0x680   : > { %v701_v34 = vpop.f32.mrb[2].mxu1 }
 0x681   : > { %v706_v35 = vrot.slane %v701_v34, 1  ;;  %v709_v36 = vadd.f32 %v701_v34, %v627_v33  ;;  %v1718_v37 = vpop.f32.mrb[3].mxu1 }
 0x683   : > { %v710_v39 = vadd.f32 %v706_v35, %v628_v38  ;;  %1875 = vtanh.f32 %v709_v36  ;;  %v1607_v42 = vmul.f32 -1.442695, %v709_v36 }
 0x685   : > { %1877 = vtanh.f32 %v710_v39  ;;  %v1608_v43 = vmul.f32 -1.442695, %v710_v39 }
 0x686   : > { %1879 = vpow2.f32 %v1607_v42 }
 0x687   : > { %1881 = vpow2.f32 %v1608_v43 }
 0x68d   : > { %v1876_v40 = vpop.eup %1875 }
 0x68e   : > { %729 = vrot.lane.b32.xlu1 %v1876_v40, %s1982_s8 }
 0x68f   : > { %v1878_v41 = vpop.eup %1877 }
 0x690   : > { %731 = vrot.lane.b32.xlu0 %v1878_v41, %s1982_s8  ;;  %v1880_v44 = vpop.eup %1879 }
 0x691   : > { %v1882_v45 = vpop.eup %1881  ;;  %v717_v46 = vadd.f32 1.0, %v1880_v44 }
 0x692   : > { %v718_v47 = vadd.f32 1.0, %v1882_v45 }
 0x693   : > { %1883 = vrcp.f32 %v717_v46 }
 0x694   : > { %1885 = vrcp.f32 %v718_v47 }
 0x69d   : > { %v1884_v48 = vpop.eup %1883 }
 0x69e   : > { %v1886_v52 = vpop.eup %1885  ;;  %v725_v56 = vmul.f32 %v1884_v48, %v600_v20 }
 0x69f   : > { %v726_v59 = vmul.f32 %v1886_v52, %v601_v23 }
 0x700   : > { %v730_v49 = vpop.permute.xlu1 %729 }
 0x701   : > { %v735_v50 = vmul.f32 %v1884_v48, %v730_v49  ;;  %v917_v49 = vld [vmem:[%s916_s20] sm:$0x1] }
 0x702   : > { %v732_v53 = vpop.permute.xlu0 %731 }
 0x703   : > { %739 = vrot.lane.b32.xlu1 %v735_v50, %s1983_s9  ;;  %v736_v55 = vmul.f32 %v1886_v52, %v732_v53 }
 0x705   : > { %741 = vrot.lane.b32.xlu0 %v736_v55, %s1983_s9 }
 0x775   : > { %v740_v57 = vpop.permute.xlu1 %739 }
 0x776   : > { %v745_v58 = vadd.f32 %v740_v57, %v725_v56  ;;  %v918_v56 = vld [vmem:[%s916_s20 + $0x8] sm:$0x1] }
 0x777   : > { %v742_v60 = vpop.permute.xlu0 %741 }
 0x778   : > { %1887 = vtanh.f32 %v745_v58  ;;  %v746_v61 = vadd.f32 %v742_v60, %v726_v59 }
 0x77a   : > { %1889 = vtanh.f32 %v746_v61 }
 0x782   : > { %v1888_v62 = vpop.eup %1887 }
 0x783   : > { %751 = vrot.lane.b32.xlu1 %v1888_v62, %s1982_s8 }
 0x784   : > { %v1890_v63 = vpop.eup %1889 }
 0x785   : > { %753 = vrot.lane.b32.xlu0 %v1890_v63, %s1982_s8 }
 0x7f5   : > { %v752_v0 = vpop.permute.xlu1 %751 }
 0x7f6   : > { %v2133_v5 = vmul.f32 %v1884_v48, %v752_v0 }
 0x7f7   : > { %v754_v3 = vpop.permute.xlu0 %753 }
 0x7f8   : > { %v2131_v4 = vmul.f32 %v1886_v52, %v754_v3 }
 0x7fa   : > { %v774_v6 = vrot.slane %v2131_v4, 7 }
 0x7fc   : > { %v775_v7 = vsel %vm484_vm2, %v774_v6, %v2133_v5 }
 0x7fd   : > { %776 = vrot.lane.b32.xlu0 %v775_v7, %s1983_s9 }
 0x86f   : > { %v777_v8 = vpop.permute.xlu0 %776 }
 0x870   : > { %1728 = vmatmul.mubr.msk.f32.vlgmr.msra.gmra.mrb[4].mxu0 %vm238_vm0, %v777_v8 }
 0x871   : > { %1814 = vmatpush3.bf16.msra.mxu0 %v2037_v10  ;;  %1749 = vmatprep.mubr.msk.f32.mxu0 %vm1980_vm1, %v1981_v2 }
 0x872   : > { %1815 = vmatprep.subr.bf16.mxu0 %v1979_v1 }
 0x875   : > { %1817 = vmatpush3.bf16.msra.mxu0 %v2039_v14 }
 0x876   : > { %1824 = vmatprep.subr.bf16.mxu0 %v1979_v1 }
 0x943   : > { %v846_v11 = vpop.f32.mrb[4].mxu0 }
 0x944   : > { %v851_v12 = vrot.slane %v846_v11, 1  ;;  %v854_v13 = vadd.f32 %v846_v11, %v772_v9  ;;  %v1729_v15 = vpop.f32.mrb[5].mxu0 }
 0x946   : > { %v855_v17 = vadd.f32 %v851_v12, %v773_v16  ;;  %1891 = vtanh.f32 %v854_v13  ;;  %v1610_v20 = vmul.f32 -1.442695, %v854_v13 }
 0x948   : > { %1893 = vtanh.f32 %v855_v17  ;;  %v1611_v21 = vmul.f32 -1.442695, %v855_v17 }
 0x949   : > { %1895 = vpow2.f32 %v1610_v20 }
 0x94a   : > { %1897 = vpow2.f32 %v1611_v21 }
 0x950   : > { %v1892_v18 = vpop.eup %1891 }
 0x951   : > { %874 = vrot.lane.b32.xlu0 %v1892_v18, %s1982_s8 }
 0x952   : > { %v1894_v19 = vpop.eup %1893 }
 0x953   : > { %876 = vrot.lane.b32.xlu1 %v1894_v19, %s1982_s8  ;;  %v1896_v22 = vpop.eup %1895 }
 0x954   : > { %v1898_v23 = vpop.eup %1897  ;;  %v862_v24 = vadd.f32 1.0, %v1896_v22 }
 0x955   : > { %v863_v25 = vadd.f32 1.0, %v1898_v23 }
 0x956   : > { %1899 = vrcp.f32 %v862_v24 }
 0x957   : > { %1901 = vrcp.f32 %v863_v25 }
 0x960   : > { %v1900_v26 = vpop.eup %1899 }
 0x961   : > { %v1902_v31 = vpop.eup %1901  ;;  %v870_v34 = vmul.f32 %v1900_v26, %v745_v58 }
 0x962   : > { %v871_v37 = vmul.f32 %v1902_v31, %v746_v61 }
 0x9c3   : > { %v875_v27 = vpop.permute.xlu0 %874 }
 0x9c4   : > { %v880_v30 = vmul.f32 %v1900_v26, %v875_v27 }
 0x9c5   : > { %v877_v32 = vpop.permute.xlu1 %876 }
 0x9c6   : > { %884 = vrot.lane.b32.xlu0 %v880_v30, %s1983_s9  ;;  %v881_v33 = vmul.f32 %v1902_v31, %v877_v32 }
 0x9c8   : > { %886 = vrot.lane.b32.xlu1 %v881_v33, %s1983_s9 }
 0xa38   : > { %v885_v35 = vpop.permute.xlu0 %884 }
 0xa39   : > { %v890_v36 = vadd.f32 %v885_v35, %v870_v34 }
 0xa3a   : > { %v887_v38 = vpop.permute.xlu1 %886 }
 0xa3b   : > { %1903 = vtanh.f32 %v890_v36  ;;  %v891_v39 = vadd.f32 %v887_v38, %v871_v37 }
 0xa3d   : > { %1905 = vtanh.f32 %v891_v39 }
 0xa45   : > { %v1904_v40 = vpop.eup %1903 }
 0xa46   : > { %896 = vrot.lane.b32.xlu0 %v1904_v40, %s1982_s8 }
 0xa47   : > { %v1906_v41 = vpop.eup %1905 }
 0xa48   : > { %898 = vrot.lane.b32.xlu1 %v1906_v41, %s1982_s8 }
 0xab8   : > { %v897_v42 = vpop.permute.xlu0 %896 }
 0xab9   : > { %v2159_v45 = vmul.f32 %v1900_v26, %v897_v42 }
 0xaba   : > { %v899_v43 = vpop.permute.xlu1 %898 }
 0xabb   : > { %v2157_v44 = vmul.f32 %v1902_v31, %v899_v43  ;;  %v1062_v31 = vld [vmem:[%s1061_s22] sm:$0x1] }
 0xabd   : > { %v919_v46 = vrot.slane %v2157_v44, 7 }
 0xabf   : > { %v920_v47 = vsel %vm484_vm2, %v919_v46, %v2159_v45 }
 0xac0   : > { %921 = vrot.lane.b32.xlu1 %v920_v47, %s1983_s9 }
 0xb32   : > { %v922_v48 = vpop.permute.xlu1 %921 }
 0xb33   : > { %1739 = vmatmul.mubr.msk.f32.vlgmr.msra.gmra.mrb[4].mxu1 %vm238_vm0, %v922_v48 }
 0xb34   : > { %1820 = vmatpush3.bf16.msra.mxu1 %v2037_v10  ;;  %1760 = vmatprep.mubr.msk.f32.mxu1 %vm1980_vm1, %v1981_v2 }
 0xb35   : > { %1821 = vmatprep.subr.bf16.mxu1 %v1979_v1 }
 0xb38   : > { %1823 = vmatpush3.bf16.msra.mxu1 %v2039_v14 }
 0xc06   : > { %v991_v50 = vpop.f32.mrb[4].mxu1 }
 0xc07   : > { %v996_v52 = vrot.slane %v991_v50, 1  ;;  %v999_v53 = vadd.f32 %v991_v50, %v917_v49  ;;  %v1740_v55 = vpop.f32.mrb[5].mxu1 }
 0xc09   : > { %v1000_v57 = vadd.f32 %v996_v52, %v918_v56  ;;  %1907 = vtanh.f32 %v999_v53  ;;  %v1613_v60 = vmul.f32 -1.442695, %v999_v53 }
 0xc0b   : > { %1909 = vtanh.f32 %v1000_v57  ;;  %v1614_v61 = vmul.f32 -1.442695, %v1000_v57 }
 0xc0c   : > { %1911 = vpow2.f32 %v1613_v60 }
 0xc0d   : > { %1913 = vpow2.f32 %v1614_v61 }
 0xc13   : > { %v1908_v58 = vpop.eup %1907 }
 0xc14   : > { %1019 = vrot.lane.b32.xlu1 %v1908_v58, %s1982_s8 }
 0xc15   : > { %v1910_v59 = vpop.eup %1909 }
 0xc16   : > { %1021 = vrot.lane.b32.xlu0 %v1910_v59, %s1982_s8  ;;  %v1912_v62 = vpop.eup %1911 }
 0xc17   : > { %v1914_v63 = vpop.eup %1913  ;;  %v1007_v0 = vadd.f32 1.0, %v1912_v62 }
 0xc18   : > { %v1008_v3 = vadd.f32 1.0, %v1914_v63 }
 0xc19   : > { %1915 = vrcp.f32 %v1007_v0 }
 0xc1a   : > { %1917 = vrcp.f32 %v1008_v3 }
 0xc23   : > { %v1916_v6 = vpop.eup %1915 }
 0xc24   : > { %v1918_v9 = vpop.eup %1917  ;;  %v1015_v13 = vmul.f32 %v1916_v6, %v890_v36  ;;  %v1063_v36 = vld [vmem:[%s1061_s22 + $0x8] sm:$0x1] }
 0xc25   : > { %v1016_v17 = vmul.f32 %v1918_v9, %v891_v39 }
 0xc86   : > { %v1020_v7 = vpop.permute.xlu1 %1019 }
 0xc87   : > { %v1025_v8 = vmul.f32 %v1916_v6, %v1020_v7  ;;  %v1207_v7 = vld [vmem:[%s1206_s24] sm:$0x1] }
 0xc88   : > { %v1022_v11 = vpop.permute.xlu0 %1021 }
 0xc89   : > { %1029 = vrot.lane.b32.xlu1 %v1025_v8, %s1983_s9  ;;  %v1026_v12 = vmul.f32 %v1918_v9, %v1022_v11 }
 0xc8b   : > { %1031 = vrot.lane.b32.xlu0 %v1026_v12, %s1983_s9 }
 0xcfb   : > { %v1030_v15 = vpop.permute.xlu1 %1029 }
 0xcfc   : > { %v1035_v16 = vadd.f32 %v1030_v15, %v1015_v13  ;;  %v1208_v13 = vld [vmem:[%s1206_s24 + $0x8] sm:$0x1] }
 0xcfd   : > { %v1032_v18 = vpop.permute.xlu0 %1031 }
 0xcfe   : > { %1919 = vtanh.f32 %v1035_v16  ;;  %v1036_v19 = vadd.f32 %v1032_v18, %v1016_v17 }
 0xd00   : > { %1921 = vtanh.f32 %v1036_v19 }
 0xd08   : > { %v1920_v20 = vpop.eup %1919 }
 0xd09   : > { %1041 = vrot.lane.b32.xlu1 %v1920_v20, %s1982_s8 }
 0xd0a   : > { %v1922_v21 = vpop.eup %1921 }
 0xd0b   : > { %1043 = vrot.lane.b32.xlu0 %v1922_v21, %s1982_s8 }
 0xd7b   : > { %v1042_v22 = vpop.permute.xlu1 %1041 }
 0xd7c   : > { %v2184_v25 = vmul.f32 %v1916_v6, %v1042_v22 }
 0xd7d   : > { %v1044_v23 = vpop.permute.xlu0 %1043 }
 0xd7e   : > { %v2182_v24 = vmul.f32 %v1918_v9, %v1044_v23 }
 0xd80   : > { %v1064_v26 = vrot.slane %v2182_v24, 7 }
 0xd82   : > { %v1065_v27 = vsel %vm484_vm2, %v1064_v26, %v2184_v25 }
 0xd83   : > { %1066 = vrot.lane.b32.xlu0 %v1065_v27, %s1983_s9 }
 0xdf5   : > { %v1067_v30 = vpop.permute.xlu0 %1066 }
 0xdf6   : > { %1750 = vmatmul.mubr.msk.f32.vlgmr.msra.gmra.mrb[6].mxu0 %vm238_vm0, %v1067_v30 }
 0xdf7   : > { %1826 = vmatpush3.bf16.msra.mxu0 %v2037_v10  ;;  %1771 = vmatprep.mubr.msk.f32.mxu0 %vm1980_vm1, %v1981_v2 }
 0xdf8   : > { %1827 = vmatprep.subr.bf16.mxu0 %v1979_v1 }
 0xdfb   : > { %1829 = vmatpush3.bf16.msra.mxu0 %v2039_v14 }
 0xec9   : > { %v1136_v32 = vpop.f32.mrb[6].mxu0 }
 0xeca   : > { %v1141_v33 = vrot.slane %v1136_v32, 1  ;;  %v1144_v34 = vadd.f32 %v1136_v32, %v1062_v31  ;;  %v1751_v35 = vpop.f32.mrb[7].mxu0 }
 0xecc   : > { %v1145_v37 = vadd.f32 %v1141_v33, %v1063_v36  ;;  %1923 = vtanh.f32 %v1144_v34  ;;  %v1616_v2 = vmul.f32 -1.442695, %v1144_v34 }
 0xece   : > { %1925 = vtanh.f32 %v1145_v37  ;;  %v1617_v14 = vmul.f32 -1.442695, %v1145_v37 }
 0xecf   : > { %1927 = vpow2.f32 %v1616_v2 }
 0xed0   : > { %1929 = vpow2.f32 %v1617_v14 }
 0xed6   : > { %v1924_v10 = vpop.eup %1923 }
 0xed7   : > { %1164 = vrot.lane.b32.xlu0 %v1924_v10, %s1982_s8 }
 0xed8   : > { %v1926_v1 = vpop.eup %1925 }
 0xed9   : > { %1166 = vrot.lane.b32.xlu1 %v1926_v1, %s1982_s8  ;;  %v1928_v38 = vpop.eup %1927 }
 0xeda   : > { %v1930_v39 = vpop.eup %1929  ;;  %v1152_v40 = vadd.f32 1.0, %v1928_v38 }
 0xedb   : > { %v1153_v41 = vadd.f32 1.0, %v1930_v39 }
 0xedc   : > { %1931 = vrcp.f32 %v1152_v40 }
 0xedd   : > { %1933 = vrcp.f32 %v1153_v41 }
 0xee6   : > { %v1932_v42 = vpop.eup %1931 }
 0xee7   : > { %v1934_v47 = vpop.eup %1933  ;;  %v1160_v50 = vmul.f32 %v1932_v42, %v1035_v16 }
 0xee8   : > { %v1161_v55 = vmul.f32 %v1934_v47, %v1036_v19 }
 0xf49   : > { %v1165_v43 = vpop.permute.xlu0 %1164 }
 0xf4a   : > { %v1170_v46 = vmul.f32 %v1932_v42, %v1165_v43 }
 0xf4b   : > { %v1167_v48 = vpop.permute.xlu1 %1166 }
 0xf4c   : > { %1174 = vrot.lane.b32.xlu0 %v1170_v46, %s1983_s9  ;;  %v1171_v49 = vmul.f32 %v1934_v47, %v1167_v48 }
 0xf4e   : > { %1176 = vrot.lane.b32.xlu1 %v1171_v49, %s1983_s9 }
 0xfbe   : > { %v1175_v52 = vpop.permute.xlu0 %1174 }
 0xfbf   : > { %v1180_v53 = vadd.f32 %v1175_v52, %v1160_v50 }
 0xfc0   : > { %v1177_v56 = vpop.permute.xlu1 %1176 }
 0xfc1   : > { %1935 = vtanh.f32 %v1180_v53  ;;  %v1181_v57 = vadd.f32 %v1177_v56, %v1161_v55 }
 0xfc3   : > { %1937 = vtanh.f32 %v1181_v57 }
 0xfcb   : > { %v1936_v58 = vpop.eup %1935 }
 0xfcc   : > { %1186 = vrot.lane.b32.xlu0 %v1936_v58, %s1982_s8 }
 0xfcd   : > { %v1938_v59 = vpop.eup %1937 }
 0xfce   : > { %1188 = vrot.lane.b32.xlu1 %v1938_v59, %s1982_s8 }
0x103e   : > { %v1187_v60 = vpop.permute.xlu0 %1186 }
0x103f   : > { %v2209_v63 = vmul.f32 %v1932_v42, %v1187_v60 }
0x1040   : > { %v1189_v61 = vpop.permute.xlu1 %1188 }
0x1041   : > { %v2207_v62 = vmul.f32 %v1934_v47, %v1189_v61  ;;  %v1352_v47 = vld [vmem:[%s1351_s26] sm:$0x1] }
0x1043   : > { %v1209_v0 = vrot.slane %v2207_v62, 7 }
0x1045   : > { %v1210_v3 = vsel %vm484_vm2, %v1209_v0, %v2209_v63 }
0x1046   : > { %1211 = vrot.lane.b32.xlu1 %v1210_v3, %s1983_s9 }
0x10b8   : > { %v1212_v6 = vpop.permute.xlu1 %1211 }
0x10b9   : > { %1761 = vmatmul.mubr.msk.f32.vlgmr.msra.gmra.mrb[6].mxu1 %vm238_vm0, %v1212_v6 }
0x118c   : > { %v1281_v8 = vpop.f32.mrb[6].mxu1 }
0x118d   : > { %v1286_v9 = vrot.slane %v1281_v8, 1  ;;  %v1289_v11 = vadd.f32 %v1281_v8, %v1207_v7  ;;  %v1762_v12 = vpop.f32.mrb[7].mxu1 }
0x118f   : > { %v1290_v15 = vadd.f32 %v1286_v9, %v1208_v13  ;;  %1939 = vtanh.f32 %v1289_v11  ;;  %v1619_v18 = vmul.f32 -1.442695, %v1289_v11 }
0x1191   : > { %1941 = vtanh.f32 %v1290_v15  ;;  %v1620_v19 = vmul.f32 -1.442695, %v1290_v15 }
0x1192   : > { %1943 = vpow2.f32 %v1619_v18 }
0x1193   : > { %1945 = vpow2.f32 %v1620_v19 }
0x1199   : > { %v1940_v16 = vpop.eup %1939 }
0x119a   : > { %1309 = vrot.lane.b32.xlu1 %v1940_v16, %s1982_s8 }
0x119b   : > { %v1942_v17 = vpop.eup %1941 }
0x119c   : > { %1311 = vrot.lane.b32.xlu0 %v1942_v17, %s1982_s8  ;;  %v1944_v20 = vpop.eup %1943 }
0x119d   : > { %v1946_v21 = vpop.eup %1945  ;;  %v1297_v22 = vadd.f32 1.0, %v1944_v20 }
0x119e   : > { %v1298_v23 = vadd.f32 1.0, %v1946_v21 }
0x119f   : > { %1947 = vrcp.f32 %v1297_v22 }
0x11a0   : > { %1949 = vrcp.f32 %v1298_v23 }
0x11a9   : > { %v1948_v26 = vpop.eup %1947 }
0x11aa   : > { %v1950_v31 = vpop.eup %1949  ;;  %v1305_v34 = vmul.f32 %v1948_v26, %v1180_v53  ;;  %v1353_v53 = vld [vmem:[%s1351_s26 + $0x8] sm:$0x1] }
0x11ab   : > { %v1306_v37 = vmul.f32 %v1950_v31, %v1181_v57 }
0x120c   : > { %v1310_v27 = vpop.permute.xlu1 %1309 }
0x120d   : > { %v1315_v30 = vmul.f32 %v1948_v26, %v1310_v27 }
0x120e   : > { %v1312_v32 = vpop.permute.xlu0 %1311 }
0x120f   : > { %1319 = vrot.lane.b32.xlu1 %v1315_v30, %s1983_s9  ;;  %v1316_v33 = vmul.f32 %v1950_v31, %v1312_v32 }
0x1211   : > { %1321 = vrot.lane.b32.xlu0 %v1316_v33, %s1983_s9 }
0x1281   : > { %v1320_v35 = vpop.permute.xlu1 %1319 }
0x1282   : > { %v1325_v36 = vadd.f32 %v1320_v35, %v1305_v34 }
0x1283   : > { %v1322_v10 = vpop.permute.xlu0 %1321 }
0x1284   : > { %1951 = vtanh.f32 %v1325_v36  ;;  %v1326_v1 = vadd.f32 %v1322_v10, %v1306_v37 }
0x1286   : > { %1953 = vtanh.f32 %v1326_v1 }
0x128e   : > { %v1952_v2 = vpop.eup %1951 }
0x128f   : > { %1331 = vrot.lane.b32.xlu1 %v1952_v2, %s1982_s8 }
0x1290   : > { %v1954_v14 = vpop.eup %1953 }
0x1291   : > { %1333 = vrot.lane.b32.xlu0 %v1954_v14, %s1982_s8 }
0x1301   : > { %v1332_v38 = vpop.permute.xlu1 %1331 }
0x1302   : > { %v1337_v41 = vmul.f32 %v1948_v26, %v1332_v38 }
0x1303   : > { %v1334_v39 = vpop.permute.xlu0 %1333 }
0x1304   : > { %v2227_v40 = vmul.f32 %v1950_v31, %v1334_v39 }
0x1306   : > { %v1354_v42 = vrot.slane %v2227_v40, 7 }
0x1308   : > { %v1355_v43 = vsel %vm484_vm2, %v1354_v42, %v1337_v41 }
0x1309   : > { %1356 = vrot.lane.b32.xlu0 %v1355_v43, %s1983_s9 }
0x137b   : > { %v1357_v46 = vpop.permute.xlu0 %1356 }
0x137c   : > { %1772 = vmatmul.mubr.msk.f32.vlgmr.msra.gmra.mrb[8].mxu0 %vm238_vm0, %v1357_v46 }
0x144f   : > { %v1426_v48 = vpop.f32.mrb[8].mxu0 }
0x1450   : > { %v1431_v49 = vrot.slane %v1426_v48, 1  ;;  %v1434_v50 = vadd.f32 %v1426_v48, %v1352_v47  ;;  %v1773_v52 = vpop.f32.mrb[9].mxu0 }
0x1452   : > { %v1435_v55 = vadd.f32 %v1431_v49, %v1353_v53  ;;  %1955 = vtanh.f32 %v1434_v50  ;;  %v1622_v58 = vmul.f32 -1.442695, %v1434_v50 }
0x1454   : > { %1957 = vtanh.f32 %v1435_v55  ;;  %v1623_v59 = vmul.f32 -1.442695, %v1435_v55 }
0x1455   : > { %1959 = vpow2.f32 %v1622_v58 }
0x1456   : > { %1961 = vpow2.f32 %v1623_v59 }
0x145c   : > { %v1956_v56 = vpop.eup %1955 }
0x145d   : > { %1454 = vrot.lane.b32.xlu1 %v1956_v56, %s1982_s8 }
0x145e   : > { %v1958_v57 = vpop.eup %1957 }
0x145f   : > { %1456 = vrot.lane.b32.xlu0 %v1958_v57, %s1982_s8  ;;  %v1960_v60 = vpop.eup %1959 }
0x1460   : > { %v1962_v61 = vpop.eup %1961  ;;  %v1442_v0 = vadd.f32 1.0, %v1960_v60 }
0x1461   : > { %v1443_v3 = vadd.f32 1.0, %v1962_v61 }
0x1462   : > { %1963 = vrcp.f32 %v1442_v0 }
0x1463   : > { %1965 = vrcp.f32 %v1443_v3 }
0x146c   : > { %v1964_v6 = vpop.eup %1963 }
0x146d   : > { %v1966_v9 = vpop.eup %1965  ;;  %v1450_v13 = vmul.f32 %v1964_v6, %v1325_v36 }
0x146e   : > { %v1451_v17 = vmul.f32 %v1966_v9, %v1326_v1 }
0x14cf   : > { %v1455_v7 = vpop.permute.xlu1 %1454 }
0x14d0   : > { %v1460_v8 = vmul.f32 %v1964_v6, %v1455_v7 }
0x14d1   : > { %v1457_v11 = vpop.permute.xlu0 %1456 }
0x14d2   : > { %1464 = vrot.lane.b32.xlu1 %v1460_v8, %s1983_s9  ;;  %v1461_v12 = vmul.f32 %v1966_v9, %v1457_v11 }
0x14d4   : > { %1466 = vrot.lane.b32.xlu0 %v1461_v12, %s1983_s9 }
0x1544   : > { %v1465_v15 = vpop.permute.xlu1 %1464 }
0x1545   : > { %v1470_v16 = vadd.f32 %v1465_v15, %v1450_v13 }
0x1546   : > { %v1467_v18 = vpop.permute.xlu0 %1466 }
0x1547   : > { %1967 = vtanh.f32 %v1470_v16  ;;  %v1471_v19 = vadd.f32 %v1467_v18, %v1451_v17 }
0x1549   : > { %1969 = vtanh.f32 %v1471_v19 }
0x1551   : > { %v1968_v20 = vpop.eup %1967 }
0x1552   : > { %1476 = vrot.lane.b32.xlu1 %v1968_v20, %s1982_s8 }
0x1553   : > { %v1970_v21 = vpop.eup %1969 }
0x1554   : > { %1478 = vrot.lane.b32.xlu0 %v1970_v21, %s1982_s8  ;;  %s1202_s8 = scalar_lea.vmem %s2275_s29, %s2198_s21 }
0x1556   : > { %469 = vrot.lane.b32.xlu1 %v2082_v54, %s1983_s9 }
0x1558   : > { %471 = vrot.lane.b32.xlu0 %v2079_v51, %s1983_s9 }
0x155a   : > { %616 = vrot.lane.b32.xlu1 %v2107_v29, %s1983_s9 }
0x155c   : > { %618 = vrot.lane.b32.xlu0 %v2105_v28, %s1983_s9 }
0x155e   : > { %761 = vrot.lane.b32.xlu1 %v2133_v5, %s1983_s9 }
0x1560   : > { %763 = vrot.lane.b32.xlu0 %v2131_v4, %s1983_s9 }
0x1562   : > { %906 = vrot.lane.b32.xlu1 %v2159_v45, %s1983_s9 }
0x1564   : > { %908 = vrot.lane.b32.xlu0 %v2157_v44, %s1983_s9 }
0x1566   : > { %1051 = vrot.lane.b32.xlu1 %v2184_v25, %s1983_s9 }
0x1568   : > { %1053 = vrot.lane.b32.xlu0 %v2182_v24, %s1983_s9 }
0x156a   : > { %1196 = vrot.lane.b32.xlu1 %v2209_v63, %s1983_s9 }
0x156c   : > { %1198 = vrot.lane.b32.xlu0 %v2207_v62, %s1983_s9 }
0x156e   : > { %1341 = vrot.lane.b32.xlu1 %v1337_v41, %s1983_s9 }
0x1570   : > { %1343 = vrot.lane.b32.xlu0 %v2227_v40, %s1983_s9 }
0x15c4   : > { %v1477_v51 = vpop.permute.xlu1 %1476 }
0x15c5   : > { %v1482_v54 = vmul.f32 %v1964_v6, %v1477_v51 }
0x15c6   : > { %v1479_v28 = vpop.permute.xlu0 %1478 }
0x15c7   : > { %1486 = vrot.lane.b32.xlu1 %v1482_v54, %s1983_s9  ;;  %v1483_v29 = vmul.f32 %v1966_v9, %v1479_v28 }
0x15c8   : > { %v470_v4 = vpop.permute.xlu1 %469 }
0x15c9   : > { %477 = vst.msk [vmem:[%s475_s30] sm:$0x1] %vm476_vm3, %v470_v4  ;;  %1488 = vrot.lane.b32.xlu0 %v1483_v29, %s1983_s9  ;;  %s1347_s9 = scalar_lea.vmem %s2275_s29, %s2218_s23 }
0x15ca   : > { %v472_v5 = vpop.permute.xlu0 %471 }
0x15cb   : > { %478 = vst.msk [vmem:[%s475_s30 + $0x8] sm:$0x1] %vm476_vm3, %v472_v5 }
0x15cc   : > { %v617_v44 = vpop.permute.xlu1 %616 }
0x15cd   : > { %623 = vst.msk [vmem:[%s622_s19] sm:$0x1] %vm476_vm3, %v617_v44 }
0x15ce   : > { %v619_v45 = vpop.permute.xlu0 %618 }
0x15cf   : > { %624 = vst.msk [vmem:[%s622_s19 + $0x8] sm:$0x1] %vm476_vm3, %v619_v45 }
0x15d0   : > { %v762_v24 = vpop.permute.xlu1 %761 }
0x15d1   : > { %768 = vst.msk [vmem:[%s767_s5] sm:$0x1] %vm476_vm3, %v762_v24 }
0x15d2   : > { %v764_v25 = vpop.permute.xlu0 %763 }
0x15d3   : > { %769 = vst.msk [vmem:[%s767_s5 + $0x8] sm:$0x1] %vm476_vm3, %v764_v25 }
0x15d4   : > { %v907_v62 = vpop.permute.xlu1 %906 }
0x15d5   : > { %913 = vst.msk [vmem:[%s912_s6] sm:$0x1] %vm476_vm3, %v907_v62 }
0x15d6   : > { %v909_v63 = vpop.permute.xlu0 %908 }
0x15d7   : > { %914 = vst.msk [vmem:[%s912_s6 + $0x8] sm:$0x1] %vm476_vm3, %v909_v63 }
0x15d8   : > { %v1052_v22 = vpop.permute.xlu1 %1051 }
0x15d9   : > { %1058 = vst.msk [vmem:[%s1057_s7] sm:$0x1] %vm476_vm3, %v1052_v22 }
0x15da   : > { %v1054_v23 = vpop.permute.xlu0 %1053 }
0x15db   : > { %1059 = vst.msk [vmem:[%s1057_s7 + $0x8] sm:$0x1] %vm476_vm3, %v1054_v23 }
0x15dc   : > { %v1197_v26 = vpop.permute.xlu1 %1196 }
0x15dd   : > { %1203 = vst.msk [vmem:[%s1202_s8] sm:$0x1] %vm476_vm3, %v1197_v26 }
0x15de   : > { %v1199_v27 = vpop.permute.xlu0 %1198 }
0x15df   : > { %1204 = vst.msk [vmem:[%s1202_s8 + $0x8] sm:$0x1] %vm476_vm3, %v1199_v27 }
0x15e0   : > { %v1342_v30 = vpop.permute.xlu1 %1341 }
0x15e1   : > { %1348 = vst.msk [vmem:[%s1347_s9] sm:$0x1] %vm476_vm3, %v1342_v30 }
0x15e2   : > { %v1344_v31 = vpop.permute.xlu0 %1343 }
0x15e3   : > { %1349 = vst.msk [vmem:[%s1347_s9 + $0x8] sm:$0x1] %vm476_vm3, %v1344_v31 }
0x1639   : > { %v1487_v32 = vpop.permute.xlu1 %1486 }
0x163a   : > { %1493 = vst.msk [vmem:[%s1492_s10] sm:$0x1] %vm476_vm3, %v1487_v32 }
0x163b   : > { %v1489_v33 = vpop.permute.xlu0 %1488 }
0x163c   : > { %1494 = vst.msk [vmem:[%s1492_s10 + $0x8] sm:$0x1] %vm476_vm3, %v1489_v33 }
0x163d PF: > { %s14_s15 = sadd.s32 1, %s1977_s15  }
0x163e   : > { %p11_p5 = scmp.ge.s32.totalorder %s14_s15, 4  }
0x1640   :  { %13 = sbr.rel (!%p11_p5) target bundleno = 1 (0x1), region = 88 }

// kernel: document_reader_forward.6
= control target key start
LH: loop header
LB: loop body
LE: loop exit
PB: predicated region body
PF: predicated region fallthrough
CT: control target
= control target key end

     0   :  { %s2842_s15 = smov 0   ;;  %s3320_s0 = inlined_call_operand.vmem [shape: f32[2,12,65], index: 0, kind: input, shape index: {}]   ;;  %s3321_s1 = inlined_call_operand.vmem [shape: f32[2,65,128], index: 1, kind: input, shape index: {}]   ;;  %s3322_s2 = inlined_call_operand.vmem [shape: f32[2,32,128], index: 2, kind: input, shape index: {}]   ;;  %s3323_s3 = inlined_call_operand.vmem [shape: f32[2,1,128], index: 3, kind: input, shape index: {}]   ;;  %s3324_s4 = inlined_call_operand.vmem [shape: f32[2,2,12,32], index: 4, kind: output, shape index: {}]  }
   0x1 LB: > { %s2848_s16 = sadd.s32 4294967295, %s2810_s15   ;;  %p2230_p0 = scmp.ge.s32.totalorder %s2810_s15, 1  ;;  %s2810_s15 = sphi %s2842_s15, %s14_s15  }
   0x2   : > { %p180_p1 = scmp.lt.s32.totalorder %s2810_s15, 3 }
   0x4   : > { %p181_p2 = pnand %p2230_p0, %p180_p1 }
   0x5   : > { %p214_p3 = scmp.lt.s32.totalorder (!%p181_p2), %s2848_s16, 1  ;;  %v2812_v0 = vmov (!%p181_p2), 0.0|0.0   ;;  %vm2813_vm0 = vmmov (!%p181_p2), 0   ;;  %v2814_v1 = vmov (!%p181_p2), 0.0   ;;  %v232_v19 = vld [vmem:[%s3320_s0] sm:$0xff] (!%p181_p2)  ;;  %vm261_vm1 = vcmask (!%p181_p2), 1040384  }
   0x6   : > { %184 = sbr.rel (%p181_p2) target bundleno = 8540 (0x215c), region = 36  ;;  %2511 = vmatprep.subr.bf16.mxu0 (!%p181_p2), %v2812_v0  ;;  %2370 = vmatprep.mubr.msk.f32.mxu0 (!%p181_p2), %vm2813_vm0, %v2814_v1  ;;  %v240_v21 = vcombine.high (!%p181_p2), %v232_v19, %v232_v19  ;;  %vm254_vm2 = vcmask (!%p181_p2), 531456   ;;  %v233_v24 = vld [vmem:[%s3320_s0 + $0x8] sm:$0xf] (!%p181_p2)  ;;  %v234_v25 = vld [vmem:[%s3320_s0 + $0x10] sm:$0xff] (!%p181_p2)  ;;  %p385_p4 = scmp.eq.s32.totalorder (!%p181_p2), %s2848_s16, 0 }
   0x7   : > { %2523 = vmatprep.subr.bf16.mxu1 (!%p181_p2), %v2812_v0  ;;  %2387 = vmatprep.mubr.msk.f32.mxu1 (!%p181_p2), %vm2813_vm0, %v2814_v1  ;;  %v252_v26 = vcombine.low (!%p181_p2), %v233_v24, %v234_v25  ;;  %v241_v27 = vcombine.high (!%p181_p2), %v234_v25, %v234_v25  ;;  %v235_v28 = vld [vmem:[%s3320_s0 + $0x18] sm:$0xf] (!%p181_p2)  ;;  %s2815_s13 = smov (!%p181_p2), 64   ;;  %s2816_s14 = smov (!%p181_p2), 32   ;;  %vm535_vm3 = vcmask (!%p181_p2), 1041409   ;;  %vm390_vm4 = vcmask (!%p181_p2), 261120  }
   0x8   : > { %v251_v23 = vcombine.low (!%p181_p2), %v232_v19, %v240_v21  ;;  %vm527_vm5 = vcmask (!%p181_p2), 253952  }
   0x9   : > { %v253_v29 = vcombine.low (!%p181_p2), %v241_v27, %v235_v28 }
   0xd   : > { %s2857_s17 = scalar_select %p214_p3, %s2848_s16, 1 }
   0xe   : > { %s2935_s11 = scalar_select %p385_p4, 0, 11 }
   0xf   : > { %s2595_s18 = smul.u32 72, %s2857_s17  ;;  %s2278_s19 = sshll.u32 %s2857_s17, 5 }
  0x10   : > { %s223_s22 = scalar_lea.vmem %s3322_s2, %s2278_s19  ;;  %s226_s10 = scalar_lea.vmem %s3323_s3, %s2857_s17 }
  0x11   : > { %s2872_s25 = scalar_lea.vmem %s3321_s1, %s2595_s18  ;;  %v381_v2 = vld [vmem:[%s223_s22] sm:$0xff]  ;;  %v382_v3 = vld [vmem:[%s223_s22 + $0x8] sm:$0xff]  ;;  %v383_v4 = vld [vmem:[%s223_s22 + $0x10] sm:$0xff]  ;;  %s387_s12 = scalar_lea.vmem [#allocation2], %s2935_s11 }
  0x12   : > { %v242_v5 = vld [vmem:[%s2872_s25] sm:$0xff]  ;;  %v243_v6 = vld [vmem:[%s2872_s25 + $0x8] sm:$0xff]  ;;  %v384_v7 = vld [vmem:[%s223_s22 + $0x18] sm:$0xff]  ;;  %v2876_v8 = vpack.c.bf16 %v382_v3, %v381_v2  ;;  %s2961_s18 = scalar_select %p385_p4, 1, 10 }
  0x13   : > { %v2512_v9 = vpack.c.bf16 %v243_v6, %v242_v5  ;;  %v244_v10 = vld [vmem:[%s2872_s25 + $0x10] sm:$0xff]  ;;  %v245_v11 = vld [vmem:[%s2872_s25 + $0x18] sm:$0xff]  ;;  %v2880_v12 = vpack.c.bf16 %v384_v7, %v383_v4  ;;  %v246_v14 = vld [vmem:[%s2872_s25 + $0x20] sm:$0xff]  ;;  %s2987_s21 = scalar_select %p385_p4, 2, 9 }
  0x14   : > { %2525 = vmatpush3.bf16.msra.mxu1 %v2876_v8  ;;  %v2515_v13 = vpack.c.bf16 %v245_v11, %v244_v10  ;;  %v247_v15 = vld [vmem:[%s2872_s25 + $0x28] sm:$0xff]  ;;  %v248_v17 = vld [vmem:[%s2872_s25 + $0x30] sm:$0xff]  ;;  %v249_v18 = vld [vmem:[%s2872_s25 + $0x38] sm:$0xff]  ;;  %s531_s20 = scalar_lea.vmem [#allocation2], %s2961_s18 }
  0x15   : > { %2513 = vmatpush3.bf16.msra.mxu0 %v2512_v9  ;;  %2526 = vmatprep.subr.bf16.mxu1 %v2812_v0  ;;  %v2518_v16 = vpack.c.bf16 %v247_v15, %v246_v14  ;;  %v2521_v20 = vpack.c.bf16 %v249_v18, %v248_v17  ;;  %v250_v22 = vld [vmem:[%s2872_s25 + $0x40] sm:$0x1]  ;;  %s677_s22 = scalar_lea.vmem [#allocation2], %s2987_s21 }
  0x16   : > { %2514 = vmatprep.subr.bf16.mxu0 %v2812_v0  ;;  %v2240_v32 = vld [vmem:[%s226_s10] ss:$0 sm:$0xff]  ;;  %s3013_s23 = scalar_select %p385_p4, 3, 8 }
  0x17   : > { %v361_v33 = vcombine.high %v2240_v32, %v2240_v32  ;;  %s3039_s25 = scalar_select %p385_p4, 4, 7 }
  0x18   : > { %2528 = vmatpush3.bf16.msra.mxu1 %v2880_v12  ;;  %s822_s24 = scalar_lea.vmem [#allocation2], %s3013_s23 }
  0x19   : > { %2516 = vmatpush3.bf16.msra.mxu0 %v2515_v13  ;;  %2529 = vmatprep.subr.bf16.mxu1 %v2812_v0  ;;  %s967_s26 = scalar_lea.vmem [#allocation2], %s3039_s25 }
  0x1a   : > { %2517 = vmatprep.subr.bf16.mxu0 %v2812_v0  ;;  %s3065_s27 = scalar_select %p385_p4, 5, 6 }
  0x1b   : > { %2388 = vmatmul.mubr.f32.vlgmr.msra.gmra.mrb[0].mxu1 %v2814_v1  ;;  %s3091_s29 = scalar_select %p385_p4, 6, 5 }
  0x1c   : > { %2531 = vmatpush3.bf16.msra.mxu1 %v2876_v8  ;;  %2398 = vmatprep.mubr.msk.f32.mxu1 %vm2813_vm0, %v2814_v1  ;;  %s1112_s28 = scalar_lea.vmem [#allocation2], %s3065_s27 }
  0x1d   : > { %2519 = vmatpush3.bf16.msra.mxu0 %v2518_v16  ;;  %2532 = vmatprep.subr.bf16.mxu1 %v2812_v0  ;;  %s1257_s30 = scalar_lea.vmem [#allocation2], %s3091_s29 }
  0x1e   : > { %2520 = vmatprep.subr.bf16.mxu0 %v2812_v0  ;;  %s3117_s5 = scalar_select %p385_p4, 7, 4 }
  0x1f   : > { %s3142_s7 = scalar_select %p385_p4, 8, 3 }
  0x20   : > { %2534 = vmatpush3.bf16.msra.mxu1 %v2880_v12  ;;  %s1402_s6 = scalar_lea.vmem [#allocation2], %s3117_s5 }
  0x21   : > { %2522 = vmatpush3.bf16.msra.mxu0 %v2521_v20  ;;  %2535 = vmatprep.subr.bf16.mxu1 %v2812_v0  ;;  %s1547_s8 = scalar_lea.vmem [#allocation2], %s3142_s7 }
  0x22   : > { %2368 = vmatprep.subr.mxu0 %v2814_v1  ;;  %s3167_s9 = scalar_select %p385_p4, 9, 2 }
  0x24   : > { %s1692_s10 = scalar_lea.vmem [#allocation2], %s3167_s9 }
  0x25   : > { %2369 = vmatpush3.msk.msra.mxu0 %vm261_vm1, %v250_v22 }
  0x26   : > { %2371 = vmatmul.mubr.msk.f32.vlgmr.msra.gmra.mrb[0].mxu0 %vm254_vm2, %v251_v23  ;;  %2541 = vmatprep.subr.bf16.mxu0 %v2812_v0 }
  0x27   : > { %2373 = vmatprep.mubr.msk.f32.mxu0 %vm2813_vm0, %v2814_v1  ;;  %2543 = vmatpush3.bf16.msra.mxu0 %v2876_v8 }
  0x28   : > { %2544 = vmatprep.subr.bf16.mxu0 %v2812_v0 }
  0x2a   : > { %2374 = vmatmul.mubr.msk.f32.gmra.mrb[2].mxu0 %vm254_vm2, %v252_v26 }
  0x2b   : > { %2376 = vmatprep.mubr.msk.f32.mxu0 %vm2813_vm0, %v2814_v1  ;;  %2546 = vmatpush3.bf16.msra.mxu0 %v2880_v12 }
  0x2c   : > { %2553 = vmatprep.subr.bf16.mxu0 %v2812_v0 }
  0x2e   : > { %2377 = vmatmul.mubr.msk.f32.gmra.mrb[4].mxu0 %vm254_vm2, %v253_v29 }
  0x2f   : > { %2420 = vmatprep.mubr.msk.f32.mxu0 %vm2813_vm0, %v2814_v1 }
  0xee   : > { %v460_v30 = vpop.f32.mrb[0].mxu1 }
  0xef   : > { %v2389_v31 = vpop.f32.mrb[1].mxu1  ;;  %v465_v51 = vrot.slane %v460_v30, 1 }
  0xf9   : > { %v331_v34 = vpop.f32.mrb[0].mxu0 }
  0xfa   : > { %v348_v35 = vcombine.high %v331_v34, %v331_v34  ;;  %v363_v36 = vadd.f32 %v2240_v32, %v331_v34  ;;  %v2372_v37 = vpop.f32.mrb[1].mxu0 }
  0xfc   : > { %v364_v38 = vadd.f32 %v361_v33, %v348_v35 }
  0xfd   : > { %v336_v39 = vpop.f32.mrb[2].mxu0 }
  0xfe   : > { %v373_v40 = vcombine.low %v363_v36, %v364_v38  ;;  %v349_v41 = vcombine.high %v336_v39, %v336_v39  ;;  %v365_v42 = vadd.f32 %v2240_v32, %v336_v39  ;;  %v2375_v43 = vpop.f32.mrb[3].mxu0 }
 0x100   : > { %377 = vst [vmem:[#allocation2] sm:$0xff] %v373_v40  ;;  %v366_v44 = vadd.f32 %v2240_v32, %v349_v41  ;;  %378 = vst [vmem:[#allocation2 + $0x8] sm:$0xf] %v365_v42 }
 0x101   : > { %v341_v45 = vpop.f32.mrb[4].mxu0 }
 0x102   : > { %v350_v46 = vcombine.high %v341_v45, %v341_v45  ;;  %v367_v47 = vadd.f32 %v361_v33, %v341_v45  ;;  %v2378_v48 = vpop.f32.mrb[5].mxu0 }
 0x104   : > { %v368_v49 = vadd.f32 %v2240_v32, %v350_v46  ;;  %v374_v50 = vcombine.low %v366_v44, %v367_v47 }
 0x106   : > { %379 = vst [vmem:[#allocation2 + $0x10] sm:$0xff] %v374_v50  ;;  %380 = vst [vmem:[#allocation2 + $0x18] sm:$0xf] %v368_v49 }
 0x10d   : > { %v388_v52 = vld [vmem:[%s387_s12] sm:$0x1]  ;;  %v389_v53 = vld [vmem:[%s387_s12 + $0x10] sm:$0x1]  ;;  %s3187_s12 = scalar_select %p385_p4, 10, 1 }
 0x10e   : > { %v469_v54 = vadd.f32 %v465_v51, %v389_v53  ;;  %v468_v55 = vadd.f32 %v460_v30, %v388_v52  ;;  %v532_v25 = vld [vmem:[%s531_s20] sm:$0x1]  ;;  %v533_v30 = vld [vmem:[%s531_s20 + $0x10] sm:$0x1] }
 0x10f   : > { %s1837_s20 = scalar_lea.vmem [#allocation2], %s3187_s12 }
 0x110   : > { %2612 = vtanh.f32 %v469_v54  ;;  %v2242_v58 = vmul.f32 -1.442695, %v469_v54  ;;  %v2241_v59 = vmul.f32 -1.442695, %v468_v55 }
 0x111   : > { %2614 = vtanh.f32 %v468_v55 }
 0x112   : > { %2616 = vpow2.f32 %v2242_v58 }
 0x113   : > { %2618 = vpow2.f32 %v2241_v59 }
 0x11a   : > { %v2613_v56 = vpop.eup %2612 }
 0x11b   : > { %490 = vrot.lane.b32.xlu0 %v2613_v56, %s2815_s13  ;;  %v2615_v57 = vpop.eup %2614 }
 0x11c   : > { %v2617_v60 = vpop.eup %2616 }
 0x11d   : > { %v477_v61 = vadd.f32 1.0, %v2617_v60  ;;  %v2619_v62 = vpop.eup %2618 }
 0x11e   : > { %v476_v63 = vadd.f32 1.0, %v2619_v62 }
 0x11f   : > { %488 = vrot.lane.b32.xlu0 %v2615_v57, %s2815_s13  ;;  %2620 = vrcp.f32 %v477_v61  ;;  %v678_v61 = vld [vmem:[%s677_s22] sm:$0x1] }
 0x120   : > { %2622 = vrcp.f32 %v476_v63 }
 0x129   : > { %v2621_v2 = vpop.eup %2620 }
 0x12a   : > { %v2623_v5 = vpop.eup %2622  ;;  %v485_v9 = vmul.f32 0.0, %v2621_v2 }
 0x12b   : > { %v484_v13 = vmul.f32 0.0, %v2623_v5 }
 0x18d   : > { %v491_v3 = vpop.permute.xlu0 %490 }
 0x18e   : > { %v495_v4 = vmul.f32 %v2621_v2, %v491_v3 }
 0x190   : > { %500 = vrot.lane.b32.xlu1 %v495_v4, %s2816_s14  ;;  %v679_v4 = vld [vmem:[%s677_s22 + $0x10] sm:$0x1]  ;;  %s3207_s22 = scalar_select %p385_p4, 11, 0 }
 0x191   : > { %v489_v6 = vpop.permute.xlu0 %488 }
 0x192   : > { %v494_v7 = vmul.f32 %v2623_v5, %v489_v6 }
 0x194   : > { %498 = vrot.lane.b32.xlu1 %v494_v7, %s2816_s14 }
 0x202   : > { %v501_v10 = vpop.permute.xlu1 %500 }
 0x203   : > { %v505_v11 = vadd.f32 %v501_v10, %v485_v9 }
 0x205   : > { %2624 = vtanh.f32 %v505_v11 }
 0x206   : > { %v499_v14 = vpop.permute.xlu1 %498 }
 0x207   : > { %v504_v15 = vadd.f32 %v499_v14, %v484_v13 }
 0x209   : > { %2626 = vtanh.f32 %v504_v15 }
 0x20f   : > { %v2625_v16 = vpop.eup %2624 }
 0x210   : > { %512 = vrot.lane.b32.xlu0 %v2625_v16, %s2815_s13 }
 0x213   : > { %v2627_v17 = vpop.eup %2626 }
 0x214   : > { %510 = vrot.lane.b32.xlu1 %v2627_v17, %s2815_s13 }
 0x282   : > { %v513_v18 = vpop.permute.xlu0 %512 }
 0x283   : > { %v2944_v19 = vmul.f32 %v2621_v2, %v513_v18 }
 0x285   : > { %v534_v21 = vrot.slane %v2944_v19, 7 }
 0x286   : > { %v511_v20 = vpop.permute.xlu1 %510 }
 0x287   : > { %v2947_v22 = vmul.f32 %v2623_v5, %v511_v20 }
 0x289   : > { %v536_v23 = vsel %vm535_vm3, %v534_v21, %v2947_v22 }
 0x28a   : > { %537 = vrot.lane.b32.xlu0 %v536_v23, %s2816_s14 }
 0x2fc   : > { %v538_v24 = vpop.permute.xlu0 %537 }
 0x2fd   : > { %2399 = vmatmul.mubr.msk.f32.vlgmr.msra.gmra.mrb[2].mxu1 %vm390_vm4, %v538_v24 }
 0x2fe   : > { %2537 = vmatpush3.bf16.msra.mxu1 %v2876_v8  ;;  %2409 = vmatprep.mubr.msk.f32.mxu1 %vm2813_vm0, %v2814_v1 }
 0x2ff   : > { %2538 = vmatprep.subr.bf16.mxu1 %v2812_v0 }
 0x302   : > { %2540 = vmatpush3.bf16.msra.mxu1 %v2880_v12 }
 0x303   : > { %2547 = vmatprep.subr.bf16.mxu1 %v2812_v0 }
 0x3d0   : > { %v607_v26 = vpop.f32.mrb[2].mxu1 }
 0x3d1   : > { %v612_v27 = vrot.slane %v607_v26, 1  ;;  %v615_v28 = vadd.f32 %v607_v26, %v532_v25  ;;  %v2400_v29 = vpop.f32.mrb[3].mxu1 }
 0x3d3   : > { %v616_v31 = vadd.f32 %v612_v27, %v533_v30  ;;  %2628 = vtanh.f32 %v615_v28  ;;  %v2244_v34 = vmul.f32 -1.442695, %v615_v28 }
 0x3d5   : > { %2630 = vtanh.f32 %v616_v31  ;;  %v2245_v35 = vmul.f32 -1.442695, %v616_v31 }
 0x3d6   : > { %2632 = vpow2.f32 %v2244_v34 }
 0x3d7   : > { %2634 = vpow2.f32 %v2245_v35 }
 0x3dd   : > { %v2629_v32 = vpop.eup %2628 }
 0x3de   : > { %635 = vrot.lane.b32.xlu0 %v2629_v32, %s2815_s13 }
 0x3df   : > { %v2631_v33 = vpop.eup %2630 }
 0x3e0   : > { %637 = vrot.lane.b32.xlu1 %v2631_v33, %s2815_s13  ;;  %v2633_v36 = vpop.eup %2632 }
 0x3e1   : > { %v2635_v37 = vpop.eup %2634  ;;  %v623_v38 = vadd.f32 1.0, %v2633_v36 }
 0x3e2   : > { %v624_v39 = vadd.f32 1.0, %v2635_v37 }
 0x3e3   : > { %2636 = vrcp.f32 %v623_v38 }
 0x3e4   : > { %2638 = vrcp.f32 %v624_v39  ;;  %v823_v39 = vld [vmem:[%s822_s24] sm:$0x1] }
 0x3ed   : > { %v2637_v40 = vpop.eup %2636 }
 0x3ee   : > { %v2639_v43 = vpop.eup %2638  ;;  %v631_v46 = vmul.f32 %v2637_v40, %v504_v15 }
 0x3ef   : > { %v632_v49 = vmul.f32 %v2639_v43, %v505_v11 }
 0x450   : > { %v636_v41 = vpop.permute.xlu0 %635 }
 0x451   : > { %v641_v42 = vmul.f32 %v2637_v40, %v636_v41 }
 0x452   : > { %v638_v44 = vpop.permute.xlu1 %637 }
 0x453   : > { %645 = vrot.lane.b32.xlu0 %v641_v42, %s2816_s14  ;;  %v642_v45 = vmul.f32 %v2639_v43, %v638_v44  ;;  %v824_v44 = vld [vmem:[%s822_s24 + $0x10] sm:$0x1]  ;;  %s1982_s24 = scalar_lea.vmem [#allocation2], %s3207_s22 }
 0x455   : > { %647 = vrot.lane.b32.xlu1 %v642_v45, %s2816_s14 }
 0x4c5   : > { %v646_v47 = vpop.permute.xlu0 %645 }
 0x4c6   : > { %v651_v48 = vadd.f32 %v646_v47, %v631_v46 }
 0x4c7   : > { %v648_v50 = vpop.permute.xlu1 %647 }
 0x4c8   : > { %2640 = vtanh.f32 %v651_v48  ;;  %v652_v51 = vadd.f32 %v648_v50, %v632_v49 }
 0x4ca   : > { %2642 = vtanh.f32 %v652_v51 }
 0x4d2   : > { %v2641_v52 = vpop.eup %2640 }
 0x4d3   : > { %657 = vrot.lane.b32.xlu0 %v2641_v52, %s2815_s13 }
 0x4d4   : > { %v2643_v53 = vpop.eup %2642 }
 0x4d5   : > { %659 = vrot.lane.b32.xlu1 %v2643_v53, %s2815_s13 }
 0x545   : > { %v658_v54 = vpop.permute.xlu0 %657 }
 0x546   : > { %v2972_v57 = vmul.f32 %v2637_v40, %v658_v54 }
 0x547   : > { %v660_v55 = vpop.permute.xlu1 %659 }
 0x548   : > { %v2970_v56 = vmul.f32 %v2639_v43, %v660_v55 }
 0x54a   : > { %v680_v58 = vrot.slane %v2970_v56, 7 }
 0x54c   : > { %v681_v59 = vsel %vm535_vm3, %v680_v58, %v2972_v57 }
 0x54d   : > { %682 = vrot.lane.b32.xlu1 %v681_v59, %s2816_s14 }
 0x5bf   : > { %v683_v60 = vpop.permute.xlu1 %682 }
 0x5c0   : > { %2410 = vmatmul.mubr.msk.f32.vlgmr.msra.gmra.mrb[4].mxu1 %vm390_vm4, %v683_v60 }
 0x5c1   : > { %2549 = vmatpush3.bf16.msra.mxu1 %v2876_v8  ;;  %2431 = vmatprep.mubr.msk.f32.mxu1 %vm2813_vm0, %v2814_v1 }
 0x5c2   : > { %2550 = vmatprep.subr.bf16.mxu1 %v2812_v0 }
 0x5c5   : > { %2552 = vmatpush3.bf16.msra.mxu1 %v2880_v12 }
 0x5c6   : > { %2559 = vmatprep.subr.bf16.mxu1 %v2812_v0 }
 0x693   : > { %v752_v62 = vpop.f32.mrb[4].mxu1 }
 0x694   : > { %v757_v63 = vrot.slane %v752_v62, 1  ;;  %v760_v2 = vadd.f32 %v752_v62, %v678_v61  ;;  %v2411_v3 = vpop.f32.mrb[5].mxu1 }
 0x696   : > { %v761_v5 = vadd.f32 %v757_v63, %v679_v4  ;;  %2644 = vtanh.f32 %v760_v2  ;;  %v2247_v9 = vmul.f32 -1.442695, %v760_v2 }
 0x698   : > { %2646 = vtanh.f32 %v761_v5  ;;  %v2248_v10 = vmul.f32 -1.442695, %v761_v5 }
 0x699   : > { %2648 = vpow2.f32 %v2247_v9 }
 0x69a   : > { %2650 = vpow2.f32 %v2248_v10 }
 0x6a0   : > { %v2645_v6 = vpop.eup %2644 }
 0x6a1   : > { %780 = vrot.lane.b32.xlu1 %v2645_v6, %s2815_s13 }
 0x6a2   : > { %v2647_v7 = vpop.eup %2646 }
 0x6a3   : > { %782 = vrot.lane.b32.xlu0 %v2647_v7, %s2815_s13  ;;  %v2649_v11 = vpop.eup %2648 }
 0x6a4   : > { %v2651_v13 = vpop.eup %2650  ;;  %v768_v14 = vadd.f32 1.0, %v2649_v11 }
 0x6a5   : > { %v769_v15 = vadd.f32 1.0, %v2651_v13 }
 0x6a6   : > { %2652 = vrcp.f32 %v768_v14 }
 0x6a7   : > { %2654 = vrcp.f32 %v769_v15 }
 0x6b0   : > { %v2653_v16 = vpop.eup %2652 }
 0x6b1   : > { %v2655_v20 = vpop.eup %2654  ;;  %v776_v24 = vmul.f32 %v2653_v16, %v651_v48 }
 0x6b2   : > { %v777_v27 = vmul.f32 %v2655_v20, %v652_v51 }
 0x713   : > { %v781_v17 = vpop.permute.xlu1 %780 }
 0x714   : > { %v786_v18 = vmul.f32 %v2653_v16, %v781_v17  ;;  %v968_v17 = vld [vmem:[%s967_s26] sm:$0x1] }
 0x715   : > { %v783_v21 = vpop.permute.xlu0 %782 }
 0x716   : > { %790 = vrot.lane.b32.xlu1 %v786_v18, %s2816_s14  ;;  %v787_v23 = vmul.f32 %v2655_v20, %v783_v21 }
 0x718   : > { %792 = vrot.lane.b32.xlu0 %v787_v23, %s2816_s14 }
 0x788   : > { %v791_v25 = vpop.permute.xlu1 %790 }
 0x789   : > { %v796_v26 = vadd.f32 %v791_v25, %v776_v24  ;;  %v969_v24 = vld [vmem:[%s967_s26 + $0x10] sm:$0x1]  ;;  %s3265_s26 = scalar_lea.vmem %s3324_s4, %s2278_s19 }
 0x78a   : > { %v793_v28 = vpop.permute.xlu0 %792  ;;  %s673_s17 = scalar_lea.vmem %s3265_s26, %s2961_s18  ;;  %s818_s19 = scalar_lea.vmem %s3265_s26, %s2987_s21 }
 0x78b   : > { %2656 = vtanh.f32 %v796_v26  ;;  %v797_v29 = vadd.f32 %v793_v28, %v777_v27  ;;  %s1253_s18 = scalar_lea.vmem %s3265_s26, %s3065_s27  ;;  %s1398_s21 = scalar_lea.vmem %s3265_s26, %s3091_s29 }
 0x78c   : > { %s1833_s27 = scalar_lea.vmem %s3265_s26, %s3167_s9  ;;  %s1978_s29 = scalar_lea.vmem %s3265_s26, %s3187_s12 }
 0x78d   : > { %2658 = vtanh.f32 %v797_v29 }
 0x795   : > { %v2657_v30 = vpop.eup %2656 }
 0x796   : > { %802 = vrot.lane.b32.xlu1 %v2657_v30, %s2815_s13 }
 0x797   : > { %v2659_v31 = vpop.eup %2658 }
 0x798   : > { %804 = vrot.lane.b32.xlu0 %v2659_v31, %s2815_s13 }
 0x808   : > { %v803_v32 = vpop.permute.xlu1 %802 }
 0x809   : > { %v2998_v35 = vmul.f32 %v2653_v16, %v803_v32 }
 0x80a   : > { %v805_v33 = vpop.permute.xlu0 %804 }
 0x80b   : > { %v2996_v34 = vmul.f32 %v2655_v20, %v805_v33 }
 0x80d   : > { %v825_v36 = vrot.slane %v2996_v34, 7 }
 0x80f   : > { %v826_v37 = vsel %vm535_vm3, %v825_v36, %v2998_v35 }
 0x810   : > { %827 = vrot.lane.b32.xlu0 %v826_v37, %s2816_s14 }
 0x882   : > { %v828_v38 = vpop.permute.xlu0 %827 }
 0x883   : > { %2421 = vmatmul.mubr.msk.f32.vlgmr.msra.gmra.mrb[6].mxu0 %vm390_vm4, %v828_v38 }
 0x884   : > { %2555 = vmatpush3.bf16.msra.mxu0 %v2876_v8  ;;  %2442 = vmatprep.mubr.msk.f32.mxu0 %vm2813_vm0, %v2814_v1 }
 0x885   : > { %2556 = vmatprep.subr.bf16.mxu0 %v2812_v0 }
 0x888   : > { %2558 = vmatpush3.bf16.msra.mxu0 %v2880_v12 }
 0x889   : > { %2565 = vmatprep.subr.bf16.mxu0 %v2812_v0 }
 0x956   : > { %v897_v40 = vpop.f32.mrb[6].mxu0 }
 0x957   : > { %v902_v41 = vrot.slane %v897_v40, 1  ;;  %v905_v42 = vadd.f32 %v897_v40, %v823_v39  ;;  %v2422_v43 = vpop.f32.mrb[7].mxu0 }
 0x959   : > { %v906_v45 = vadd.f32 %v902_v41, %v824_v44  ;;  %2660 = vtanh.f32 %v905_v42  ;;  %v2250_v48 = vmul.f32 -1.442695, %v905_v42 }
 0x95b   : > { %2662 = vtanh.f32 %v906_v45  ;;  %v2251_v49 = vmul.f32 -1.442695, %v906_v45 }
 0x95c   : > { %2664 = vpow2.f32 %v2250_v48 }
 0x95d   : > { %2666 = vpow2.f32 %v2251_v49 }
 0x963   : > { %v2661_v46 = vpop.eup %2660 }
 0x964   : > { %925 = vrot.lane.b32.xlu0 %v2661_v46, %s2815_s13 }
 0x965   : > { %v2663_v47 = vpop.eup %2662 }
 0x966   : > { %927 = vrot.lane.b32.xlu1 %v2663_v47, %s2815_s13  ;;  %v2665_v50 = vpop.eup %2664 }
 0x967   : > { %v2667_v51 = vpop.eup %2666  ;;  %v913_v52 = vadd.f32 1.0, %v2665_v50 }
 0x968   : > { %v914_v53 = vadd.f32 1.0, %v2667_v51 }
 0x969   : > { %2668 = vrcp.f32 %v913_v52 }
 0x96a   : > { %2670 = vrcp.f32 %v914_v53 }
 0x973   : > { %v2669_v54 = vpop.eup %2668 }
 0x974   : > { %v2671_v59 = vpop.eup %2670  ;;  %v921_v62 = vmul.f32 %v2669_v54, %v796_v26 }
 0x975   : > { %v922_v3 = vmul.f32 %v2671_v59, %v797_v29 }
 0x9d6   : > { %v926_v55 = vpop.permute.xlu0 %925 }
 0x9d7   : > { %v931_v58 = vmul.f32 %v2669_v54, %v926_v55 }
 0x9d8   : > { %v928_v60 = vpop.permute.xlu1 %927 }
 0x9d9   : > { %935 = vrot.lane.b32.xlu0 %v931_v58, %s2816_s14  ;;  %v932_v61 = vmul.f32 %v2671_v59, %v928_v60 }
 0x9db   : > { %937 = vrot.lane.b32.xlu1 %v932_v61, %s2816_s14 }
 0xa4b   : > { %v936_v63 = vpop.permute.xlu0 %935 }
 0xa4c   : > { %v941_v2 = vadd.f32 %v936_v63, %v921_v62 }
 0xa4d   : > { %v938_v4 = vpop.permute.xlu1 %937 }
 0xa4e   : > { %2672 = vtanh.f32 %v941_v2  ;;  %v942_v5 = vadd.f32 %v938_v4, %v922_v3 }
 0xa50   : > { %2674 = vtanh.f32 %v942_v5 }
 0xa58   : > { %v2673_v6 = vpop.eup %2672 }
 0xa59   : > { %947 = vrot.lane.b32.xlu0 %v2673_v6, %s2815_s13 }
 0xa5a   : > { %v2675_v7 = vpop.eup %2674 }
 0xa5b   : > { %949 = vrot.lane.b32.xlu1 %v2675_v7, %s2815_s13 }
 0xacb   : > { %v948_v9 = vpop.permute.xlu0 %947 }
 0xacc   : > { %v3024_v13 = vmul.f32 %v2669_v54, %v948_v9 }
 0xacd   : > { %v950_v10 = vpop.permute.xlu1 %949 }
 0xace   : > { %v3022_v11 = vmul.f32 %v2671_v59, %v950_v10  ;;  %v1113_v59 = vld [vmem:[%s1112_s28] sm:$0x1] }
 0xad0   : > { %v970_v14 = vrot.slane %v3022_v11, 7 }
 0xad2   : > { %v971_v15 = vsel %vm535_vm3, %v970_v14, %v3024_v13 }
 0xad3   : > { %972 = vrot.lane.b32.xlu1 %v971_v15, %s2816_s14 }
 0xb45   : > { %v973_v16 = vpop.permute.xlu1 %972 }
 0xb46   : > { %2432 = vmatmul.mubr.msk.f32.vlgmr.msra.gmra.mrb[6].mxu1 %vm390_vm4, %v973_v16 }
 0xb47   : > { %2561 = vmatpush3.bf16.msra.mxu1 %v2876_v8  ;;  %2453 = vmatprep.mubr.msk.f32.mxu1 %vm2813_vm0, %v2814_v1 }
 0xb48   : > { %2562 = vmatprep.subr.bf16.mxu1 %v2812_v0 }
 0xb4b   : > { %2564 = vmatpush3.bf16.msra.mxu1 %v2880_v12 }
 0xb4c   : > { %2571 = vmatprep.subr.bf16.mxu1 %v2812_v0 }
 0xc19   : > { %v1042_v18 = vpop.f32.mrb[6].mxu1 }
 0xc1a   : > { %v1047_v20 = vrot.slane %v1042_v18, 1  ;;  %v1050_v21 = vadd.f32 %v1042_v18, %v968_v17  ;;  %v2433_v23 = vpop.f32.mrb[7].mxu1 }
 0xc1c   : > { %v1051_v25 = vadd.f32 %v1047_v20, %v969_v24  ;;  %2676 = vtanh.f32 %v1050_v21  ;;  %v2253_v28 = vmul.f32 -1.442695, %v1050_v21 }
 0xc1e   : > { %2678 = vtanh.f32 %v1051_v25  ;;  %v2254_v29 = vmul.f32 -1.442695, %v1051_v25 }
 0xc1f   : > { %2680 = vpow2.f32 %v2253_v28 }
 0xc20   : > { %2682 = vpow2.f32 %v2254_v29 }
 0xc26   : > { %v2677_v26 = vpop.eup %2676 }
 0xc27   : > { %1070 = vrot.lane.b32.xlu1 %v2677_v26, %s2815_s13 }
 0xc28   : > { %v2679_v27 = vpop.eup %2678 }
 0xc29   : > { %1072 = vrot.lane.b32.xlu0 %v2679_v27, %s2815_s13  ;;  %v2681_v30 = vpop.eup %2680 }
 0xc2a   : > { %v2683_v31 = vpop.eup %2682  ;;  %v1058_v32 = vadd.f32 1.0, %v2681_v30 }
 0xc2b   : > { %v1059_v33 = vadd.f32 1.0, %v2683_v31 }
 0xc2c   : > { %2684 = vrcp.f32 %v1058_v32 }
 0xc2d   : > { %2686 = vrcp.f32 %v1059_v33 }
 0xc36   : > { %v2685_v36 = vpop.eup %2684 }
 0xc37   : > { %v2687_v39 = vpop.eup %2686  ;;  %v1066_v42 = vmul.f32 %v2685_v36, %v941_v2  ;;  %v1114_v2 = vld [vmem:[%s1112_s28 + $0x10] sm:$0x1]  ;;  %s526_s28 = scalar_lea.vmem %s3265_s26, %s2935_s11  ;;  %s963_s11 = scalar_lea.vmem %s3265_s26, %s3013_s23 }
 0xc38   : > { %v1067_v45 = vmul.f32 %v2687_v39, %v942_v5  ;;  %s1543_s23 = scalar_lea.vmem %s3265_s26, %s3117_s5 }
 0xc99   : > { %v1071_v37 = vpop.permute.xlu1 %1070 }
 0xc9a   : > { %v1076_v38 = vmul.f32 %v2685_v36, %v1071_v37 }
 0xc9b   : > { %v1073_v40 = vpop.permute.xlu0 %1072 }
 0xc9c   : > { %1080 = vrot.lane.b32.xlu1 %v1076_v38, %s2816_s14  ;;  %v1077_v41 = vmul.f32 %v2687_v39, %v1073_v40 }
 0xc9e   : > { %1082 = vrot.lane.b32.xlu0 %v1077_v41, %s2816_s14  ;;  %v1258_v41 = vld [vmem:[%s1257_s30] sm:$0x1] }
 0xd0e   : > { %v1081_v43 = vpop.permute.xlu1 %1080 }
 0xd0f   : > { %v1086_v44 = vadd.f32 %v1081_v43, %v1066_v42 }
 0xd10   : > { %v1083_v46 = vpop.permute.xlu0 %1082 }
 0xd11   : > { %2688 = vtanh.f32 %v1086_v44  ;;  %v1087_v47 = vadd.f32 %v1083_v46, %v1067_v45  ;;  %v1259_v46 = vld [vmem:[%s1257_s30 + $0x10] sm:$0x1]  ;;  %s2123_s30 = scalar_lea.vmem %s3265_s26, %s3207_s22 }
 0xd13   : > { %2690 = vtanh.f32 %v1087_v47 }
 0xd1b   : > { %v2689_v48 = vpop.eup %2688 }
 0xd1c   : > { %1092 = vrot.lane.b32.xlu1 %v2689_v48, %s2815_s13 }
 0xd1d   : > { %v2691_v49 = vpop.eup %2690 }
 0xd1e   : > { %1094 = vrot.lane.b32.xlu0 %v2691_v49, %s2815_s13 }
 0xd8e   : > { %v1093_v50 = vpop.permute.xlu1 %1092 }
 0xd8f   : > { %v3050_v53 = vmul.f32 %v2685_v36, %v1093_v50 }
 0xd90   : > { %v1095_v51 = vpop.permute.xlu0 %1094 }
 0xd91   : > { %v3048_v52 = vmul.f32 %v2687_v39, %v1095_v51 }
 0xd93   : > { %v1115_v54 = vrot.slane %v3048_v52, 7 }
 0xd95   : > { %v1116_v55 = vsel %vm535_vm3, %v1115_v54, %v3050_v53 }
 0xd96   : > { %1117 = vrot.lane.b32.xlu0 %v1116_v55, %s2816_s14 }
 0xe08   : > { %v1118_v58 = vpop.permute.xlu0 %1117 }
 0xe09   : > { %2443 = vmatmul.mubr.msk.f32.vlgmr.msra.gmra.mrb[8].mxu0 %vm390_vm4, %v1118_v58 }
 0xe0a   : > { %2567 = vmatpush3.bf16.msra.mxu0 %v2876_v8  ;;  %2464 = vmatprep.mubr.msk.f32.mxu0 %vm2813_vm0, %v2814_v1 }
 0xe0b   : > { %2568 = vmatprep.subr.bf16.mxu0 %v2812_v0 }
 0xe0e   : > { %2570 = vmatpush3.bf16.msra.mxu0 %v2880_v12 }
 0xe0f   : > { %2577 = vmatprep.subr.bf16.mxu0 %v2812_v0 }
 0xedc   : > { %v1187_v60 = vpop.f32.mrb[8].mxu0 }
 0xedd   : > { %v1192_v61 = vrot.slane %v1187_v60, 1  ;;  %v1195_v62 = vadd.f32 %v1187_v60, %v1113_v59  ;;  %v2444_v63 = vpop.f32.mrb[9].mxu0 }
 0xedf   : > { %v1196_v3 = vadd.f32 %v1192_v61, %v1114_v2  ;;  %2692 = vtanh.f32 %v1195_v62  ;;  %v2256_v6 = vmul.f32 -1.442695, %v1195_v62 }
 0xee1   : > { %2694 = vtanh.f32 %v1196_v3  ;;  %v2257_v7 = vmul.f32 -1.442695, %v1196_v3 }
 0xee2   : > { %2696 = vpow2.f32 %v2256_v6 }
 0xee3   : > { %2698 = vpow2.f32 %v2257_v7 }
 0xee9   : > { %v2693_v4 = vpop.eup %2692 }
 0xeea   : > { %1215 = vrot.lane.b32.xlu0 %v2693_v4, %s2815_s13 }
 0xeeb   : > { %v2695_v5 = vpop.eup %2694 }
 0xeec   : > { %1217 = vrot.lane.b32.xlu1 %v2695_v5, %s2815_s13  ;;  %v2697_v9 = vpop.eup %2696 }
 0xeed   : > { %v2699_v10 = vpop.eup %2698  ;;  %v1203_v14 = vadd.f32 1.0, %v2697_v9 }
 0xeee   : > { %v1204_v15 = vadd.f32 1.0, %v2699_v10 }
 0xeef   : > { %2700 = vrcp.f32 %v1203_v14 }
 0xef0   : > { %2702 = vrcp.f32 %v1204_v15 }
 0xef9   : > { %v2701_v16 = vpop.eup %2700 }
 0xefa   : > { %v2703_v20 = vpop.eup %2702  ;;  %v1211_v24 = vmul.f32 %v2701_v16, %v1086_v44 }
 0xefb   : > { %v1212_v27 = vmul.f32 %v2703_v20, %v1087_v47 }
 0xf5c   : > { %v1216_v17 = vpop.permute.xlu0 %1215 }
 0xf5d   : > { %v1221_v18 = vmul.f32 %v2701_v16, %v1216_v17 }
 0xf5e   : > { %v1218_v21 = vpop.permute.xlu1 %1217 }
 0xf5f   : > { %1225 = vrot.lane.b32.xlu0 %v1221_v18, %s2816_s14  ;;  %v1222_v23 = vmul.f32 %v2703_v20, %v1218_v21 }
 0xf61   : > { %1227 = vrot.lane.b32.xlu1 %v1222_v23, %s2816_s14 }
 0xfd1   : > { %v1226_v25 = vpop.permute.xlu0 %1225 }
 0xfd2   : > { %v1231_v26 = vadd.f32 %v1226_v25, %v1211_v24  ;;  %v1403_v25 = vld [vmem:[%s1402_s6] sm:$0x1] }
 0xfd3   : > { %v1228_v28 = vpop.permute.xlu1 %1227 }
 0xfd4   : > { %2704 = vtanh.f32 %v1231_v26  ;;  %v1232_v29 = vadd.f32 %v1228_v28, %v1212_v27 }
 0xfd6   : > { %2706 = vtanh.f32 %v1232_v29 }
 0xfde   : > { %v2705_v30 = vpop.eup %2704 }
 0xfdf   : > { %1237 = vrot.lane.b32.xlu0 %v2705_v30, %s2815_s13  ;;  %v1404_v30 = vld [vmem:[%s1402_s6 + $0x10] sm:$0x1] }
 0xfe0   : > { %v2707_v31 = vpop.eup %2706 }
 0xfe1   : > { %1239 = vrot.lane.b32.xlu1 %v2707_v31, %s2815_s13 }
0x1051   : > { %v1238_v32 = vpop.permute.xlu0 %1237 }
0x1052   : > { %v3076_v37 = vmul.f32 %v2701_v16, %v1238_v32 }
0x1053   : > { %v1240_v33 = vpop.permute.xlu1 %1239 }
0x1054   : > { %v3074_v36 = vmul.f32 %v2703_v20, %v1240_v33 }
0x1056   : > { %v1260_v38 = vrot.slane %v3074_v36, 7 }
0x1058   : > { %v1261_v39 = vsel %vm535_vm3, %v1260_v38, %v3076_v37 }
0x1059   : > { %1262 = vrot.lane.b32.xlu1 %v1261_v39, %s2816_s14 }
0x10cb   : > { %v1263_v40 = vpop.permute.xlu1 %1262 }
0x10cc   : > { %2454 = vmatmul.mubr.msk.f32.vlgmr.msra.gmra.mrb[8].mxu1 %vm390_vm4, %v1263_v40 }
0x10cd   : > { %2573 = vmatpush3.bf16.msra.mxu1 %v2876_v8  ;;  %2475 = vmatprep.mubr.msk.f32.mxu1 %vm2813_vm0, %v2814_v1 }
0x10ce   : > { %2574 = vmatprep.subr.bf16.mxu1 %v2812_v0 }
0x10d1   : > { %2576 = vmatpush3.bf16.msra.mxu1 %v2880_v12 }
0x10d2   : > { %2583 = vmatprep.subr.bf16.mxu1 %v2812_v0 }
0x119f   : > { %v1332_v42 = vpop.f32.mrb[8].mxu1 }
0x11a0   : > { %v1337_v43 = vrot.slane %v1332_v42, 1  ;;  %v1340_v44 = vadd.f32 %v1332_v42, %v1258_v41  ;;  %v2455_v45 = vpop.f32.mrb[9].mxu1 }
0x11a2   : > { %v1341_v47 = vadd.f32 %v1337_v43, %v1259_v46  ;;  %2708 = vtanh.f32 %v1340_v44  ;;  %v2259_v50 = vmul.f32 -1.442695, %v1340_v44 }
0x11a4   : > { %2710 = vtanh.f32 %v1341_v47  ;;  %v2260_v51 = vmul.f32 -1.442695, %v1341_v47 }
0x11a5   : > { %2712 = vpow2.f32 %v2259_v50 }
0x11a6   : > { %2714 = vpow2.f32 %v2260_v51 }
0x11ac   : > { %v2709_v48 = vpop.eup %2708 }
0x11ad   : > { %1360 = vrot.lane.b32.xlu1 %v2709_v48, %s2815_s13 }
0x11ae   : > { %v2711_v49 = vpop.eup %2710 }
0x11af   : > { %1362 = vrot.lane.b32.xlu0 %v2711_v49, %s2815_s13  ;;  %v2713_v54 = vpop.eup %2712 }
0x11b0   : > { %v2715_v55 = vpop.eup %2714  ;;  %v1348_v58 = vadd.f32 1.0, %v2713_v54 }
0x11b1   : > { %v1349_v59 = vadd.f32 1.0, %v2715_v55 }
0x11b2   : > { %2716 = vrcp.f32 %v1348_v58 }
0x11b3   : > { %2718 = vrcp.f32 %v1349_v59 }
0x11bc   : > { %v2717_v60 = vpop.eup %2716 }
0x11bd   : > { %v2719_v63 = vpop.eup %2718  ;;  %v1356_v4 = vmul.f32 %v2717_v60, %v1231_v26 }
0x11be   : > { %v1357_v7 = vmul.f32 %v2719_v63, %v1232_v29 }
0x121f   : > { %v1361_v61 = vpop.permute.xlu1 %1360 }
0x1220   : > { %v1366_v62 = vmul.f32 %v2717_v60, %v1361_v61 }
0x1221   : > { %v1363_v2 = vpop.permute.xlu0 %1362 }
0x1222   : > { %1370 = vrot.lane.b32.xlu1 %v1366_v62, %s2816_s14  ;;  %v1367_v3 = vmul.f32 %v2719_v63, %v1363_v2 }
0x1224   : > { %1372 = vrot.lane.b32.xlu0 %v1367_v3, %s2816_s14 }
0x1294   : > { %v1371_v5 = vpop.permute.xlu1 %1370 }
0x1295   : > { %v1376_v6 = vadd.f32 %v1371_v5, %v1356_v4 }
0x1296   : > { %v1373_v9 = vpop.permute.xlu0 %1372 }
0x1297   : > { %2720 = vtanh.f32 %v1376_v6  ;;  %v1377_v10 = vadd.f32 %v1373_v9, %v1357_v7  ;;  %v1548_v7 = vld [vmem:[%s1547_s8] sm:$0x1] }
0x1299   : > { %2722 = vtanh.f32 %v1377_v10 }
0x12a1   : > { %v2721_v14 = vpop.eup %2720 }
0x12a2   : > { %1382 = vrot.lane.b32.xlu1 %v2721_v14, %s2815_s13 }
0x12a3   : > { %v2723_v15 = vpop.eup %2722 }
0x12a4   : > { %1384 = vrot.lane.b32.xlu0 %v2723_v15, %s2815_s13 }
0x1314   : > { %v1383_v16 = vpop.permute.xlu1 %1382 }
0x1315   : > { %v3102_v20 = vmul.f32 %v2717_v60, %v1383_v16  ;;  %v1549_v16 = vld [vmem:[%s1547_s8 + $0x10] sm:$0x1] }
0x1316   : > { %v1385_v17 = vpop.permute.xlu0 %1384 }
0x1317   : > { %v3100_v18 = vmul.f32 %v2719_v63, %v1385_v17 }
0x1319   : > { %v1405_v21 = vrot.slane %v3100_v18, 7 }
0x131b   : > { %v1406_v23 = vsel %vm535_vm3, %v1405_v21, %v3102_v20 }
0x131c   : > { %1407 = vrot.lane.b32.xlu0 %v1406_v23, %s2816_s14 }
0x138e   : > { %v1408_v24 = vpop.permute.xlu0 %1407 }
0x138f   : > { %2465 = vmatmul.mubr.msk.f32.vlgmr.msra.gmra.mrb[10].mxu0 %vm390_vm4, %v1408_v24 }
0x1390   : > { %2579 = vmatpush3.bf16.msra.mxu0 %v2876_v8  ;;  %2486 = vmatprep.mubr.msk.f32.mxu0 %vm2813_vm0, %v2814_v1 }
0x1391   : > { %2580 = vmatprep.subr.bf16.mxu0 %v2812_v0 }
0x1394   : > { %2582 = vmatpush3.bf16.msra.mxu0 %v2880_v12 }
0x1395   : > { %2589 = vmatprep.subr.bf16.mxu0 %v2812_v0 }
0x1462   : > { %v1477_v26 = vpop.f32.mrb[10].mxu0 }
0x1463   : > { %v1482_v27 = vrot.slane %v1477_v26, 1  ;;  %v1485_v28 = vadd.f32 %v1477_v26, %v1403_v25  ;;  %v2466_v29 = vpop.f32.mrb[11].mxu0 }
0x1465   : > { %v1486_v31 = vadd.f32 %v1482_v27, %v1404_v30  ;;  %2724 = vtanh.f32 %v1485_v28  ;;  %v2262_v38 = vmul.f32 -1.442695, %v1485_v28 }
0x1467   : > { %2726 = vtanh.f32 %v1486_v31  ;;  %v2263_v39 = vmul.f32 -1.442695, %v1486_v31 }
0x1468   : > { %2728 = vpow2.f32 %v2262_v38 }
0x1469   : > { %2730 = vpow2.f32 %v2263_v39 }
0x146f   : > { %v2725_v32 = vpop.eup %2724 }
0x1470   : > { %1505 = vrot.lane.b32.xlu0 %v2725_v32, %s2815_s13 }
0x1471   : > { %v2727_v33 = vpop.eup %2726 }
0x1472   : > { %1507 = vrot.lane.b32.xlu1 %v2727_v33, %s2815_s13  ;;  %v2729_v40 = vpop.eup %2728 }
0x1473   : > { %v2731_v41 = vpop.eup %2730  ;;  %v1493_v42 = vadd.f32 1.0, %v2729_v40 }
0x1474   : > { %v1494_v43 = vadd.f32 1.0, %v2731_v41 }
0x1475   : > { %2732 = vrcp.f32 %v1493_v42 }
0x1476   : > { %2734 = vrcp.f32 %v1494_v43 }
0x147f   : > { %v2733_v44 = vpop.eup %2732 }
0x1480   : > { %v2735_v47 = vpop.eup %2734  ;;  %v1501_v50 = vmul.f32 %v2733_v44, %v1376_v6 }
0x1481   : > { %v1502_v55 = vmul.f32 %v2735_v47, %v1377_v10 }
0x14e2   : > { %v1506_v45 = vpop.permute.xlu0 %1505 }
0x14e3   : > { %v1511_v46 = vmul.f32 %v2733_v44, %v1506_v45 }
0x14e4   : > { %v1508_v48 = vpop.permute.xlu1 %1507 }
0x14e5   : > { %1515 = vrot.lane.b32.xlu0 %v1511_v46, %s2816_s14  ;;  %v1512_v49 = vmul.f32 %v2735_v47, %v1508_v48 }
0x14e7   : > { %1517 = vrot.lane.b32.xlu1 %v1512_v49, %s2816_s14 }
0x1557   : > { %v1516_v51 = vpop.permute.xlu0 %1515 }
0x1558   : > { %v1521_v54 = vadd.f32 %v1516_v51, %v1501_v50 }
0x1559   : > { %v1518_v58 = vpop.permute.xlu1 %1517 }
0x155a   : > { %2736 = vtanh.f32 %v1521_v54  ;;  %v1522_v59 = vadd.f32 %v1518_v58, %v1502_v55 }
0x155c   : > { %2738 = vtanh.f32 %v1522_v59 }
0x1564   : > { %v2737_v60 = vpop.eup %2736 }
0x1565   : > { %1527 = vrot.lane.b32.xlu0 %v2737_v60, %s2815_s13 }
0x1566   : > { %v2739_v61 = vpop.eup %2738 }
0x1567   : > { %1529 = vrot.lane.b32.xlu1 %v2739_v61, %s2815_s13 }
0x15d7   : > { %v1528_v62 = vpop.permute.xlu0 %1527 }
0x15d8   : > { %v3128_v3 = vmul.f32 %v2733_v44, %v1528_v62 }
0x15d9   : > { %v1530_v63 = vpop.permute.xlu1 %1529 }
0x15da   : > { %v3126_v2 = vmul.f32 %v2735_v47, %v1530_v63 }
0x15dc   : > { %v1550_v4 = vrot.slane %v3126_v2, 7 }
0x15de   : > { %v1551_v5 = vsel %vm535_vm3, %v1550_v4, %v3128_v3  ;;  %v1694_v4 = vld [vmem:[%s1692_s10 + $0x10] sm:$0x1] }
0x15df   : > { %1552 = vrot.lane.b32.xlu1 %v1551_v5, %s2816_s14 }
0x1651   : > { %v1553_v6 = vpop.permute.xlu1 %1552 }
0x1652   : > { %2476 = vmatmul.mubr.msk.f32.vlgmr.msra.gmra.mrb[10].mxu1 %vm390_vm4, %v1553_v6 }
0x1653   : > { %2585 = vmatpush3.bf16.msra.mxu1 %v2876_v8  ;;  %2497 = vmatprep.mubr.msk.f32.mxu1 %vm2813_vm0, %v2814_v1 }
0x1654   : > { %2586 = vmatprep.subr.bf16.mxu1 %v2812_v0 }
0x1657   : > { %2588 = vmatpush3.bf16.msra.mxu1 %v2880_v12 }
0x1725   : > { %v1622_v9 = vpop.f32.mrb[10].mxu1 }
0x1726   : > { %v1627_v10 = vrot.slane %v1622_v9, 1  ;;  %v1630_v14 = vadd.f32 %v1622_v9, %v1548_v7  ;;  %v2477_v15 = vpop.f32.mrb[11].mxu1 }
0x1728   : > { %v1631_v17 = vadd.f32 %v1627_v10, %v1549_v16  ;;  %2740 = vtanh.f32 %v1630_v14  ;;  %v2265_v24 = vmul.f32 -1.442695, %v1630_v14 }
0x172a   : > { %2742 = vtanh.f32 %v1631_v17  ;;  %v2266_v25 = vmul.f32 -1.442695, %v1631_v17 }
0x172b   : > { %2744 = vpow2.f32 %v2265_v24 }
0x172c   : > { %2746 = vpow2.f32 %v2266_v25 }
0x1732   : > { %v2741_v21 = vpop.eup %2740 }
0x1733   : > { %1650 = vrot.lane.b32.xlu1 %v2741_v21, %s2815_s13 }
0x1734   : > { %v2743_v23 = vpop.eup %2742 }
0x1735   : > { %1652 = vrot.lane.b32.xlu0 %v2743_v23, %s2815_s13  ;;  %v2745_v26 = vpop.eup %2744 }
0x1736   : > { %v2747_v27 = vpop.eup %2746  ;;  %v1638_v28 = vadd.f32 1.0, %v2745_v26 }
0x1737   : > { %v1639_v29 = vadd.f32 1.0, %v2747_v27 }
0x1738   : > { %2748 = vrcp.f32 %v1638_v28 }
0x1739   : > { %2750 = vrcp.f32 %v1639_v29 }
0x1742   : > { %v2749_v30 = vpop.eup %2748 }
0x1743   : > { %v2751_v33 = vpop.eup %2750  ;;  %v1646_v40 = vmul.f32 %v2749_v30, %v1521_v54 }
0x1744   : > { %v1647_v43 = vmul.f32 %v2751_v33, %v1522_v59  ;;  %v1693_v59 = vld [vmem:[%s1692_s10] sm:$0x1] }
0x17a5   : > { %v1651_v31 = vpop.permute.xlu1 %1650 }
0x17a6   : > { %v1656_v32 = vmul.f32 %v2749_v30, %v1651_v31 }
0x17a7   : > { %v1653_v38 = vpop.permute.xlu0 %1652 }
0x17a8   : > { %1660 = vrot.lane.b32.xlu1 %v1656_v32, %s2816_s14  ;;  %v1657_v39 = vmul.f32 %v2751_v33, %v1653_v38 }
0x17aa   : > { %1662 = vrot.lane.b32.xlu0 %v1657_v39, %s2816_s14 }
0x181a   : > { %v1661_v41 = vpop.permute.xlu1 %1660 }
0x181b   : > { %v1666_v42 = vadd.f32 %v1661_v41, %v1646_v40 }
0x181c   : > { %v1663_v44 = vpop.permute.xlu0 %1662 }
0x181d   : > { %2752 = vtanh.f32 %v1666_v42  ;;  %v1667_v45 = vadd.f32 %v1663_v44, %v1647_v43  ;;  %v1838_v43 = vld [vmem:[%s1837_s20] sm:$0x1] }
0x181f   : > { %2754 = vtanh.f32 %v1667_v45 }
0x1827   : > { %v2753_v46 = vpop.eup %2752 }
0x1828   : > { %1672 = vrot.lane.b32.xlu1 %v2753_v46, %s2815_s13 }
0x1829   : > { %v2755_v47 = vpop.eup %2754 }
0x182a   : > { %1674 = vrot.lane.b32.xlu0 %v2755_v47, %s2815_s13 }
0x189a   : > { %v1673_v48 = vpop.permute.xlu1 %1672 }
0x189b   : > { %v3153_v51 = vmul.f32 %v2749_v30, %v1673_v48  ;;  %v1839_v48 = vld [vmem:[%s1837_s20 + $0x10] sm:$0x1] }
0x189c   : > { %v1675_v49 = vpop.permute.xlu0 %1674 }
0x189d   : > { %v3151_v50 = vmul.f32 %v2751_v33, %v1675_v49 }
0x189f   : > { %v1695_v54 = vrot.slane %v3151_v50, 7 }
0x18a1   : > { %v1696_v55 = vsel %vm535_vm3, %v1695_v54, %v3153_v51 }
0x18a2   : > { %1697 = vrot.lane.b32.xlu0 %v1696_v55, %s2816_s14 }
0x1914   : > { %v1698_v58 = vpop.permute.xlu0 %1697 }
0x1915   : > { %2487 = vmatmul.mubr.msk.f32.vlgmr.msra.gmra.mrb[12].mxu0 %vm390_vm4, %v1698_v58 }
0x1916   : > { %2591 = vmatpush3.bf16.msra.mxu0 %v2876_v8  ;;  %2508 = vmatprep.mubr.msk.f32.mxu0 %vm2813_vm0, %v2814_v1 }
0x1917   : > { %2592 = vmatprep.subr.bf16.mxu0 %v2812_v0 }
0x191a   : > { %2594 = vmatpush3.bf16.msra.mxu0 %v2880_v12 }
0x19e8   : > { %v1767_v60 = vpop.f32.mrb[12].mxu0 }
0x19e9   : > { %v1772_v61 = vrot.slane %v1767_v60, 1  ;;  %v1775_v62 = vadd.f32 %v1767_v60, %v1693_v59  ;;  %v2488_v63 = vpop.f32.mrb[13].mxu0 }
0x19eb   : > { %v1776_v5 = vadd.f32 %v1772_v61, %v1694_v4  ;;  %2756 = vtanh.f32 %v1775_v62  ;;  %v2268_v1 = vmul.f32 -1.442695, %v1775_v62 }
0x19ed   : > { %2758 = vtanh.f32 %v1776_v5  ;;  %v2269_v12 = vmul.f32 -1.442695, %v1776_v5 }
0x19ee   : > { %2760 = vpow2.f32 %v2268_v1 }
0x19ef   : > { %2762 = vpow2.f32 %v2269_v12 }
0x19f5   : > { %v2757_v8 = vpop.eup %2756 }
0x19f6   : > { %1795 = vrot.lane.b32.xlu0 %v2757_v8, %s2815_s13 }
0x19f7   : > { %v2759_v0 = vpop.eup %2758 }
0x19f8   : > { %1797 = vrot.lane.b32.xlu1 %v2759_v0, %s2815_s13  ;;  %v2761_v6 = vpop.eup %2760 }
0x19f9   : > { %v2763_v7 = vpop.eup %2762  ;;  %v1783_v9 = vadd.f32 1.0, %v2761_v6 }
0x19fa   : > { %v1784_v10 = vadd.f32 1.0, %v2763_v7 }
0x19fb   : > { %2764 = vrcp.f32 %v1783_v9 }
0x19fc   : > { %2766 = vrcp.f32 %v1784_v10 }
0x1a05   : > { %v2765_v14 = vpop.eup %2764 }
0x1a06   : > { %v2767_v17 = vpop.eup %2766  ;;  %v1791_v24 = vmul.f32 %v2765_v14, %v1666_v42 }
0x1a07   : > { %v1792_v27 = vmul.f32 %v2767_v17, %v1667_v45 }
0x1a68   : > { %v1796_v15 = vpop.permute.xlu0 %1795 }
0x1a69   : > { %v1801_v16 = vmul.f32 %v2765_v14, %v1796_v15 }
0x1a6a   : > { %v1798_v21 = vpop.permute.xlu1 %1797 }
0x1a6b   : > { %1805 = vrot.lane.b32.xlu0 %v1801_v16, %s2816_s14  ;;  %v1802_v23 = vmul.f32 %v2767_v17, %v1798_v21 }
0x1a6d   : > { %1807 = vrot.lane.b32.xlu1 %v1802_v23, %s2816_s14 }
0x1add   : > { %v1806_v25 = vpop.permute.xlu0 %1805 }
0x1ade   : > { %v1811_v26 = vadd.f32 %v1806_v25, %v1791_v24 }
0x1adf   : > { %v1808_v28 = vpop.permute.xlu1 %1807 }
0x1ae0   : > { %2768 = vtanh.f32 %v1811_v26  ;;  %v1812_v29 = vadd.f32 %v1808_v28, %v1792_v27 }
0x1ae2   : > { %2770 = vtanh.f32 %v1812_v29 }
0x1aea   : > { %v2769_v30 = vpop.eup %2768 }
0x1aeb   : > { %1817 = vrot.lane.b32.xlu0 %v2769_v30, %s2815_s13 }
0x1aec   : > { %v2771_v31 = vpop.eup %2770 }
0x1aed   : > { %1819 = vrot.lane.b32.xlu1 %v2771_v31, %s2815_s13 }
0x1b5d   : > { %v1818_v32 = vpop.permute.xlu0 %1817 }
0x1b5e   : > { %v3178_v39 = vmul.f32 %v2765_v14, %v1818_v32 }
0x1b5f   : > { %v1820_v33 = vpop.permute.xlu1 %1819 }
0x1b60   : > { %v3176_v38 = vmul.f32 %v2767_v17, %v1820_v33 }
0x1b62   : > { %v1840_v40 = vrot.slane %v3176_v38, 7 }
0x1b64   : > { %v1841_v41 = vsel %vm535_vm3, %v1840_v40, %v3178_v39  ;;  %v1984_v40 = vld [vmem:[%s1982_s24 + $0x10] sm:$0x1] }
0x1b65   : > { %1842 = vrot.lane.b32.xlu1 %v1841_v41, %s2816_s14 }
0x1bd7   : > { %v1843_v42 = vpop.permute.xlu1 %1842 }
0x1bd8   : > { %2498 = vmatmul.mubr.msk.f32.vlgmr.msra.gmra.mrb[12].mxu1 %vm390_vm4, %v1843_v42 }
0x1cab   : > { %v1912_v44 = vpop.f32.mrb[12].mxu1 }
0x1cac   : > { %v1917_v45 = vrot.slane %v1912_v44, 1  ;;  %v1920_v46 = vadd.f32 %v1912_v44, %v1838_v43  ;;  %v2499_v47 = vpop.f32.mrb[13].mxu1 }
0x1cae   : > { %v1921_v49 = vadd.f32 %v1917_v45, %v1839_v48  ;;  %2772 = vtanh.f32 %v1920_v46  ;;  %v2271_v58 = vmul.f32 -1.442695, %v1920_v46 }
0x1cb0   : > { %2774 = vtanh.f32 %v1921_v49  ;;  %v2272_v59 = vmul.f32 -1.442695, %v1921_v49 }
0x1cb1   : > { %2776 = vpow2.f32 %v2271_v58 }
0x1cb2   : > { %2778 = vpow2.f32 %v2272_v59 }
0x1cb8   : > { %v2773_v54 = vpop.eup %2772 }
0x1cb9   : > { %1940 = vrot.lane.b32.xlu1 %v2773_v54, %s2815_s13 }
0x1cba   : > { %v2775_v55 = vpop.eup %2774 }
0x1cbb   : > { %1942 = vrot.lane.b32.xlu0 %v2775_v55, %s2815_s13  ;;  %v2777_v60 = vpop.eup %2776 }
0x1cbc   : > { %v2779_v61 = vpop.eup %2778  ;;  %v1928_v62 = vadd.f32 1.0, %v2777_v60 }
0x1cbd   : > { %v1929_v63 = vadd.f32 1.0, %v2779_v61 }
0x1cbe   : > { %2780 = vrcp.f32 %v1928_v62 }
0x1cbf   : > { %2782 = vrcp.f32 %v1929_v63 }
0x1cc8   : > { %v2781_v4 = vpop.eup %2780 }
0x1cc9   : > { %v2783_v0 = vpop.eup %2782  ;;  %v1936_v6 = vmul.f32 %v2781_v4, %v1811_v26 }
0x1cca   : > { %v1937_v10 = vmul.f32 %v2783_v0, %v1812_v29  ;;  %v1983_v29 = vld [vmem:[%s1982_s24] sm:$0x1] }
0x1d2b   : > { %v1941_v5 = vpop.permute.xlu1 %1940 }
0x1d2c   : > { %v1946_v8 = vmul.f32 %v2781_v4, %v1941_v5 }
0x1d2d   : > { %v1943_v1 = vpop.permute.xlu0 %1942 }
0x1d2e   : > { %1950 = vrot.lane.b32.xlu1 %v1946_v8, %s2816_s14  ;;  %v1947_v12 = vmul.f32 %v2783_v0, %v1943_v1 }
0x1d30   : > { %1952 = vrot.lane.b32.xlu0 %v1947_v12, %s2816_s14 }
0x1da0   : > { %v1951_v7 = vpop.permute.xlu1 %1950 }
0x1da1   : > { %v1956_v9 = vadd.f32 %v1951_v7, %v1936_v6 }
0x1da2   : > { %v1953_v14 = vpop.permute.xlu0 %1952 }
0x1da3   : > { %2784 = vtanh.f32 %v1956_v9  ;;  %v1957_v15 = vadd.f32 %v1953_v14, %v1937_v10 }
0x1da5   : > { %2786 = vtanh.f32 %v1957_v15 }
0x1dad   : > { %v2785_v16 = vpop.eup %2784 }
0x1dae   : > { %1962 = vrot.lane.b32.xlu1 %v2785_v16, %s2815_s13 }
0x1daf   : > { %v2787_v17 = vpop.eup %2786 }
0x1db0   : > { %1964 = vrot.lane.b32.xlu0 %v2787_v17, %s2815_s13 }
0x1e20   : > { %v1963_v21 = vpop.permute.xlu1 %1962 }
0x1e21   : > { %v3198_v25 = vmul.f32 %v2781_v4, %v1963_v21 }
0x1e22   : > { %v1965_v23 = vpop.permute.xlu0 %1964 }
0x1e23   : > { %v3196_v24 = vmul.f32 %v2783_v0, %v1965_v23 }
0x1e25   : > { %v1985_v26 = vrot.slane %v3196_v24, 7 }
0x1e27   : > { %v1986_v27 = vsel %vm535_vm3, %v1985_v26, %v3198_v25 }
0x1e28   : > { %1987 = vrot.lane.b32.xlu0 %v1986_v27, %s2816_s14 }
0x1e9a   : > { %v1988_v28 = vpop.permute.xlu0 %1987 }
0x1e9b   : > { %2509 = vmatmul.mubr.msk.f32.vlgmr.msra.gmra.mrb[14].mxu0 %vm390_vm4, %v1988_v28 }
0x1f6e   : > { %v2057_v30 = vpop.f32.mrb[14].mxu0 }
0x1f6f   : > { %v2062_v31 = vrot.slane %v2057_v30, 1  ;;  %v2065_v32 = vadd.f32 %v2057_v30, %v1983_v29  ;;  %v2510_v33 = vpop.f32.mrb[15].mxu0 }
0x1f71   : > { %v2066_v41 = vadd.f32 %v2062_v31, %v1984_v40  ;;  %2788 = vtanh.f32 %v2065_v32  ;;  %v2274_v44 = vmul.f32 -1.442695, %v2065_v32 }
0x1f73   : > { %2790 = vtanh.f32 %v2066_v41  ;;  %v2275_v45 = vmul.f32 -1.442695, %v2066_v41 }
0x1f74   : > { %2792 = vpow2.f32 %v2274_v44 }
0x1f75   : > { %2794 = vpow2.f32 %v2275_v45 }
0x1f7b   : > { %v2789_v42 = vpop.eup %2788 }
0x1f7c   : > { %2085 = vrot.lane.b32.xlu1 %v2789_v42, %s2815_s13 }
0x1f7d   : > { %v2791_v43 = vpop.eup %2790 }
0x1f7e   : > { %2087 = vrot.lane.b32.xlu0 %v2791_v43, %s2815_s13  ;;  %v2793_v46 = vpop.eup %2792 }
0x1f7f   : > { %v2795_v47 = vpop.eup %2794  ;;  %v2073_v48 = vadd.f32 1.0, %v2793_v46 }
0x1f80   : > { %v2074_v49 = vadd.f32 1.0, %v2795_v47 }
0x1f81   : > { %2796 = vrcp.f32 %v2073_v48 }
0x1f82   : > { %2798 = vrcp.f32 %v2074_v49 }
0x1f8b   : > { %v2797_v54 = vpop.eup %2796 }
0x1f8c   : > { %v2799_v59 = vpop.eup %2798  ;;  %v2081_v62 = vmul.f32 %v2797_v54, %v1956_v9 }
0x1f8d   : > { %v2082_v5 = vmul.f32 %v2799_v59, %v1957_v15 }
0x1fee   : > { %v2086_v55 = vpop.permute.xlu1 %2085 }
0x1fef   : > { %v2091_v58 = vmul.f32 %v2797_v54, %v2086_v55 }
0x1ff0   : > { %v2088_v60 = vpop.permute.xlu0 %2087 }
0x1ff1   : > { %2095 = vrot.lane.b32.xlu1 %v2091_v58, %s2816_s14  ;;  %v2092_v61 = vmul.f32 %v2799_v59, %v2088_v60 }
0x1ff3   : > { %2097 = vrot.lane.b32.xlu0 %v2092_v61, %s2816_s14 }
0x2063   : > { %v2096_v63 = vpop.permute.xlu1 %2095 }
0x2064   : > { %v2101_v4 = vadd.f32 %v2096_v63, %v2081_v62 }
0x2065   : > { %v2098_v8 = vpop.permute.xlu0 %2097 }
0x2066   : > { %2800 = vtanh.f32 %v2101_v4  ;;  %v2102_v0 = vadd.f32 %v2098_v8, %v2082_v5 }
0x2068   : > { %2802 = vtanh.f32 %v2102_v0 }
0x2070   : > { %v2801_v1 = vpop.eup %2800 }
0x2071   : > { %2107 = vrot.lane.b32.xlu1 %v2801_v1, %s2815_s13 }
0x2072   : > { %v2803_v12 = vpop.eup %2802 }
0x2073   : > { %2109 = vrot.lane.b32.xlu0 %v2803_v12, %s2815_s13 }
0x2075   : > { %520 = vrot.lane.b32.xlu1 %v2947_v22, %s2816_s14 }
0x2077   : > { %522 = vrot.lane.b32.xlu0 %v2944_v19, %s2816_s14 }
0x2079   : > { %667 = vrot.lane.b32.xlu1 %v2972_v57, %s2816_s14 }
0x207b   : > { %669 = vrot.lane.b32.xlu0 %v2970_v56, %s2816_s14 }
0x207d   : > { %812 = vrot.lane.b32.xlu1 %v2998_v35, %s2816_s14 }
0x207f   : > { %814 = vrot.lane.b32.xlu0 %v2996_v34, %s2816_s14 }
0x2081   : > { %957 = vrot.lane.b32.xlu1 %v3024_v13, %s2816_s14 }
0x2083   : > { %959 = vrot.lane.b32.xlu0 %v3022_v11, %s2816_s14 }
0x2085   : > { %1102 = vrot.lane.b32.xlu1 %v3050_v53, %s2816_s14 }
0x2087   : > { %1104 = vrot.lane.b32.xlu0 %v3048_v52, %s2816_s14 }
0x2089   : > { %1247 = vrot.lane.b32.xlu1 %v3076_v37, %s2816_s14 }
0x208b   : > { %1249 = vrot.lane.b32.xlu0 %v3074_v36, %s2816_s14 }
0x208d   : > { %1392 = vrot.lane.b32.xlu1 %v3102_v20, %s2816_s14 }
0x208f   : > { %1394 = vrot.lane.b32.xlu0 %v3100_v18, %s2816_s14 }
0x2091   : > { %1537 = vrot.lane.b32.xlu1 %v3128_v3, %s2816_s14 }
0x2093   : > { %1539 = vrot.lane.b32.xlu0 %v3126_v2, %s2816_s14 }
0x2095   : > { %1682 = vrot.lane.b32.xlu1 %v3153_v51, %s2816_s14 }
0x2097   : > { %1684 = vrot.lane.b32.xlu0 %v3151_v50, %s2816_s14 }
0x2099   : > { %1827 = vrot.lane.b32.xlu1 %v3178_v39, %s2816_s14 }
0x209b   : > { %1829 = vrot.lane.b32.xlu0 %v3176_v38, %s2816_s14 }
0x209d   : > { %1972 = vrot.lane.b32.xlu1 %v3198_v25, %s2816_s14 }
0x209f   : > { %1974 = vrot.lane.b32.xlu0 %v3196_v24, %s2816_s14 }
0x20e3   : > { %v2108_v19 = vpop.permute.xlu1 %2107 }
0x20e4   : > { %v2113_v22 = vmul.f32 %v2797_v54, %v2108_v19 }
0x20e5   : > { %v2110_v56 = vpop.permute.xlu0 %2109 }
0x20e6   : > { %2117 = vrot.lane.b32.xlu1 %v2113_v22, %s2816_s14  ;;  %v2114_v57 = vmul.f32 %v2799_v59, %v2110_v56 }
0x20e7   : > { %v521_v34 = vpop.permute.xlu1 %520 }
0x20e8   : > { %528 = vst.msk [vmem:[%s526_s28] sm:$0x1] %vm527_vm5, %v521_v34  ;;  %2119 = vrot.lane.b32.xlu0 %v2114_v57, %s2816_s14  ;;  %s1108_s14 = scalar_lea.vmem %s3265_s26, %s3039_s25  ;;  %s1688_s25 = scalar_lea.vmem %s3265_s26, %s3142_s7 }
0x20e9   : > { %v523_v35 = vpop.permute.xlu0 %522 }
0x20ea   : > { %529 = vst.msk [vmem:[%s526_s28 + $0x10] sm:$0x1] %vm527_vm5, %v523_v35 }
0x20eb   : > { %v668_v11 = vpop.permute.xlu1 %667 }
0x20ec   : > { %674 = vst.msk [vmem:[%s673_s17] sm:$0x1] %vm527_vm5, %v668_v11 }
0x20ed   : > { %v670_v13 = vpop.permute.xlu0 %669 }
0x20ee   : > { %675 = vst.msk [vmem:[%s673_s17 + $0x10] sm:$0x1] %vm527_vm5, %v670_v13 }
0x20ef   : > { %v813_v52 = vpop.permute.xlu1 %812 }
0x20f0   : > { %819 = vst.msk [vmem:[%s818_s19] sm:$0x1] %vm527_vm5, %v813_v52 }
0x20f1   : > { %v815_v53 = vpop.permute.xlu0 %814 }
0x20f2   : > { %820 = vst.msk [vmem:[%s818_s19 + $0x10] sm:$0x1] %vm527_vm5, %v815_v53 }
0x20f3   : > { %v958_v36 = vpop.permute.xlu1 %957 }
0x20f4   : > { %964 = vst.msk [vmem:[%s963_s11] sm:$0x1] %vm527_vm5, %v958_v36 }
0x20f5   : > { %v960_v37 = vpop.permute.xlu0 %959 }
0x20f6   : > { %965 = vst.msk [vmem:[%s963_s11 + $0x10] sm:$0x1] %vm527_vm5, %v960_v37 }
0x20f7   : > { %v1103_v18 = vpop.permute.xlu1 %1102 }
0x20f8   : > { %1109 = vst.msk [vmem:[%s1108_s14] sm:$0x1] %vm527_vm5, %v1103_v18 }
0x20f9   : > { %v1105_v20 = vpop.permute.xlu0 %1104 }
0x20fa   : > { %1110 = vst.msk [vmem:[%s1108_s14 + $0x10] sm:$0x1] %vm527_vm5, %v1105_v20 }
0x20fb   : > { %v1248_v2 = vpop.permute.xlu1 %1247 }
0x20fc   : > { %1254 = vst.msk [vmem:[%s1253_s18] sm:$0x1] %vm527_vm5, %v1248_v2 }
0x20fd   : > { %v1250_v3 = vpop.permute.xlu0 %1249 }
0x20fe   : > { %1255 = vst.msk [vmem:[%s1253_s18 + $0x10] sm:$0x1] %vm527_vm5, %v1250_v3 }
0x20ff   : > { %v1393_v50 = vpop.permute.xlu1 %1392 }
0x2100   : > { %1399 = vst.msk [vmem:[%s1398_s21] sm:$0x1] %vm527_vm5, %v1393_v50 }
0x2101   : > { %v1395_v51 = vpop.permute.xlu0 %1394 }
0x2102   : > { %1400 = vst.msk [vmem:[%s1398_s21 + $0x10] sm:$0x1] %vm527_vm5, %v1395_v51 }
0x2103   : > { %v1538_v38 = vpop.permute.xlu1 %1537 }
0x2104   : > { %1544 = vst.msk [vmem:[%s1543_s23] sm:$0x1] %vm527_vm5, %v1538_v38 }
0x2105   : > { %v1540_v39 = vpop.permute.xlu0 %1539 }
0x2106   : > { %1545 = vst.msk [vmem:[%s1543_s23 + $0x10] sm:$0x1] %vm527_vm5, %v1540_v39 }
0x2107   : > { %v1683_v6 = vpop.permute.xlu1 %1682 }
0x2108   : > { %1689 = vst.msk [vmem:[%s1688_s25] sm:$0x1] %vm527_vm5, %v1683_v6 }
0x2109   : > { %v1685_v7 = vpop.permute.xlu0 %1684 }
0x210a   : > { %1690 = vst.msk [vmem:[%s1688_s25 + $0x10] sm:$0x1] %vm527_vm5, %v1685_v7 }
0x210b   : > { %v1828_v9 = vpop.permute.xlu1 %1827 }
0x210c   : > { %1834 = vst.msk [vmem:[%s1833_s27] sm:$0x1] %vm527_vm5, %v1828_v9 }
0x210d   : > { %v1830_v10 = vpop.permute.xlu0 %1829 }
0x210e   : > { %1835 = vst.msk [vmem:[%s1833_s27 + $0x10] sm:$0x1] %vm527_vm5, %v1830_v10 }
0x210f   : > { %v1973_v14 = vpop.permute.xlu1 %1972 }
0x2110   : > { %1979 = vst.msk [vmem:[%s1978_s29] sm:$0x1] %vm527_vm5, %v1973_v14 }
0x2111   : > { %v1975_v15 = vpop.permute.xlu0 %1974 }
0x2112   : > { %1980 = vst.msk [vmem:[%s1978_s29 + $0x10] sm:$0x1] %vm527_vm5, %v1975_v15 }
0x2158   : > { %v2118_v16 = vpop.permute.xlu1 %2117 }
0x2159   : > { %2124 = vst.msk [vmem:[%s2123_s30] sm:$0x1] %vm527_vm5, %v2118_v16 }
0x215a   : > { %v2120_v17 = vpop.permute.xlu0 %2119 }
0x215b   : > { %2125 = vst.msk [vmem:[%s2123_s30 + $0x10] sm:$0x1] %vm527_vm5, %v2120_v17 }
0x215c PF: > { %s14_s15 = sadd.s32 1, %s2810_s15  }
0x215d   : > { %p11_p5 = scmp.ge.s32.totalorder %s14_s15, 4  }
0x215f   :  { %13 = sbr.rel (!%p11_p5) target bundleno = 1 (0x1), region = 96 }

// kernel: document_reader_forward.7
= control target key start
LH: loop header
LB: loop body
LE: loop exit
PB: predicated region body
PF: predicated region fallthrough
CT: control target
= control target key end

     0   :  { %vm46_vm0 = vcmask 523264   ;;  %v551_v8 = vmov 0   ;;  %vm68_vm2 = vcmask 7168   ;;  %v552_v59 = vmov 0.0|0.0   ;;  %s556_s12 = smov 64   ;;  %s707_s0 = inlined_call_operand.vmem [shape: f32[2,8,64], index: 0, kind: input, shape index: {}]   ;;  %s708_s4 = inlined_call_operand.vmem [shape: f32[1,64], index: 4, kind: input, shape index: {}]   ;;  %s709_s5 = inlined_call_operand.<no memory space> [shape: f32[1,1], index: 5, kind: input, shape index: {}]   ;;  %s710_s2 = inlined_call_operand.vmem [shape: s32[2,8,1], index: 2, kind: input, shape index: {}]   ;;  %s711_s6 = inlined_call_operand.vmem [shape: f32[64,128], index: 6, kind: input, shape index: {}]   ;;  %s712_s1 = inlined_call_operand.vmem [shape: f32[2,12,64], index: 1, kind: input, shape index: {}]   ;;  %s713_s7 = inlined_call_operand.vmem [shape: f32[1,128], index: 7, kind: input, shape index: {}]   ;;  %s714_s3 = inlined_call_operand.vmem [shape: s32[2,1,12], index: 3, kind: input, shape index: {}]   ;;  %s715_s8 = inlined_call_operand.vmem [shape: f32[2,2,12], index: 8, kind: output, shape index: {}]  }
   0x1   :  { %v605_v0 = vld [vmem:[%s707_s0] sm:$0xff]  ;;  %v613_v2 = vld [vmem:[%s707_s0 + $0x8] sm:$0xff]  ;;  %v13_v3 = vstv %s709_s5  ;;  %537 = vset.pattern.permute.xlu1 %v551_v8  ;;  %538 = vset.pattern.permute.xlu0 %v551_v8  ;;  %v135_v60 = vld [vmem:[%s711_s6 + $0x10] sm:$0xff]  ;;  %vm553_vm4 = vmmov 0   ;;  %vm150_vm5 = vcmask 1041409   ;;  %vm263_vm7 = vcmask 1040384  }
   0x2   :  { %v453_v1 = vld [vmem:[%s708_s4] ss:$0 sm:$0xff]  ;;  %14 = vst [vmem:[#allocation2] sm:$0x1] %v13_v3  ;;  %v63_v13 = vld [vmem:[%s710_s2 + $0x8] sm:$0xff]  ;;  %511 = vmatprep.subr.bf16.mxu0 %v552_v59  ;;  %523 = vmatprep.subr.bf16.mxu1 %v552_v59  ;;  %v136_v61 = vld [vmem:[%s711_s6 + $0x18] sm:$0xff] }
   0x3   :  { %v44_v4 = vmul.f32 %v453_v1, %v605_v0  ;;  %v45_v5 = vmul.f32 %v453_v1, %v613_v2  ;;  %v62_v9 = vld [vmem:[%s710_s2] sm:$0xff]  ;;  %vm65_vm3 = vcmp.ne.s32.totalorder %v63_v13, 0  ;;  %v134_v57 = vld [vmem:[%s711_s6 + $0x8] sm:$0xff]  ;;  %v515_v62 = vpack.c.bf16 %v136_v61, %v135_v60  ;;  %vm673_vm6 = vmpackc.low %vm46_vm0, %vm46_vm0 }
   0x4   :  { %vm64_vm1 = vcmp.ne.s32.totalorder %v62_v9, 0  ;;  %v133_v56 = vld [vmem:[%s711_s6] sm:$0xff]  ;;  %v138_v1 = vld [vmem:[%s711_s6 + $0x28] sm:$0xff]  ;;  %vm446_vm12 = vcmask 91136  }
   0x5   :  { %v47_v6 = vsel %vm46_vm0, %v44_v4, 0.0  ;;  %v50_v7 = vsel %vm46_vm0, %v45_v5, 0.0  ;;  %v512_v58 = vpack.c.bf16 %v134_v57, %v133_v56  ;;  %v137_v63 = vld [vmem:[%s711_s6 + $0x20] sm:$0xff]  ;;  %v139_v4 = vld [vmem:[%s711_s6 + $0x30] sm:$0xff]  ;;  %v140_v5 = vld [vmem:[%s711_s6 + $0x38] sm:$0xff] }
   0x6   :  { %48 = vadd.xlane.f32.xlu0 %v47_v6  ;;  %v518_v3 = vpack.c.bf16 %v138_v1, %v137_v63  ;;  %v521_v6 = vpack.c.bf16 %v140_v5, %v139_v4  ;;  %v425_v56 = vld [vmem:[%s714_s3 + $0x1] sm:$0x1] }
   0x7   :  { %513 = vmatpush3.bf16.msra.mxu0 %v512_v58  ;;  %vm427_vm9 = vcmp.ne.s32.totalorder %v425_v56, 0 }
   0x8   :  { %514 = vmatprep.subr.bf16.mxu0 %v552_v59  ;;  %v429_v58 = vsel %vm427_vm9, 1, %v551_v8 }
   0x9   :  { %v454_v10 = vld [vmem:[#allocation2] ss:$0 sm:$0xff] }
   0xa   :  { %51 = vadd.xlane.f32.xlu0 %v50_v7  ;;  %v554_v7 = vmov 0.0  }
   0xb   :  { %516 = vmatpush3.bf16.msra.mxu0 %v515_v62  ;;  %494 = vmatprep.mubr.msk.f32.mxu0 %vm553_vm4, %v554_v7 }
   0xc   :  { %517 = vmatprep.subr.bf16.mxu0 %v552_v59  ;;  %501 = vmatprep.mubr.msk.f32.mxu1 %vm553_vm4, %v554_v7 }
   0xf   :  { %519 = vmatpush3.bf16.msra.mxu0 %v518_v3 }
  0x10   :  { %520 = vmatprep.subr.bf16.mxu0 %v552_v59 }
  0x13   :  { %522 = vmatpush3.bf16.msra.mxu0 %v521_v6 }
  0x93   :  { %v49_v11 = vpop.xlane.xlu0 %48 }
  0x94   :  { %v60_v12 = vadd.f32 %v454_v10, %v49_v11 }
  0x96   :  { %v66_v14 = vsel %vm64_vm1, -inf, %v60_v12 }
  0x97   :  { %v69_v15 = vsel %vm68_vm2, %v66_v14, -inf  ;;  %v52_v16 = vpop.xlane.xlu0 %51 }
  0x98   :  { %v70_v17 = vrot.slane %v69_v15, 4  ;;  %v61_v18 = vadd.f32 %v454_v10, %v52_v16 }
  0x9a   :  { %v71_v19 = vmax.f32 %v69_v15, %v70_v17  ;;  %v67_v20 = vsel %vm65_vm3, -inf, %v61_v18 }
  0x9b   :  { %v76_v21 = vsel %vm68_vm2, %v67_v20, -inf }
  0x9c   :  { %v72_v22 = vrot.slane %v71_v19, 2  ;;  %v77_v23 = vrot.slane %v76_v21, 4 }
  0x9e   :  { %v73_v24 = vmax.f32 %v71_v19, %v72_v22  ;;  %v78_v25 = vmax.f32 %v76_v21, %v77_v23 }
  0xa0   :  { %v74_v26 = vrot.slane %v73_v24, 1  ;;  %v79_v27 = vrot.slane %v78_v25, 2 }
  0xa2   :  { %v75_v28 = vmax.f32 %v73_v24, %v74_v26  ;;  %v80_v29 = vmax.f32 %v78_v25, %v79_v27  ;;  %v34_v27 = vld [vmem:[%s712_s1 + $0x8] sm:$0xf] }
  0xa4   :  { %v83_v30 = vsub.f32 %v66_v14, %v75_v28  ;;  %v81_v31 = vrot.slane %v80_v29, 1 }
  0xa6   :  { %v85_v32 = vmul.f32 1.442695, %v83_v30  ;;  %v82_v33 = vmax.f32 %v80_v29, %v81_v31  ;;  %v555_v30 = vmov 1966171168  }
  0xa7   :  { %v226_v31 = vunpack.c.l.s4 %v555_v30 }
  0xa8   :  { %539 = vpow2.f32 %v85_v32  ;;  %v84_v34 = vsub.f32 %v67_v20, %v82_v33  ;;  %v228_v32 = vlaneseq }
  0xa9   :  { %v227_v33 = vunpack.c.0.s8 %v226_v31 }
  0xaa   :  { %v87_v35 = vmul.f32 1.442695, %v84_v34  ;;  %v229_v34 = vshrl.u32 %v228_v32, 7 }
  0xac   :  { %541 = vpow2.f32 %v87_v35  ;;  %v455_v35 = vld [vmem:[%s713_s7] ss:$0 sm:$0xff] }
  0xb2   :  { %v540_v36 = vpop.eup %539 }
  0xb3   :  { %v89_v37 = vsel %vm68_vm2, %v540_v36, 0.0 }
  0xb4   :  { %v90_v38 = vrot.slane %v89_v37, 4 }
  0xb6   :  { %v542_v39 = vpop.eup %541  ;;  %v91_v40 = vadd.f32 %v90_v38, %v89_v37 }
  0xb7   :  { %v96_v41 = vsel %vm68_vm2, %v542_v39, 0.0 }
  0xb8   :  { %v92_v42 = vrot.slane %v91_v40, 2  ;;  %v97_v43 = vrot.slane %v96_v41, 4 }
  0xba   :  { %v93_v44 = vadd.f32 %v92_v42, %v91_v40  ;;  %v98_v45 = vadd.f32 %v97_v43, %v96_v41  ;;  %v251_v41 = vsub.s32 0, %v229_v34 }
  0xbc   :  { %v99_v46 = vrot.slane %v98_v45, 2  ;;  %v94_v47 = vrot.slane %v93_v44, 1  ;;  %v437_v63 = vrot.slane %v429_v58, %v251_v41 }
  0xbe   :  { %v95_v48 = vadd.f32 %v94_v47, %v93_v44  ;;  %v100_v49 = vadd.f32 %v99_v46, %v98_v45  ;;  %v35_v47 = vld [vmem:[%s712_s1 + $0x10] sm:$0xff]  ;;  %vm439_vm11 = vcmp.eq.s32.totalorder %v437_v63, 1 }
  0xc0   :  { %543 = vrcp.f32 %v95_v48  ;;  %v101_v50 = vrot.slane %v100_v49, 1  ;;  %v36_v48 = vld [vmem:[%s712_s1 + $0x18] sm:$0xf] }
  0xc2   :  { %v102_v51 = vadd.f32 %v101_v50, %v100_v49  ;;  %v528_v49 = vpack.c.bf16 %v36_v48, %v35_v47 }
  0xc4   :  { %545 = vrcp.f32 %v102_v51 }
  0xca   :  { %v544_v52 = vpop.eup %543 }
  0xcb   :  { %v104_v53 = vmul.f32 %v544_v52, %v540_v36  ;;  %v230_v36 = vsub.s32 %v227_v33, %v229_v34 }
  0xcd   :  { %109 = vperm.xlu1 %537, %v104_v53  }
  0xce   :  { %v546_v54 = vpop.eup %545 }
  0xcf   :  { %v106_v55 = vmul.f32 %v546_v54, %v542_v39  ;;  %v424_v54 = vld [vmem:[%s714_s3] sm:$0x1] }
  0xd0   :  { %vm426_vm8 = vcmp.ne.s32.totalorder %v424_v54, 0 }
  0xd1   :  { %114 = vperm.xlu1 %537, %v106_v55   ;;  %v428_v55 = vsel %vm426_vm8, 1, %v551_v8 }
  0xd2   :  { %v433_v57 = vrot.slane %v428_v55, %v251_v41 }
  0xd4   :  { %vm438_vm10 = vcmp.eq.s32.totalorder %v433_v57, 1 }
 0x14c   :  { %v110_v9 = vpop.permute.xlu1 %109 }
 0x14d   :  { %v117_v10 = vmul.f32 %v110_v9, %v605_v0 }
 0x14f   :  { %v119_v11 = vsel %vm46_vm0, %v117_v10, 0.0 }
 0x150   :  { %v120_v12 = vrot.slane %v119_v11, 4  ;;  %v115_v13 = vpop.permute.xlu1 %114 }
 0x151   :  { %v118_v14 = vmul.f32 %v115_v13, %v613_v2  ;;  %v33_v2 = vld [vmem:[%s712_s1] sm:$0xff] }
 0x152   :  { %v121_v15 = vadd.f32 %v120_v12, %v119_v11  ;;  %v524_v29 = vpack.c.bf16 %v34_v27, %v33_v2 }
 0x153   :  { %v126_v16 = vsel %vm46_vm0, %v118_v14, 0.0 }
 0x154   :  { %v122_v17 = vrot.slane %v121_v15, 2  ;;  %v127_v18 = vrot.slane %v126_v16, 4  ;;  %526 = vmatpush3.bf16.xpose.msk.msra.mxu1 %vm673_vm6, %v524_v29 }
 0x155   :  { %527 = vmatprep.subr.bf16.mxu1 %v552_v59 }
 0x156   :  { %v123_v19 = vadd.f32 %v122_v17, %v121_v15  ;;  %v128_v20 = vadd.f32 %v127_v18, %v126_v16 }
 0x158   :  { %v129_v21 = vrot.slane %v128_v20, 2  ;;  %v124_v22 = vrot.slane %v123_v19, 1 }
 0x15a   :  { %v130_v23 = vadd.f32 %v129_v21, %v128_v20  ;;  %v125_v25 = vadd.f32 %v124_v22, %v123_v19 }
 0x15c   :  { %v131_v24 = vrot.slane %v130_v23, 1 }
 0x15e   :  { %v132_v0 = vadd.f32 %v131_v24, %v130_v23 }
 0x160   :  { %v151_v26 = vsel %vm150_vm5, %v132_v0, %v125_v25 }
 0x161   :  { %495 = vmatmul.mubr.msk.f32.vlgmr.msra.gmra.mrb[0].mxu0 %vm46_vm0, %v151_v26 }
 0x234   :  { %v220_v37 = vpop.f32.mrb[0].mxu0 }
 0x235   :  { %v221_v38 = vadd.f32 %v455_v35, %v220_v37  ;;  %v496_v39 = vpop.f32.mrb[1].mxu0 }
 0x237   :  { %v231_v40 = vrot.slane %v221_v38, %v230_v36 }
 0x239   :  { %v232_v42 = vcombine.high %v231_v40, %v231_v40  ;;  %v239_v43 = vrot.slane %v231_v40, %v230_v36 }
 0x23b   :  { %v252_v44 = vrot.slane %v239_v43, %v251_v41  ;;  %v246_v45 = vrot.slane %v232_v42, %v230_v36 }
 0x23d   :  { %257 = vrot.lane.b32.xlu0 %v252_v44, %s556_s12  ;;  %v256_v46 = vrot.slane %v246_v45, %v251_v41 }
 0x23f   :  { %259 = vrot.lane.b32.xlu1 %v256_v46, %s556_s12 }
 0x2af   :  { %v258_v50 = vpop.permute.xlu0 %257 }
 0x2b0   :  { %v264_v51 = vsel %vm263_vm7, %v239_v43, %v258_v50 }
 0x2b1   :  { %502 = vmatmul.mubr.msk.f32.vlgmr.msra.gmra.mrb[0].mxu1 %vm46_vm0, %v264_v51  ;;  %v260_v52 = vpop.permute.xlu1 %259 }
 0x2b2   :  { %530 = vmatpush3.bf16.xpose.msk.msra.mxu1 %vm673_vm6, %v528_v49  ;;  %508 = vmatprep.mubr.msk.f32.mxu1 %vm553_vm4, %v554_v7  ;;  %v265_v53 = vsel %vm263_vm7, %v246_v45, %v260_v52 }
 0x2b9   :  { %509 = vmatmul.mubr.msk.f32.vlgmr.msra.gmra.mrb[2].mxu1 %vm46_vm0, %v265_v53 }
 0x384   :  { %v341_v59 = vpop.f32.mrb[0].mxu1 }
 0x385   :  { %v440_v60 = vsel %vm438_vm10, -inf, %v341_v59  ;;  %v503_v61 = vpop.f32.mrb[1].mxu1 }
 0x386   :  { %v442_v62 = vmul.f32 1.442695, %v440_v60 }
 0x388   :  { %547 = vpow2.f32 %v442_v62 }
 0x38c   :  { %v420_v1 = vpop.f32.mrb[2].mxu1 }
 0x38d   :  { %v441_v3 = vsel %vm439_vm11, -inf, %v420_v1  ;;  %v510_v4 = vpop.f32.mrb[3].mxu1 }
 0x38e   :  { %v444_v5 = vmul.f32 1.442695, %v441_v3 }
 0x390   :  { %549 = vpow2.f32 %v444_v5 }
 0x392   :  { %v548_v6 = vpop.eup %547 }
 0x393   :  { %447 = vst.msk [vmem:[%s715_s8] sm:$0x3] %vm446_vm12, %v548_v6 }
 0x39a   :  { %v550_v7 = vpop.eup %549 }
 0x39b   :  { %448 = vst.msk [vmem:[%s715_s8 + $0x2] sm:$0x3] %vm446_vm12, %v550_v7 }

</bundles_post_ra>
